<compile_context>
chip_gen: v7x
topology: tpu7x:2x2x1
jax: 0.10.0
libtpu: 0.0.40
codegen_flags: <defaults>
</compile_context>

<pallas_src>
import functools

import jax
import jax.numpy as jnp
from jax import lax
from jax.experimental import pallas as pl
from jax.experimental.pallas import tpu as pltpu


# ------------------------------ Pallas kernel -------------------------------

def _encoder_layer_kernel(
    x_ref,
    wq_ref, bq_ref, wk_ref, bk_ref, wv_ref, bv_ref,
    wo_ref, bo_ref, w1_ref, b1_ref, w2_ref, b2_ref,
    g1_ref, be1_ref, g2_ref, be2_ref,
    o_ref,
    *, nhead, ln_eps):
  """One full TransformerEncoderLayer for a single batch element (S, E)."""
  f32 = jnp.float32
  bf16 = jnp.bfloat16

  x = x_ref[...].astype(f32)                      # (S, E) f32
  S, E = x.shape
  Dh = E // nhead

  xb = x.astype(bf16)

  def proj(w_ref, b_ref):
    # Weights are pre-transposed to (in, out): no in-kernel transpose.
    return jnp.dot(xb, w_ref[...], preferred_element_type=f32) + b_ref[...]

  def to_heads(t_f32):
    # (S, E) f32 -> (H, S, Dh) bf16.  Heads live on a leading axis, so every
    # per-head matmul is a clean contiguous tile (no lane-dim slicing).  The
    # f32 projection dies here; only the bf16 copy stays live.
    return jnp.swapaxes(t_f32.astype(bf16).reshape(S, nhead, Dh), 0, 1)

  qh = to_heads(proj(wq_ref, bq_ref))              # (H, S, Dh) bf16
  kh = to_heads(proj(wk_ref, bk_ref))
  vh = to_heads(proj(wv_ref, bv_ref))

  # Batched attention over the head axis (reference applies NO 1/sqrt(Dh)).
  s = jnp.einsum("hqd,hkd->hqk", qh, kh,
                 preferred_element_type=f32)       # (H, S, S) f32
  m = jnp.max(s, axis=-1, keepdims=True)
  p = jnp.exp(s - m)
  p = p * pl.reciprocal(jnp.sum(p, axis=-1, keepdims=True), approx=True)
  ctx = jnp.einsum("hqk,hkd->hqd", p.astype(bf16), vh,
                   preferred_element_type=f32)     # (H, S, Dh) f32
  # Recombine heads in bf16 (it is only consumed as bf16 by the out-proj);
  # halves the bytes moved by the head-recombination relayout.
  ctx = jnp.swapaxes(ctx.astype(bf16), 0, 1).reshape(S, E)   # (S, E) bf16

  attn_out = jnp.dot(ctx, wo_ref[...], preferred_element_type=f32) + bo_ref[...]

  def layernorm(y, g_ref, b_ref):
    mean = jnp.mean(y, axis=-1, keepdims=True)
    var = jnp.mean(jnp.square(y - mean), axis=-1, keepdims=True)
    return (y - mean) * lax.rsqrt(var + ln_eps) * g_ref[...] + b_ref[...]

  # residual add fused with LN (dropout1 is identity in eval mode)
  h1 = layernorm(x + attn_out, g1_ref, be1_ref)    # (S, E) f32

  ff = jnp.dot(h1.astype(bf16), w1_ref[...],
               preferred_element_type=f32) + b1_ref[...]
  # tanh-approx GELU (review-endorsed; difference vs erf GELU << tolerance)
  ff = jax.nn.gelu(ff, approximate=True)
  ff = jnp.dot(ff.astype(bf16), w2_ref[...],
               preferred_element_type=f32) + b2_ref[...]

  # residual add fused with LN (dropout2 is identity in eval mode)
  o_ref[...] = layernorm(h1 + ff, g2_ref, be2_ref).astype(o_ref.dtype)


# --------------------------------- wrapper ----------------------------------

def _const_index_map(rank):
  zeros = (0,) * rank
  return lambda n: zeros


def transformer_encoder_layer(src, params, nhead, ln_eps=1e-5):
  """src: (S, N, E) float32 -> (S, N, E) float32."""
  S, N, E = src.shape
  F = params["w1"].shape[1]
  assert E % nhead == 0

  # Batch-major layout so each grid step owns one contiguous (S, E) slab.
  x = jnp.transpose(src, (1, 0, 2))               # (N, S, E)

  weight_args = (
      params["wq"], params["bq"], params["wk"], params["bk"],
      params["wv"], params["bv"], params["wo"], params["bo"],
      params["w1"], params["b1"], params["w2"], params["b2"],
      params["ln1_g"], params["ln1_b"], params["ln2_g"], params["ln2_b"],
  )
  weight_bytes = sum(int(a.size) * a.dtype.itemsize for a in weight_args)

  x_spec = pl.BlockSpec((None, S, E), lambda n: (n, 0, 0))

  # Explicit scoped-VMEM budget: resident weights (single-buffered) +
  # double-buffered in/out activation blocks + in-kernel intermediate chain
  # (q/k/v, per-head scores, ctx, FFN activation).  Clamped to [32, 64] MiB so
  # it is valid headroom on v5e/v6e (128 MiB physical) and v7x (64 MiB).
  inter = (6 * S * E + nhead * S * S + 2 * S * F + 4 * S * E) * 4
  need = weight_bytes + (2 * 2 * S * E * 4) + 2 * inter
  vmem_limit = int(min(64 * 2**20, max(32 * 2**20, need)))

  # Advisory cost estimate so XLA schedules neighbours around the fused call.
  flops = N * (8 * S * E * E + 4 * S * S * E + 4 * S * E * F)
  transcendentals = N * (nhead * S * S + S * F)
  bytes_accessed = 2 * S * N * E * 4 + weight_bytes
  cost = pl.CostEstimate(flops=flops, transcendentals=transcendentals,
                         bytes_accessed=bytes_accessed)

  kernel = functools.partial(_encoder_layer_kernel, nhead=nhead, ln_eps=ln_eps)

  def build(single_buffer_weights):
    def const_spec(shape):
      idx = _const_index_map(len(shape))
      if single_buffer_weights:
        try:
          # Constant index_map => weights stay VMEM-resident across grid
          # steps; single-buffering them avoids wasting a second copy.
          return pl.BlockSpec(shape, idx, pipeline_mode=pl.Buffered(1))
        except TypeError:
          return pl.BlockSpec(shape, idx)
      return pl.BlockSpec(shape, idx)

    return pl.pallas_call(
        kernel,
        out_shape=jax.ShapeDtypeStruct((N, S, E), src.dtype),
        grid=(N,),
        in_specs=[x_spec] + [const_spec(a.shape) for a in weight_args],
        out_specs=x_spec,
        compiler_params=pltpu.CompilerParams(
            dimension_semantics=("parallel",),     # megacore split over batch
            vmem_limit_bytes=vmem_limit),
        cost_estimate=cost,
    )

  try:
    out = build(True)(x, *weight_args)
  except Exception:
    # Fallback: default double-buffered weights if pipeline_mode is rejected.
    out = build(False)(x, *weight_args)

  return jnp.transpose(out, (1, 0, 2))            # back to (S, N, E)


# -------------------------- parameter construction --------------------------

def init_params(key, d_model, dim_feedforward):
  """Weights stored pre-transposed to (in, out) and cast to bf16 (MXU-native);
  biases and LayerNorm params stay f32."""
  E, F = d_model, dim_feedforward
  ks = jax.random.split(key, 12)

  def w(k, shape):
    return (0.02 * jax.random.normal(k, shape, jnp.float32)).astype(jnp.bfloat16)

  def b(k, n):
    return 0.02 * jax.random.normal(k, (1, n), jnp.float32)

  return {
      "wq": w(ks[0], (E, E)), "bq": b(ks[1], E),
      "wk": w(ks[2], (E, E)), "bk": b(ks[3], E),
      "wv": w(ks[4], (E, E)), "bv": b(ks[5], E),
      "wo": w(ks[6], (E, E)), "bo": b(ks[7], E),
      "w1": w(ks[8], (E, F)), "b1": b(ks[9], F),
      "w2": w(ks[10], (F, E)), "b2": b(ks[11], E),
      "ln1_g": jnp.ones((1, E), jnp.float32), "ln1_b": jnp.zeros((1, E), jnp.float32),
      "ln2_g": jnp.ones((1, E), jnp.float32), "ln2_b": jnp.zeros((1, E), jnp.float32),
  }


# ------------------------- pure-JAX reference (f32) --------------------------

def reference_forward(src, params, nhead, ln_eps=1e-5):
  S, N, E = src.shape
  Dh = E // nhead

  def lin(x, w, b):
    return x @ w.astype(jnp.float32) + b[0]

  q = lin(src, params["wq"], params["bq"])
  k = lin(src, params["wk"], params["bk"])
  v = lin(src, params["wv"], params["bv"])

  def heads(t):  # (S, N, E) -> (N*H, S, Dh)  (matches view/transpose in torch)
    return t.reshape(S, N * nhead, Dh).transpose(1, 0, 2)

  q, k, v = heads(q), heads(k), heads(v)
  s = jnp.einsum("bsd,btd->bst", q, k)            # no scaling in the reference
  p = jax.nn.softmax(s, axis=-1)
  ctx = jnp.einsum("bst,btd->bsd", p, v)          # (N*H, S, Dh)
  ctx = ctx.transpose(1, 0, 2).reshape(S, N, E)
  attn_out = lin(ctx, params["wo"], params["bo"])

  def layernorm(y, g, b):
    mu = y.mean(-1, keepdims=True)
    var = ((y - mu) ** 2).mean(-1, keepdims=True)
    return (y - mu) * jax.lax.rsqrt(var + ln_eps) * g[0] + b[0]

  h1 = layernorm(src + attn_out, params["ln1_g"], params["ln1_b"])
  ff = jax.nn.gelu(lin(h1, params["w1"], params["b1"]), approximate=False)
  ff = lin(ff, params["w2"], params["b2"])
  return layernorm(h1 + ff, params["ln2_g"], params["ln2_b"])


# ------------------------------------ main -----------------------------------

if __name__ == "__main__":
  # Small but lane-aligned shapes (E multiple of 128) per the perf review.
  d_model, nhead, dim_feedforward = 128, 4, 256
  S, N = 16, 2

  key = jax.random.PRNGKey(0)
  pkey, xkey = jax.random.split(key)
  params = init_params(pkey, d_model, dim_feedforward)
  src = jax.random.normal(xkey, (S, N, d_model), jnp.float32)

  out = jax.block_until_ready(transformer_encoder_layer(src, params, nhead))
  assert out.shape == (S, N, d_model) and out.dtype == jnp.float32

  ref = reference_forward(src, params, nhead)
  err = float(jnp.max(jnp.abs(out - ref)))
  assert err < 0.1, f"max abs diff vs reference = {err}"

  print("KERNEL_OK")
</pallas_src>

<mosaic_0001>
module attributes {stable_mosaic.version = 11 : i64} {
  func.func @_encoder_layer_kernel(%arg0: i32, %arg1: memref<1x16x128xf32, #tpu.memory_space<vmem>>, %arg2: memref<128x128xbf16, #tpu.memory_space<vmem>>, %arg3: memref<1x128xf32, #tpu.memory_space<vmem>>, %arg4: memref<128x128xbf16, #tpu.memory_space<vmem>>, %arg5: memref<1x128xf32, #tpu.memory_space<vmem>>, %arg6: memref<128x128xbf16, #tpu.memory_space<vmem>>, %arg7: memref<1x128xf32, #tpu.memory_space<vmem>>, %arg8: memref<128x128xbf16, #tpu.memory_space<vmem>>, %arg9: memref<1x128xf32, #tpu.memory_space<vmem>>, %arg10: memref<128x256xbf16, #tpu.memory_space<vmem>>, %arg11: memref<1x256xf32, #tpu.memory_space<vmem>>, %arg12: memref<256x128xbf16, #tpu.memory_space<vmem>>, %arg13: memref<1x128xf32, #tpu.memory_space<vmem>>, %arg14: memref<1x128xf32, #tpu.memory_space<vmem>>, %arg15: memref<1x128xf32, #tpu.memory_space<vmem>>, %arg16: memref<1x128xf32, #tpu.memory_space<vmem>>, %arg17: memref<1x128xf32, #tpu.memory_space<vmem>>, %arg18: memref<1x16x128xf32, #tpu.memory_space<vmem>>) attributes {dimension_semantics = [#tpu.dimension_semantics<parallel>], iteration_bounds = array<i64: 2>, scalar_prefetch = 0 : i64, scratch_operands = 0 : i64, tpu.core_type = #tpu.core_type<tc>, window_params = [{transform_indices = @transform_0, window_bounds = array<i64: 1, 16, 128>}, {pipeline_mode = #tpu.pipeline_mode<synchronous>, transform_indices = @transform_1, window_bounds = array<i64: 128, 128>}, {pipeline_mode = #tpu.pipeline_mode<synchronous>, transform_indices = @transform_2, window_bounds = array<i64: 1, 128>}, {pipeline_mode = #tpu.pipeline_mode<synchronous>, transform_indices = @transform_3, window_bounds = array<i64: 128, 128>}, {pipeline_mode = #tpu.pipeline_mode<synchronous>, transform_indices = @transform_4, window_bounds = array<i64: 1, 128>}, {pipeline_mode = #tpu.pipeline_mode<synchronous>, transform_indices = @transform_5, window_bounds = array<i64: 128, 128>}, {pipeline_mode = #tpu.pipeline_mode<synchronous>, transform_indices = @transform_6, window_bounds = array<i64: 1, 128>}, {pipeline_mode = #tpu.pipeline_mode<synchronous>, transform_indices = @transform_7, window_bounds = array<i64: 128, 128>}, {pipeline_mode = #tpu.pipeline_mode<synchronous>, transform_indices = @transform_8, window_bounds = array<i64: 1, 128>}, {pipeline_mode = #tpu.pipeline_mode<synchronous>, transform_indices = @transform_9, window_bounds = array<i64: 128, 256>}, {pipeline_mode = #tpu.pipeline_mode<synchronous>, transform_indices = @transform_10, window_bounds = array<i64: 1, 256>}, {pipeline_mode = #tpu.pipeline_mode<synchronous>, transform_indices = @transform_11, window_bounds = array<i64: 256, 128>}, {pipeline_mode = #tpu.pipeline_mode<synchronous>, transform_indices = @transform_12, window_bounds = array<i64: 1, 128>}, {pipeline_mode = #tpu.pipeline_mode<synchronous>, transform_indices = @transform_13, window_bounds = array<i64: 1, 128>}, {pipeline_mode = #tpu.pipeline_mode<synchronous>, transform_indices = @transform_14, window_bounds = array<i64: 1, 128>}, {pipeline_mode = #tpu.pipeline_mode<synchronous>, transform_indices = @transform_15, window_bounds = array<i64: 1, 128>}, {pipeline_mode = #tpu.pipeline_mode<synchronous>, transform_indices = @transform_16, window_bounds = array<i64: 1, 128>}, {transform_indices = @transform_17, window_bounds = array<i64: 1, 16, 128>}]} {
    %c0 = arith.constant 0 : index
    %c0_0 = arith.constant 0 : index
    %c0_1 = arith.constant 0 : index
    %0 = vector.load %arg1[%c0, %c0_0, %c0_1] : memref<1x16x128xf32, #tpu.memory_space<vmem>>, vector<1x16x128xf32>
    %1 = vector.shape_cast %0 : vector<1x16x128xf32> to vector<16x128xf32>
    %2 = arith.truncf %1 : vector<16x128xf32> to vector<16x128xbf16>
    %c0_2 = arith.constant 0 : index
    %c0_3 = arith.constant 0 : index
    %3 = vector.load %arg2[%c0_2, %c0_3] : memref<128x128xbf16, #tpu.memory_space<vmem>>, vector<128x128xbf16>
    %cst = arith.constant dense<0.000000e+00> : vector<16x128xf32>
    %4 = tpu.matmul %2, %3, %cst {dimension_numbers = #tpu.dot_dimension_numbers<[1], [0], [0], [1], [0, 0, 1, 1], [], []>} : vector<16x128xbf16>, vector<128x128xbf16>, vector<16x128xf32> -> vector<16x128xf32>
    %c0_4 = arith.constant 0 : index
    %c0_5 = arith.constant 0 : index
    %5 = vector.load %arg3[%c0_4, %c0_5] : memref<1x128xf32, #tpu.memory_space<vmem>>, vector<1x128xf32>
    %6 = vector.broadcast %5 : vector<1x128xf32> to vector<16x128xf32>
    %7 = arith.addf %4, %6 : vector<16x128xf32>
    %8 = arith.truncf %7 : vector<16x128xf32> to vector<16x128xbf16>
    %9 = vector.shape_cast %8 : vector<16x128xbf16> to vector<16x4x32xbf16>
    %10 = tpu.transpose %9, [1, 0, 2] : vector<16x4x32xbf16> -> vector<4x16x32xbf16>
    %c0_6 = arith.constant 0 : index
    %c0_7 = arith.constant 0 : index
    %11 = vector.load %arg4[%c0_6, %c0_7] : memref<128x128xbf16, #tpu.memory_space<vmem>>, vector<128x128xbf16>
    %cst_8 = arith.constant dense<0.000000e+00> : vector<16x128xf32>
    %12 = tpu.matmul %2, %11, %cst_8 {dimension_numbers = #tpu.dot_dimension_numbers<[1], [0], [0], [1], [0, 0, 1, 1], [], []>} : vector<16x128xbf16>, vector<128x128xbf16>, vector<16x128xf32> -> vector<16x128xf32>
    %c0_9 = arith.constant 0 : index
    %c0_10 = arith.constant 0 : index
    %13 = vector.load %arg5[%c0_9, %c0_10] : memref<1x128xf32, #tpu.memory_space<vmem>>, vector<1x128xf32>
    %14 = vector.broadcast %13 : vector<1x128xf32> to vector<16x128xf32>
    %15 = arith.addf %12, %14 : vector<16x128xf32>
    %16 = arith.truncf %15 : vector<16x128xf32> to vector<16x128xbf16>
    %17 = vector.shape_cast %16 : vector<16x128xbf16> to vector<16x4x32xbf16>
    %18 = tpu.transpose %17, [1, 0, 2] : vector<16x4x32xbf16> -> vector<4x16x32xbf16>
    %c0_11 = arith.constant 0 : index
    %c0_12 = arith.constant 0 : index
    %19 = vector.load %arg6[%c0_11, %c0_12] : memref<128x128xbf16, #tpu.memory_space<vmem>>, vector<128x128xbf16>
    %cst_13 = arith.constant dense<0.000000e+00> : vector<16x128xf32>
    %20 = tpu.matmul %2, %19, %cst_13 {dimension_numbers = #tpu.dot_dimension_numbers<[1], [0], [0], [1], [0, 0, 1, 1], [], []>} : vector<16x128xbf16>, vector<128x128xbf16>, vector<16x128xf32> -> vector<16x128xf32>
    %c0_14 = arith.constant 0 : index
    %c0_15 = arith.constant 0 : index
    %21 = vector.load %arg7[%c0_14, %c0_15] : memref<1x128xf32, #tpu.memory_space<vmem>>, vector<1x128xf32>
    %22 = vector.broadcast %21 : vector<1x128xf32> to vector<16x128xf32>
    %23 = arith.addf %20, %22 : vector<16x128xf32>
    %24 = arith.truncf %23 : vector<16x128xf32> to vector<16x128xbf16>
    %25 = vector.shape_cast %24 : vector<16x128xbf16> to vector<16x4x32xbf16>
    %26 = tpu.transpose %25, [1, 0, 2] : vector<16x4x32xbf16> -> vector<4x16x32xbf16>
    "tpu.trace_start"() <{level = 10 : i32, message = "hqd,hkd->hqk"}> : () -> ()
    %cst_16 = arith.constant dense<0.000000e+00> : vector<4x16x16xf32>
    %27 = tpu.matmul %10, %18, %cst_16 {dimension_numbers = #tpu.dot_dimension_numbers<[2], [2], [1], [1], [0, 0, 0, 1, 1, 1], [0], [0]>} : vector<4x16x32xbf16>, vector<4x16x32xbf16>, vector<4x16x16xf32> -> vector<4x16x16xf32>
    "tpu.trace_stop"() : () -> ()
    %cst_17 = arith.constant dense<0xFF800000> : vector<4x16xf32>
    %28 = vector.multi_reduction <maximumf>, %27, %cst_17 [2] : vector<4x16x16xf32> to vector<4x16xf32>
    %29 = vector.shape_cast %28 : vector<4x16xf32> to vector<4x16x1xf32>
    %30 = vector.broadcast %29 : vector<4x16x1xf32> to vector<4x16x16xf32>
    %31 = arith.subf %27, %30 : vector<4x16x16xf32>
    %32 = math.exp %31 : vector<4x16x16xf32>
    %cst_18 = arith.constant dense<0.000000e+00> : vector<4x16xf32>
    %33 = vector.multi_reduction <add>, %32, %cst_18 [2] : vector<4x16x16xf32> to vector<4x16xf32>
    %34 = vector.shape_cast %33 : vector<4x16xf32> to vector<4x16x1xf32>
    %35 = tpu.reciprocal %34 {approx = true} : vector<4x16x1xf32> -> vector<4x16x1xf32>
    %36 = vector.broadcast %35 : vector<4x16x1xf32> to vector<4x16x16xf32>
    %37 = arith.mulf %32, %36 : vector<4x16x16xf32>
    %38 = arith.truncf %37 : vector<4x16x16xf32> to vector<4x16x16xbf16>
    "tpu.trace_start"() <{level = 10 : i32, message = "hqk,hkd->hqd"}> : () -> ()
    %cst_19 = arith.constant dense<0.000000e+00> : vector<4x16x32xf32>
    %39 = tpu.matmul %38, %26, %cst_19 {dimension_numbers = #tpu.dot_dimension_numbers<[2], [1], [1], [2], [0, 0, 0, 1, 1, 2], [0], [0]>} : vector<4x16x16xbf16>, vector<4x16x32xbf16>, vector<4x16x32xf32> -> vector<4x16x32xf32>
    "tpu.trace_stop"() : () -> ()
    %40 = arith.truncf %39 : vector<4x16x32xf32> to vector<4x16x32xbf16>
    %41 = tpu.transpose %40, [1, 0, 2] : vector<4x16x32xbf16> -> vector<16x4x32xbf16>
    %42 = vector.shape_cast %41 : vector<16x4x32xbf16> to vector<16x128xbf16>
    %c0_20 = arith.constant 0 : index
    %c0_21 = arith.constant 0 : index
    %43 = vector.load %arg8[%c0_20, %c0_21] : memref<128x128xbf16, #tpu.memory_space<vmem>>, vector<128x128xbf16>
    %cst_22 = arith.constant dense<0.000000e+00> : vector<16x128xf32>
    %44 = tpu.matmul %42, %43, %cst_22 {dimension_numbers = #tpu.dot_dimension_numbers<[1], [0], [0], [1], [0, 0, 1, 1], [], []>} : vector<16x128xbf16>, vector<128x128xbf16>, vector<16x128xf32> -> vector<16x128xf32>
    %c0_23 = arith.constant 0 : index
    %c0_24 = arith.constant 0 : index
    %45 = vector.load %arg9[%c0_23, %c0_24] : memref<1x128xf32, #tpu.memory_space<vmem>>, vector<1x128xf32>
    %46 = vector.broadcast %45 : vector<1x128xf32> to vector<16x128xf32>
    %47 = arith.addf %44, %46 : vector<16x128xf32>
    %48 = arith.addf %1, %47 : vector<16x128xf32>
    %cst_25 = arith.constant dense<0.000000e+00> : vector<16xf32>
    %49 = vector.multi_reduction <add>, %48, %cst_25 [1] : vector<16x128xf32> to vector<16xf32>
    %50 = vector.shape_cast %49 : vector<16xf32> to vector<16x1xf32>
    %cst_26 = arith.constant 1.280000e+02 : f32
    %51 = vector.broadcast %cst_26 : f32 to vector<16x1xf32>
    %52 = arith.divf %50, %51 : vector<16x1xf32>
    %53 = vector.broadcast %52 : vector<16x1xf32> to vector<16x128xf32>
    %54 = arith.subf %48, %53 : vector<16x128xf32>
    %55 = arith.mulf %54, %54 : vector<16x128xf32>
    %cst_27 = arith.constant dense<0.000000e+00> : vector<16xf32>
    %56 = vector.multi_reduction <add>, %55, %cst_27 [1] : vector<16x128xf32> to vector<16xf32>
    %57 = vector.shape_cast %56 : vector<16xf32> to vector<16x1xf32>
    %cst_28 = arith.constant 1.280000e+02 : f32
    %58 = vector.broadcast %cst_28 : f32 to vector<16x1xf32>
    %59 = arith.divf %57, %58 : vector<16x1xf32>
    %60 = vector.broadcast %52 : vector<16x1xf32> to vector<16x128xf32>
    %61 = arith.subf %48, %60 : vector<16x128xf32>
    %cst_29 = arith.constant 9.99999974E-6 : f32
    %62 = vector.broadcast %cst_29 : f32 to vector<16x1xf32>
    %63 = arith.addf %59, %62 : vector<16x1xf32>
    %64 = math.rsqrt %63 : vector<16x1xf32>
    %65 = vector.broadcast %64 : vector<16x1xf32> to vector<16x128xf32>
    %66 = arith.mulf %61, %65 : vector<16x128xf32>
    %c0_30 = arith.constant 0 : index
    %c0_31 = arith.constant 0 : index
    %67 = vector.load %arg14[%c0_30, %c0_31] : memref<1x128xf32, #tpu.memory_space<vmem>>, vector<1x128xf32>
    %68 = vector.broadcast %67 : vector<1x128xf32> to vector<16x128xf32>
    %69 = arith.mulf %66, %68 : vector<16x128xf32>
    %c0_32 = arith.constant 0 : index
    %c0_33 = arith.constant 0 : index
    %70 = vector.load %arg15[%c0_32, %c0_33] : memref<1x128xf32, #tpu.memory_space<vmem>>, vector<1x128xf32>
    %71 = vector.broadcast %70 : vector<1x128xf32> to vector<16x128xf32>
    %72 = arith.addf %69, %71 : vector<16x128xf32>
    %73 = arith.truncf %72 : vector<16x128xf32> to vector<16x128xbf16>
    %c0_34 = arith.constant 0 : index
    %c0_35 = arith.constant 0 : index
    %74 = vector.load %arg10[%c0_34, %c0_35] : memref<128x256xbf16, #tpu.memory_space<vmem>>, vector<128x256xbf16>
    %cst_36 = arith.constant dense<0.000000e+00> : vector<16x256xf32>
    %75 = tpu.matmul %73, %74, %cst_36 {dimension_numbers = #tpu.dot_dimension_numbers<[1], [0], [0], [1], [0, 0, 1, 1], [], []>} : vector<16x128xbf16>, vector<128x256xbf16>, vector<16x256xf32> -> vector<16x256xf32>
    %c0_37 = arith.constant 0 : index
    %c0_38 = arith.constant 0 : index
    %76 = vector.load %arg11[%c0_37, %c0_38] : memref<1x256xf32, #tpu.memory_space<vmem>>, vector<1x256xf32>
    %77 = vector.broadcast %76 : vector<1x256xf32> to vector<16x256xf32>
    %78 = arith.addf %75, %77 : vector<16x256xf32>
    %79 = arith.mulf %78, %78 : vector<16x256xf32>
    %80 = arith.mulf %78, %79 : vector<16x256xf32>
    %cst_39 = arith.constant 4.471500e-02 : f32
    %81 = vector.broadcast %cst_39 : f32 to vector<16x256xf32>
    %82 = arith.mulf %81, %80 : vector<16x256xf32>
    %83 = arith.addf %78, %82 : vector<16x256xf32>
    %cst_40 = arith.constant 0.797884583 : f32
    %84 = vector.broadcast %cst_40 : f32 to vector<16x256xf32>
    %85 = arith.mulf %84, %83 : vector<16x256xf32>
    %86 = math.tanh %85 : vector<16x256xf32>
    %cst_41 = arith.constant 1.000000e+00 : f32
    %87 = vector.broadcast %cst_41 : f32 to vector<16x256xf32>
    %88 = arith.addf %87, %86 : vector<16x256xf32>
    %cst_42 = arith.constant 5.000000e-01 : f32
    %89 = vector.broadcast %cst_42 : f32 to vector<16x256xf32>
    %90 = arith.mulf %89, %88 : vector<16x256xf32>
    %91 = arith.mulf %78, %90 : vector<16x256xf32>
    %92 = arith.truncf %91 : vector<16x256xf32> to vector<16x256xbf16>
    %c0_43 = arith.constant 0 : index
    %c0_44 = arith.constant 0 : index
    %93 = vector.load %arg12[%c0_43, %c0_44] : memref<256x128xbf16, #tpu.memory_space<vmem>>, vector<256x128xbf16>
    %cst_45 = arith.constant dense<0.000000e+00> : vector<16x128xf32>
    %94 = tpu.matmul %92, %93, %cst_45 {dimension_numbers = #tpu.dot_dimension_numbers<[1], [0], [0], [1], [0, 0, 1, 1], [], []>} : vector<16x256xbf16>, vector<256x128xbf16>, vector<16x128xf32> -> vector<16x128xf32>
    %c0_46 = arith.constant 0 : index
    %c0_47 = arith.constant 0 : index
    %95 = vector.load %arg13[%c0_46, %c0_47] : memref<1x128xf32, #tpu.memory_space<vmem>>, vector<1x128xf32>
    %96 = vector.broadcast %95 : vector<1x128xf32> to vector<16x128xf32>
    %97 = arith.addf %94, %96 : vector<16x128xf32>
    %98 = arith.addf %72, %97 : vector<16x128xf32>
    %cst_48 = arith.constant dense<0.000000e+00> : vector<16xf32>
    %99 = vector.multi_reduction <add>, %98, %cst_48 [1] : vector<16x128xf32> to vector<16xf32>
    %100 = vector.shape_cast %99 : vector<16xf32> to vector<16x1xf32>
    %cst_49 = arith.constant 1.280000e+02 : f32
    %101 = vector.broadcast %cst_49 : f32 to vector<16x1xf32>
    %102 = arith.divf %100, %101 : vector<16x1xf32>
    %103 = vector.broadcast %102 : vector<16x1xf32> to vector<16x128xf32>
    %104 = arith.subf %98, %103 : vector<16x128xf32>
    %105 = arith.mulf %104, %104 : vector<16x128xf32>
    %cst_50 = arith.constant dense<0.000000e+00> : vector<16xf32>
    %106 = vector.multi_reduction <add>, %105, %cst_50 [1] : vector<16x128xf32> to vector<16xf32>
    %107 = vector.shape_cast %106 : vector<16xf32> to vector<16x1xf32>
    %cst_51 = arith.constant 1.280000e+02 : f32
    %108 = vector.broadcast %cst_51 : f32 to vector<16x1xf32>
    %109 = arith.divf %107, %108 : vector<16x1xf32>
    %110 = vector.broadcast %102 : vector<16x1xf32> to vector<16x128xf32>
    %111 = arith.subf %98, %110 : vector<16x128xf32>
    %cst_52 = arith.constant 9.99999974E-6 : f32
    %112 = vector.broadcast %cst_52 : f32 to vector<16x1xf32>
    %113 = arith.addf %109, %112 : vector<16x1xf32>
    %114 = math.rsqrt %113 : vector<16x1xf32>
    %115 = vector.broadcast %114 : vector<16x1xf32> to vector<16x128xf32>
    %116 = arith.mulf %111, %115 : vector<16x128xf32>
    %c0_53 = arith.constant 0 : index
    %c0_54 = arith.constant 0 : index
    %117 = vector.load %arg16[%c0_53, %c0_54] : memref<1x128xf32, #tpu.memory_space<vmem>>, vector<1x128xf32>
    %118 = vector.broadcast %117 : vector<1x128xf32> to vector<16x128xf32>
    %119 = arith.mulf %116, %118 : vector<16x128xf32>
    %c0_55 = arith.constant 0 : index
    %c0_56 = arith.constant 0 : index
    %120 = vector.load %arg17[%c0_55, %c0_56] : memref<1x128xf32, #tpu.memory_space<vmem>>, vector<1x128xf32>
    %121 = vector.broadcast %120 : vector<1x128xf32> to vector<16x128xf32>
    %122 = arith.addf %119, %121 : vector<16x128xf32>
    %c0_57 = arith.constant 0 : index
    %c0_58 = arith.constant 0 : index
    %c0_59 = arith.constant 0 : index
    %123 = vector.load %arg18[%c0_57, %c0_58, %c0_59] : memref<1x16x128xf32, #tpu.memory_space<vmem>>, vector<1x16x128xf32>
    %124 = vector.shape_cast %123 : vector<1x16x128xf32> to vector<16x128xf32>
    %125 = vector.shape_cast %122 : vector<16x128xf32> to vector<1x16x128xf32>
    tpu.vector_store %arg18[%c0_57, %c0_58, %c0_59], %125 {strides = array<i32>} : memref<1x16x128xf32, #tpu.memory_space<vmem>>, vector<1x16x128xf32>,
    return
  }
  func.func @transform_0(%arg0: i32) -> (i32, i32, i32) {
    %c0_i32 = arith.constant 0 : i32
    %c0_i32_0 = arith.constant 0 : i32
    %c0_i32_1 = arith.constant 0 : i32
    return %arg0, %c0_i32, %c0_i32_0 : i32, i32, i32
  }
  func.func @transform_1(%arg0: i32) -> (i32, i32) {
    %c0_i32 = arith.constant 0 : i32
    %c0_i32_0 = arith.constant 0 : i32
    %c0_i32_1 = arith.constant 0 : i32
    return %c0_i32, %c0_i32_0 : i32, i32
  }
  func.func @transform_2(%arg0: i32) -> (i32, i32) {
    %c0_i32 = arith.constant 0 : i32
    %c0_i32_0 = arith.constant 0 : i32
    %c0_i32_1 = arith.constant 0 : i32
    return %c0_i32, %c0_i32_0 : i32, i32
  }
  func.func @transform_3(%arg0: i32) -> (i32, i32) {
    %c0_i32 = arith.constant 0 : i32
    %c0_i32_0 = arith.constant 0 : i32
    %c0_i32_1 = arith.constant 0 : i32
    return %c0_i32, %c0_i32_0 : i32, i32
  }
  func.func @transform_4(%arg0: i32) -> (i32, i32) {
    %c0_i32 = arith.constant 0 : i32
    %c0_i32_0 = arith.constant 0 : i32
    %c0_i32_1 = arith.constant 0 : i32
    return %c0_i32, %c0_i32_0 : i32, i32
  }
  func.func @transform_5(%arg0: i32) -> (i32, i32) {
    %c0_i32 = arith.constant 0 : i32
    %c0_i32_0 = arith.constant 0 : i32
    %c0_i32_1 = arith.constant 0 : i32
    return %c0_i32, %c0_i32_0 : i32, i32
  }
  func.func @transform_6(%arg0: i32) -> (i32, i32) {
    %c0_i32 = arith.constant 0 : i32
    %c0_i32_0 = arith.constant 0 : i32
    %c0_i32_1 = arith.constant 0 : i32
    return %c0_i32, %c0_i32_0 : i32, i32
  }
  func.func @transform_7(%arg0: i32) -> (i32, i32) {
    %c0_i32 = arith.constant 0 : i32
    %c0_i32_0 = arith.constant 0 : i32
    %c0_i32_1 = arith.constant 0 : i32
    return %c0_i32, %c0_i32_0 : i32, i32
  }
  func.func @transform_8(%arg0: i32) -> (i32, i32) {
    %c0_i32 = arith.constant 0 : i32
    %c0_i32_0 = arith.constant 0 : i32
    %c0_i32_1 = arith.constant 0 : i32
    return %c0_i32, %c0_i32_0 : i32, i32
  }
  func.func @transform_9(%arg0: i32) -> (i32, i32) {
    %c0_i32 = arith.constant 0 : i32
    %c0_i32_0 = arith.constant 0 : i32
    %c0_i32_1 = arith.constant 0 : i32
    return %c0_i32, %c0_i32_0 : i32, i32
  }
  func.func @transform_10(%arg0: i32) -> (i32, i32) {
    %c0_i32 = arith.constant 0 : i32
    %c0_i32_0 = arith.constant 0 : i32
    %c0_i32_1 = arith.constant 0 : i32
    return %c0_i32, %c0_i32_0 : i32, i32
  }
  func.func @transform_11(%arg0: i32) -> (i32, i32) {
    %c0_i32 = arith.constant 0 : i32
    %c0_i32_0 = arith.constant 0 : i32
    %c0_i32_1 = arith.constant 0 : i32
    return %c0_i32, %c0_i32_0 : i32, i32
  }
  func.func @transform_12(%arg0: i32) -> (i32, i32) {
    %c0_i32 = arith.constant 0 : i32
    %c0_i32_0 = arith.constant 0 : i32
    %c0_i32_1 = arith.constant 0 : i32
    return %c0_i32, %c0_i32_0 : i32, i32
  }
  func.func @transform_13(%arg0: i32) -> (i32, i32) {
    %c0_i32 = arith.constant 0 : i32
    %c0_i32_0 = arith.constant 0 : i32
    %c0_i32_1 = arith.constant 0 : i32
    return %c0_i32, %c0_i32_0 : i32, i32
  }
  func.func @transform_14(%arg0: i32) -> (i32, i32) {
    %c0_i32 = arith.constant 0 : i32
    %c0_i32_0 = arith.constant 0 : i32
    %c0_i32_1 = arith.constant 0 : i32
    return %c0_i32, %c0_i32_0 : i32, i32
  }
  func.func @transform_15(%arg0: i32) -> (i32, i32) {
    %c0_i32 = arith.constant 0 : i32
    %c0_i32_0 = arith.constant 0 : i32
    %c0_i32_1 = arith.constant 0 : i32
    return %c0_i32, %c0_i32_0 : i32, i32
  }
  func.func @transform_16(%arg0: i32) -> (i32, i32) {
    %c0_i32 = arith.constant 0 : i32
    %c0_i32_0 = arith.constant 0 : i32
    %c0_i32_1 = arith.constant 0 : i32
    return %c0_i32, %c0_i32_0 : i32, i32
  }
  func.func @transform_17(%arg0: i32) -> (i32, i32, i32) {
    %c0_i32 = arith.constant 0 : i32
    %c0_i32_0 = arith.constant 0 : i32
    %c0_i32_1 = arith.constant 0 : i32
    return %arg0, %c0_i32, %c0_i32_0 : i32, i32, i32
  }
}

module attributes {stable_mosaic.version = 11 : i64} {
  func.func @_encoder_layer_kernel(%arg0: i32, %arg1: memref<1x16x128xf32, #tpu.memory_space<vmem>>, %arg2: memref<128x128xbf16, #tpu.memory_space<vmem>>, %arg3: memref<1x128xf32, #tpu.memory_space<vmem>>, %arg4: memref<128x128xbf16, #tpu.memory_space<vmem>>, %arg5: memref<1x128xf32, #tpu.memory_space<vmem>>, %arg6: memref<128x128xbf16, #tpu.memory_space<vmem>>, %arg7: memref<1x128xf32, #tpu.memory_space<vmem>>, %arg8: memref<128x128xbf16, #tpu.memory_space<vmem>>, %arg9: memref<1x128xf32, #tpu.memory_space<vmem>>, %arg10: memref<128x256xbf16, #tpu.memory_space<vmem>>, %arg11: memref<1x256xf32, #tpu.memory_space<vmem>>, %arg12: memref<256x128xbf16, #tpu.memory_space<vmem>>, %arg13: memref<1x128xf32, #tpu.memory_space<vmem>>, %arg14: memref<1x128xf32, #tpu.memory_space<vmem>>, %arg15: memref<1x128xf32, #tpu.memory_space<vmem>>, %arg16: memref<1x128xf32, #tpu.memory_space<vmem>>, %arg17: memref<1x128xf32, #tpu.memory_space<vmem>>, %arg18: memref<1x16x128xf32, #tpu.memory_space<vmem>>) attributes {dimension_semantics = [#tpu.dimension_semantics<parallel>], iteration_bounds = array<i64: 2>, scalar_prefetch = 0 : i64, scratch_operands = 0 : i64, tpu.core_type = #tpu.core_type<tc>, window_params = [{transform_indices = @transform_0, window_bounds = array<i64: 1, 16, 128>}, {pipeline_mode = #tpu.pipeline_mode<synchronous>, transform_indices = @transform_1, window_bounds = array<i64: 128, 128>}, {pipeline_mode = #tpu.pipeline_mode<synchronous>, transform_indices = @transform_2, window_bounds = array<i64: 1, 128>}, {pipeline_mode = #tpu.pipeline_mode<synchronous>, transform_indices = @transform_3, window_bounds = array<i64: 128, 128>}, {pipeline_mode = #tpu.pipeline_mode<synchronous>, transform_indices = @transform_4, window_bounds = array<i64: 1, 128>}, {pipeline_mode = #tpu.pipeline_mode<synchronous>, transform_indices = @transform_5, window_bounds = array<i64: 128, 128>}, {pipeline_mode = #tpu.pipeline_mode<synchronous>, transform_indices = @transform_6, window_bounds = array<i64: 1, 128>}, {pipeline_mode = #tpu.pipeline_mode<synchronous>, transform_indices = @transform_7, window_bounds = array<i64: 128, 128>}, {pipeline_mode = #tpu.pipeline_mode<synchronous>, transform_indices = @transform_8, window_bounds = array<i64: 1, 128>}, {pipeline_mode = #tpu.pipeline_mode<synchronous>, transform_indices = @transform_9, window_bounds = array<i64: 128, 256>}, {pipeline_mode = #tpu.pipeline_mode<synchronous>, transform_indices = @transform_10, window_bounds = array<i64: 1, 256>}, {pipeline_mode = #tpu.pipeline_mode<synchronous>, transform_indices = @transform_11, window_bounds = array<i64: 256, 128>}, {pipeline_mode = #tpu.pipeline_mode<synchronous>, transform_indices = @transform_12, window_bounds = array<i64: 1, 128>}, {pipeline_mode = #tpu.pipeline_mode<synchronous>, transform_indices = @transform_13, window_bounds = array<i64: 1, 128>}, {pipeline_mode = #tpu.pipeline_mode<synchronous>, transform_indices = @transform_14, window_bounds = array<i64: 1, 128>}, {pipeline_mode = #tpu.pipeline_mode<synchronous>, transform_indices = @transform_15, window_bounds = array<i64: 1, 128>}, {pipeline_mode = #tpu.pipeline_mode<synchronous>, transform_indices = @transform_16, window_bounds = array<i64: 1, 128>}, {transform_indices = @transform_17, window_bounds = array<i64: 1, 16, 128>}]} {
    %c0 = arith.constant 0 : index
    %c0_0 = arith.constant 0 : index
    %c0_1 = arith.constant 0 : index
    %0 = vector.load %arg1[%c0, %c0_0, %c0_1] : memref<1x16x128xf32, #tpu.memory_space<vmem>>, vector<1x16x128xf32>
    %1 = vector.shape_cast %0 : vector<1x16x128xf32> to vector<16x128xf32>
    %2 = arith.truncf %1 : vector<16x128xf32> to vector<16x128xbf16>
    %c0_2 = arith.constant 0 : index
    %c0_3 = arith.constant 0 : index
    %3 = vector.load %arg2[%c0_2, %c0_3] : memref<128x128xbf16, #tpu.memory_space<vmem>>, vector<128x128xbf16>
    %cst = arith.constant dense<0.000000e+00> : vector<16x128xf32>
    %4 = tpu.matmul %2, %3, %cst {dimension_numbers = #tpu.dot_dimension_numbers<[1], [0], [0], [1], [0, 0, 1, 1], [], []>} : vector<16x128xbf16>, vector<128x128xbf16>, vector<16x128xf32> -> vector<16x128xf32>
    %c0_4 = arith.constant 0 : index
    %c0_5 = arith.constant 0 : index
    %5 = vector.load %arg3[%c0_4, %c0_5] : memref<1x128xf32, #tpu.memory_space<vmem>>, vector<1x128xf32>
    %6 = vector.broadcast %5 : vector<1x128xf32> to vector<16x128xf32>
    %7 = arith.addf %4, %6 : vector<16x128xf32>
    %8 = arith.truncf %7 : vector<16x128xf32> to vector<16x128xbf16>
    %9 = vector.shape_cast %8 : vector<16x128xbf16> to vector<16x4x32xbf16>
    %10 = tpu.transpose %9, [1, 0, 2] : vector<16x4x32xbf16> -> vector<4x16x32xbf16>
    %c0_6 = arith.constant 0 : index
    %c0_7 = arith.constant 0 : index
    %11 = vector.load %arg4[%c0_6, %c0_7] : memref<128x128xbf16, #tpu.memory_space<vmem>>, vector<128x128xbf16>
    %cst_8 = arith.constant dense<0.000000e+00> : vector<16x128xf32>
    %12 = tpu.matmul %2, %11, %cst_8 {dimension_numbers = #tpu.dot_dimension_numbers<[1], [0], [0], [1], [0, 0, 1, 1], [], []>} : vector<16x128xbf16>, vector<128x128xbf16>, vector<16x128xf32> -> vector<16x128xf32>
    %c0_9 = arith.constant 0 : index
    %c0_10 = arith.constant 0 : index
    %13 = vector.load %arg5[%c0_9, %c0_10] : memref<1x128xf32, #tpu.memory_space<vmem>>, vector<1x128xf32>
    %14 = vector.broadcast %13 : vector<1x128xf32> to vector<16x128xf32>
    %15 = arith.addf %12, %14 : vector<16x128xf32>
    %16 = arith.truncf %15 : vector<16x128xf32> to vector<16x128xbf16>
    %17 = vector.shape_cast %16 : vector<16x128xbf16> to vector<16x4x32xbf16>
    %18 = tpu.transpose %17, [1, 0, 2] : vector<16x4x32xbf16> -> vector<4x16x32xbf16>
    %c0_11 = arith.constant 0 : index
    %c0_12 = arith.constant 0 : index
    %19 = vector.load %arg6[%c0_11, %c0_12] : memref<128x128xbf16, #tpu.memory_space<vmem>>, vector<128x128xbf16>
    %cst_13 = arith.constant dense<0.000000e+00> : vector<16x128xf32>
    %20 = tpu.matmul %2, %19, %cst_13 {dimension_numbers = #tpu.dot_dimension_numbers<[1], [0], [0], [1], [0, 0, 1, 1], [], []>} : vector<16x128xbf16>, vector<128x128xbf16>, vector<16x128xf32> -> vector<16x128xf32>
    %c0_14 = arith.constant 0 : index
    %c0_15 = arith.constant 0 : index
    %21 = vector.load %arg7[%c0_14, %c0_15] : memref<1x128xf32, #tpu.memory_space<vmem>>, vector<1x128xf32>
    %22 = vector.broadcast %21 : vector<1x128xf32> to vector<16x128xf32>
    %23 = arith.addf %20, %22 : vector<16x128xf32>
    %24 = arith.truncf %23 : vector<16x128xf32> to vector<16x128xbf16>
    %25 = vector.shape_cast %24 : vector<16x128xbf16> to vector<16x4x32xbf16>
    %26 = tpu.transpose %25, [1, 0, 2] : vector<16x4x32xbf16> -> vector<4x16x32xbf16>
    "tpu.trace_start"() <{level = 10 : i32, message = "hqd,hkd->hqk"}> : () -> ()
    %cst_16 = arith.constant dense<0.000000e+00> : vector<4x16x16xf32>
    %27 = tpu.matmul %10, %18, %cst_16 {dimension_numbers = #tpu.dot_dimension_numbers<[2], [2], [1], [1], [0, 0, 0, 1, 1, 1], [0], [0]>} : vector<4x16x32xbf16>, vector<4x16x32xbf16>, vector<4x16x16xf32> -> vector<4x16x16xf32>
    "tpu.trace_stop"() : () -> ()
    %cst_17 = arith.constant dense<0xFF800000> : vector<4x16xf32>
    %28 = vector.multi_reduction <maximumf>, %27, %cst_17 [2] : vector<4x16x16xf32> to vector<4x16xf32>
    %29 = vector.shape_cast %28 : vector<4x16xf32> to vector<4x16x1xf32>
    %30 = vector.broadcast %29 : vector<4x16x1xf32> to vector<4x16x16xf32>
    %31 = arith.subf %27, %30 : vector<4x16x16xf32>
    %32 = math.exp %31 : vector<4x16x16xf32>
    %cst_18 = arith.constant dense<0.000000e+00> : vector<4x16xf32>
    %33 = vector.multi_reduction <add>, %32, %cst_18 [2] : vector<4x16x16xf32> to vector<4x16xf32>
    %34 = vector.shape_cast %33 : vector<4x16xf32> to vector<4x16x1xf32>
    %35 = tpu.reciprocal %34 {approx = true} : vector<4x16x1xf32> -> vector<4x16x1xf32>
    %36 = vector.broadcast %35 : vector<4x16x1xf32> to vector<4x16x16xf32>
    %37 = arith.mulf %32, %36 : vector<4x16x16xf32>
    %38 = arith.truncf %37 : vector<4x16x16xf32> to vector<4x16x16xbf16>
    "tpu.trace_start"() <{level = 10 : i32, message = "hqk,hkd->hqd"}> : () -> ()
    %cst_19 = arith.constant dense<0.000000e+00> : vector<4x16x32xf32>
    %39 = tpu.matmul %38, %26, %cst_19 {dimension_numbers = #tpu.dot_dimension_numbers<[2], [1], [1], [2], [0, 0, 0, 1, 1, 2], [0], [0]>} : vector<4x16x16xbf16>, vector<4x16x32xbf16>, vector<4x16x32xf32> -> vector<4x16x32xf32>
    "tpu.trace_stop"() : () -> ()
    %40 = arith.truncf %39 : vector<4x16x32xf32> to vector<4x16x32xbf16>
    %41 = tpu.transpose %40, [1, 0, 2] : vector<4x16x32xbf16> -> vector<16x4x32xbf16>
    %42 = vector.shape_cast %41 : vector<16x4x32xbf16> to vector<16x128xbf16>
    %c0_20 = arith.constant 0 : index
    %c0_21 = arith.constant 0 : index
    %43 = vector.load %arg8[%c0_20, %c0_21] : memref<128x128xbf16, #tpu.memory_space<vmem>>, vector<128x128xbf16>
    %cst_22 = arith.constant dense<0.000000e+00> : vector<16x128xf32>
    %44 = tpu.matmul %42, %43, %cst_22 {dimension_numbers = #tpu.dot_dimension_numbers<[1], [0], [0], [1], [0, 0, 1, 1], [], []>} : vector<16x128xbf16>, vector<128x128xbf16>, vector<16x128xf32> -> vector<16x128xf32>
    %c0_23 = arith.constant 0 : index
    %c0_24 = arith.constant 0 : index
    %45 = vector.load %arg9[%c0_23, %c0_24] : memref<1x128xf32, #tpu.memory_space<vmem>>, vector<1x128xf32>
    %46 = vector.broadcast %45 : vector<1x128xf32> to vector<16x128xf32>
    %47 = arith.addf %44, %46 : vector<16x128xf32>
    %48 = arith.addf %1, %47 : vector<16x128xf32>
    %cst_25 = arith.constant dense<0.000000e+00> : vector<16xf32>
    %49 = vector.multi_reduction <add>, %48, %cst_25 [1] : vector<16x128xf32> to vector<16xf32>
    %50 = vector.shape_cast %49 : vector<16xf32> to vector<16x1xf32>
    %cst_26 = arith.constant 1.280000e+02 : f32
    %51 = vector.broadcast %cst_26 : f32 to vector<16x1xf32>
    %52 = arith.divf %50, %51 : vector<16x1xf32>
    %53 = vector.broadcast %52 : vector<16x1xf32> to vector<16x128xf32>
    %54 = arith.subf %48, %53 : vector<16x128xf32>
    %55 = arith.mulf %54, %54 : vector<16x128xf32>
    %cst_27 = arith.constant dense<0.000000e+00> : vector<16xf32>
    %56 = vector.multi_reduction <add>, %55, %cst_27 [1] : vector<16x128xf32> to vector<16xf32>
    %57 = vector.shape_cast %56 : vector<16xf32> to vector<16x1xf32>
    %cst_28 = arith.constant 1.280000e+02 : f32
    %58 = vector.broadcast %cst_28 : f32 to vector<16x1xf32>
    %59 = arith.divf %57, %58 : vector<16x1xf32>
    %60 = vector.broadcast %52 : vector<16x1xf32> to vector<16x128xf32>
    %61 = arith.subf %48, %60 : vector<16x128xf32>
    %cst_29 = arith.constant 9.99999974E-6 : f32
    %62 = vector.broadcast %cst_29 : f32 to vector<16x1xf32>
    %63 = arith.addf %59, %62 : vector<16x1xf32>
    %64 = math.rsqrt %63 : vector<16x1xf32>
    %65 = vector.broadcast %64 : vector<16x1xf32> to vector<16x128xf32>
    %66 = arith.mulf %61, %65 : vector<16x128xf32>
    %c0_30 = arith.constant 0 : index
    %c0_31 = arith.constant 0 : index
    %67 = vector.load %arg14[%c0_30, %c0_31] : memref<1x128xf32, #tpu.memory_space<vmem>>, vector<1x128xf32>
    %68 = vector.broadcast %67 : vector<1x128xf32> to vector<16x128xf32>
    %69 = arith.mulf %66, %68 : vector<16x128xf32>
    %c0_32 = arith.constant 0 : index
    %c0_33 = arith.constant 0 : index
    %70 = vector.load %arg15[%c0_32, %c0_33] : memref<1x128xf32, #tpu.memory_space<vmem>>, vector<1x128xf32>
    %71 = vector.broadcast %70 : vector<1x128xf32> to vector<16x128xf32>
    %72 = arith.addf %69, %71 : vector<16x128xf32>
    %73 = arith.truncf %72 : vector<16x128xf32> to vector<16x128xbf16>
    %c0_34 = arith.constant 0 : index
    %c0_35 = arith.constant 0 : index
    %74 = vector.load %arg10[%c0_34, %c0_35] : memref<128x256xbf16, #tpu.memory_space<vmem>>, vector<128x256xbf16>
    %cst_36 = arith.constant dense<0.000000e+00> : vector<16x256xf32>
    %75 = tpu.matmul %73, %74, %cst_36 {dimension_numbers = #tpu.dot_dimension_numbers<[1], [0], [0], [1], [0, 0, 1, 1], [], []>} : vector<16x128xbf16>, vector<128x256xbf16>, vector<16x256xf32> -> vector<16x256xf32>
    %c0_37 = arith.constant 0 : index
    %c0_38 = arith.constant 0 : index
    %76 = vector.load %arg11[%c0_37, %c0_38] : memref<1x256xf32, #tpu.memory_space<vmem>>, vector<1x256xf32>
    %77 = vector.broadcast %76 : vector<1x256xf32> to vector<16x256xf32>
    %78 = arith.addf %75, %77 : vector<16x256xf32>
    %79 = arith.mulf %78, %78 : vector<16x256xf32>
    %80 = arith.mulf %78, %79 : vector<16x256xf32>
    %cst_39 = arith.constant 4.471500e-02 : f32
    %81 = vector.broadcast %cst_39 : f32 to vector<16x256xf32>
    %82 = arith.mulf %81, %80 : vector<16x256xf32>
    %83 = arith.addf %78, %82 : vector<16x256xf32>
    %cst_40 = arith.constant 0.797884583 : f32
    %84 = vector.broadcast %cst_40 : f32 to vector<16x256xf32>
    %85 = arith.mulf %84, %83 : vector<16x256xf32>
    %86 = math.tanh %85 : vector<16x256xf32>
    %cst_41 = arith.constant 1.000000e+00 : f32
    %87 = vector.broadcast %cst_41 : f32 to vector<16x256xf32>
    %88 = arith.addf %87, %86 : vector<16x256xf32>
    %cst_42 = arith.constant 5.000000e-01 : f32
    %89 = vector.broadcast %cst_42 : f32 to vector<16x256xf32>
    %90 = arith.mulf %89, %88 : vector<16x256xf32>
    %91 = arith.mulf %78, %90 : vector<16x256xf32>
    %92 = arith.truncf %91 : vector<16x256xf32> to vector<16x256xbf16>
    %c0_43 = arith.constant 0 : index
    %c0_44 = arith.constant 0 : index
    %93 = vector.load %arg12[%c0_43, %c0_44] : memref<256x128xbf16, #tpu.memory_space<vmem>>, vector<256x128xbf16>
    %cst_45 = arith.constant dense<0.000000e+00> : vector<16x128xf32>
    %94 = tpu.matmul %92, %93, %cst_45 {dimension_numbers = #tpu.dot_dimension_numbers<[1], [0], [0], [1], [0, 0, 1, 1], [], []>} : vector<16x256xbf16>, vector<256x128xbf16>, vector<16x128xf32> -> vector<16x128xf32>
    %c0_46 = arith.constant 0 : index
    %c0_47 = arith.constant 0 : index
    %95 = vector.load %arg13[%c0_46, %c0_47] : memref<1x128xf32, #tpu.memory_space<vmem>>, vector<1x128xf32>
    %96 = vector.broadcast %95 : vector<1x128xf32> to vector<16x128xf32>
    %97 = arith.addf %94, %96 : vector<16x128xf32>
    %98 = arith.addf %72, %97 : vector<16x128xf32>
    %cst_48 = arith.constant dense<0.000000e+00> : vector<16xf32>
    %99 = vector.multi_reduction <add>, %98, %cst_48 [1] : vector<16x128xf32> to vector<16xf32>
    %100 = vector.shape_cast %99 : vector<16xf32> to vector<16x1xf32>
    %cst_49 = arith.constant 1.280000e+02 : f32
    %101 = vector.broadcast %cst_49 : f32 to vector<16x1xf32>
    %102 = arith.divf %100, %101 : vector<16x1xf32>
    %103 = vector.broadcast %102 : vector<16x1xf32> to vector<16x128xf32>
    %104 = arith.subf %98, %103 : vector<16x128xf32>
    %105 = arith.mulf %104, %104 : vector<16x128xf32>
    %cst_50 = arith.constant dense<0.000000e+00> : vector<16xf32>
    %106 = vector.multi_reduction <add>, %105, %cst_50 [1] : vector<16x128xf32> to vector<16xf32>
    %107 = vector.shape_cast %106 : vector<16xf32> to vector<16x1xf32>
    %cst_51 = arith.constant 1.280000e+02 : f32
    %108 = vector.broadcast %cst_51 : f32 to vector<16x1xf32>
    %109 = arith.divf %107, %108 : vector<16x1xf32>
    %110 = vector.broadcast %102 : vector<16x1xf32> to vector<16x128xf32>
    %111 = arith.subf %98, %110 : vector<16x128xf32>
    %cst_52 = arith.constant 9.99999974E-6 : f32
    %112 = vector.broadcast %cst_52 : f32 to vector<16x1xf32>
    %113 = arith.addf %109, %112 : vector<16x1xf32>
    %114 = math.rsqrt %113 : vector<16x1xf32>
    %115 = vector.broadcast %114 : vector<16x1xf32> to vector<16x128xf32>
    %116 = arith.mulf %111, %115 : vector<16x128xf32>
    %c0_53 = arith.constant 0 : index
    %c0_54 = arith.constant 0 : index
    %117 = vector.load %arg16[%c0_53, %c0_54] : memref<1x128xf32, #tpu.memory_space<vmem>>, vector<1x128xf32>
    %118 = vector.broadcast %117 : vector<1x128xf32> to vector<16x128xf32>
    %119 = arith.mulf %116, %118 : vector<16x128xf32>
    %c0_55 = arith.constant 0 : index
    %c0_56 = arith.constant 0 : index
    %120 = vector.load %arg17[%c0_55, %c0_56] : memref<1x128xf32, #tpu.memory_space<vmem>>, vector<1x128xf32>
    %121 = vector.broadcast %120 : vector<1x128xf32> to vector<16x128xf32>
    %122 = arith.addf %119, %121 : vector<16x128xf32>
    %c0_57 = arith.constant 0 : index
    %c0_58 = arith.constant 0 : index
    %c0_59 = arith.constant 0 : index
    %123 = vector.load %arg18[%c0_57, %c0_58, %c0_59] : memref<1x16x128xf32, #tpu.memory_space<vmem>>, vector<1x16x128xf32>
    %124 = vector.shape_cast %123 : vector<1x16x128xf32> to vector<16x128xf32>
    %125 = vector.shape_cast %122 : vector<16x128xf32> to vector<1x16x128xf32>
    tpu.vector_store %arg18[%c0_57, %c0_58, %c0_59], %125 {strides = array<i32>} : memref<1x16x128xf32, #tpu.memory_space<vmem>>, vector<1x16x128xf32>,
    return
  }
  func.func @transform_0(%arg0: i32) -> (i32, i32, i32) {
    %c0_i32 = arith.constant 0 : i32
    %c0_i32_0 = arith.constant 0 : i32
    %c0_i32_1 = arith.constant 0 : i32
    return %arg0, %c0_i32, %c0_i32_0 : i32, i32, i32
  }
  func.func @transform_1(%arg0: i32) -> (i32, i32) {
    %c0_i32 = arith.constant 0 : i32
    %c0_i32_0 = arith.constant 0 : i32
    %c0_i32_1 = arith.constant 0 : i32
    return %c0_i32, %c0_i32_0 : i32, i32
  }
  func.func @transform_2(%arg0: i32) -> (i32, i32) {
    %c0_i32 = arith.constant 0 : i32
    %c0_i32_0 = arith.constant 0 : i32
    %c0_i32_1 = arith.constant 0 : i32
    return %c0_i32, %c0_i32_0 : i32, i32
  }
  func.func @transform_3(%arg0: i32) -> (i32, i32) {
    %c0_i32 = arith.constant 0 : i32
    %c0_i32_0 = arith.constant 0 : i32
    %c0_i32_1 = arith.constant 0 : i32
    return %c0_i32, %c0_i32_0 : i32, i32
  }
  func.func @transform_4(%arg0: i32) -> (i32, i32) {
    %c0_i32 = arith.constant 0 : i32
    %c0_i32_0 = arith.constant 0 : i32
    %c0_i32_1 = arith.constant 0 : i32
    return %c0_i32, %c0_i32_0 : i32, i32
  }
  func.func @transform_5(%arg0: i32) -> (i32, i32) {
    %c0_i32 = arith.constant 0 : i32
    %c0_i32_0 = arith.constant 0 : i32
    %c0_i32_1 = arith.constant 0 : i32
    return %c0_i32, %c0_i32_0 : i32, i32
  }
  func.func @transform_6(%arg0: i32) -> (i32, i32) {
    %c0_i32 = arith.constant 0 : i32
    %c0_i32_0 = arith.constant 0 : i32
    %c0_i32_1 = arith.constant 0 : i32
    return %c0_i32, %c0_i32_0 : i32, i32
  }
  func.func @transform_7(%arg0: i32) -> (i32, i32) {
    %c0_i32 = arith.constant 0 : i32
    %c0_i32_0 = arith.constant 0 : i32
    %c0_i32_1 = arith.constant 0 : i32
    return %c0_i32, %c0_i32_0 : i32, i32
  }
  func.func @transform_8(%arg0: i32) -> (i32, i32) {
    %c0_i32 = arith.constant 0 : i32
    %c0_i32_0 = arith.constant 0 : i32
    %c0_i32_1 = arith.constant 0 : i32
    return %c0_i32, %c0_i32_0 : i32, i32
  }
  func.func @transform_9(%arg0: i32) -> (i32, i32) {
    %c0_i32 = arith.constant 0 : i32
    %c0_i32_0 = arith.constant 0 : i32
    %c0_i32_1 = arith.constant 0 : i32
    return %c0_i32, %c0_i32_0 : i32, i32
  }
  func.func @transform_10(%arg0: i32) -> (i32, i32) {
    %c0_i32 = arith.constant 0 : i32
    %c0_i32_0 = arith.constant 0 : i32
    %c0_i32_1 = arith.constant 0 : i32
    return %c0_i32, %c0_i32_0 : i32, i32
  }
  func.func @transform_11(%arg0: i32) -> (i32, i32) {
    %c0_i32 = arith.constant 0 : i32
    %c0_i32_0 = arith.constant 0 : i32
    %c0_i32_1 = arith.constant 0 : i32
    return %c0_i32, %c0_i32_0 : i32, i32
  }
  func.func @transform_12(%arg0: i32) -> (i32, i32) {
    %c0_i32 = arith.constant 0 : i32
    %c0_i32_0 = arith.constant 0 : i32
    %c0_i32_1 = arith.constant 0 : i32
    return %c0_i32, %c0_i32_0 : i32, i32
  }
  func.func @transform_13(%arg0: i32) -> (i32, i32) {
    %c0_i32 = arith.constant 0 : i32
    %c0_i32_0 = arith.constant 0 : i32
    %c0_i32_1 = arith.constant 0 : i32
    return %c0_i32, %c0_i32_0 : i32, i32
  }
  func.func @transform_14(%arg0: i32) -> (i32, i32) {
    %c0_i32 = arith.constant 0 : i32
    %c0_i32_0 = arith.constant 0 : i32
    %c0_i32_1 = arith.constant 0 : i32
    return %c0_i32, %c0_i32_0 : i32, i32
  }
  func.func @transform_15(%arg0: i32) -> (i32, i32) {
    %c0_i32 = arith.constant 0 : i32
    %c0_i32_0 = arith.constant 0 : i32
    %c0_i32_1 = arith.constant 0 : i32
    return %c0_i32, %c0_i32_0 : i32, i32
  }
  func.func @transform_16(%arg0: i32) -> (i32, i32) {
    %c0_i32 = arith.constant 0 : i32
    %c0_i32_0 = arith.constant 0 : i32
    %c0_i32_1 = arith.constant 0 : i32
    return %c0_i32, %c0_i32_0 : i32, i32
  }
  func.func @transform_17(%arg0: i32) -> (i32, i32, i32) {
    %c0_i32 = arith.constant 0 : i32
    %c0_i32_0 = arith.constant 0 : i32
    %c0_i32_1 = arith.constant 0 : i32
    return %arg0, %c0_i32, %c0_i32_0 : i32, i32, i32
  }
}

</mosaic_0001>

<bundles_post_ra>
// kernel: tpu_custom_call.1
= control target key start
LH: loop header
LB: loop body
LE: loop exit
PB: predicated region body
PF: predicated region fallthrough
CT: control target
= control target key end

     0   :  { %s4903_s0 = inlined_call_operand.hbm [shape: f32[2,16,128], index: 0, kind: input, shape index: {}]   ;;  %s4904_s1 = inlined_call_operand.hbm [shape: bf16[128,128], index: 1, kind: input, shape index: {}]   ;;  %s4905_s2 = inlined_call_operand.vmem [shape: f32[1,128], index: 2, kind: input, shape index: {}]   ;;  %s4906_s3 = inlined_call_operand.hbm [shape: bf16[128,128], index: 3, kind: input, shape index: {}]   ;;  %s4907_s4 = inlined_call_operand.vmem [shape: f32[1,128], index: 4, kind: input, shape index: {}]   ;;  %s4908_s5 = inlined_call_operand.hbm [shape: bf16[128,128], index: 5, kind: input, shape index: {}]   ;;  %s4909_s6 = inlined_call_operand.vmem [shape: f32[1,128], index: 6, kind: input, shape index: {}]   ;;  %s4910_s7 = inlined_call_operand.hbm [shape: bf16[128,128], index: 7, kind: input, shape index: {}]   ;;  %s4911_s8 = inlined_call_operand.vmem [shape: f32[1,128], index: 8, kind: input, shape index: {}]   ;;  %s4912_s9 = inlined_call_operand.hbm [shape: bf16[128,256], index: 9, kind: input, shape index: {}]   ;;  %s4913_s10 = inlined_call_operand.vmem [shape: f32[1,256], index: 10, kind: input, shape index: {}]   ;;  %s4914_s11 = inlined_call_operand.hbm [shape: bf16[256,128], index: 11, kind: input, shape index: {}]   ;;  %s4915_s12 = inlined_call_operand.vmem [shape: f32[1,128], index: 12, kind: input, shape index: {}]   ;;  %s4916_s13 = inlined_call_operand.vmem [shape: f32[1,128], index: 13, kind: input, shape index: {}]   ;;  %s4917_s14 = inlined_call_operand.vmem [shape: f32[1,128], index: 14, kind: input, shape index: {}]   ;;  %s4918_s15 = inlined_call_operand.vmem [shape: f32[1,128], index: 15, kind: input, shape index: {}]   ;;  %s4919_s16 = inlined_call_operand.vmem [shape: f32[1,128], index: 16, kind: input, shape index: {}]   ;;  %s4920_s17 = inlined_call_operand.hbm [shape: f32[2,16,128], index: 17, kind: output, shape index: {}]  }
   0x1   :  { %4933 = sst [smem:[#allocation20_spill]] %s4903_s0 }
   0x2   :  { %4934 = sst [smem:[#allocation21_spill]] %s4904_s1 }
   0x3   :  { %4935 = sst [smem:[#allocation22_spill]] %s4908_s5 }
   0x4   :  { %4936 = sst [smem:[#allocation23_spill]] %s4911_s8 }
   0x5   :  { %4937 = sst [smem:[#allocation24_spill]] %s4913_s10 }
   0x6   :  { %4938 = sst [smem:[#allocation25_spill]] %s4915_s12 }
   0x7   :  { %4939 = sst [smem:[#allocation26_spill]] %s4916_s13 }
   0x8   :  { %4940 = sst [smem:[#allocation27_spill]] %s4917_s14 }
   0x9   :  { %4941 = sst [smem:[#allocation28_spill]] %s4918_s15 }
   0xa   :  { %4942 = sst [smem:[#allocation29_spill]] %s4919_s16 }
   0xb   :  { %4943 = sst [smem:[#allocation30_spill]] %s4920_s17 }
   0xc   :  { %22 = vsyncpa [#allocation3], 0 }
   0xd   :  { %24 = vsyncpa [#allocation3 + $0x1], 0 }
   0xe   :  { %25 = vsyncpa [#allocation6], 0 }
   0xf   :  { %26 = vsyncpa [#allocation9], 0 }
  0x10   :  { %27 = vsyncpa [#allocation12], 0 }
  0x11   :  { %28 = vsyncpa [#allocation4], 0 }
  0x12   :  { %30 = vsyncpa [#allocation4 + $0x1], 0  ;;  %s4215_s24 = smov 0   ;;  %s4217_s25 = smov 0  }
  0x13   :  { %s4219_s26 = smov 0   ;;  %s4221_s27 = smov 0  }
  0x14 LB: > { %s4103_s28 = smov [#allocation5]   ;;  %s4236_s0 = sadd.s32 4294967295, %s4101_s27   ;;  %s4101_s27 = sphi %s4221_s27, %s4980_s27   ;;  %s4097_s26 = sphi %s4219_s26, %s4979_s26   ;;  %s4093_s25 = sphi %s4217_s25, %s4978_s25   ;;  %s4089_s24 = sphi %s4215_s24, %s4977_s24  }
  0x15   : > { %s441_s29 = sshll.u32 %s4103_s28, 4  ;;  %p3256_p0 = scmp.ge.s32.totalorder %s4101_s27, 1  ;;  %s4241_s29 = int_to_ptr.vmem [resolvable:$true] %s441_s29 }
  0x16   : > { %p4929_p1 = scmp.eq.s32.totalorder %s4236_s0, 0  ;;  %p429_p2 = scmp.lt.s32.totalorder %s4101_s27, 3 }
  0x17   : > { %s4104_s18 = smov [#allocation8]   ;;  %s4105_s20 = smov [#allocation11]  }
  0x18   : > { %p4243_p3 = pnand %p3256_p0, %p429_p2  ;;  %s473_s19 = sshll.u32 %s4104_s18, 4  ;;  %s4256_s19 = int_to_ptr.vmem [resolvable:$true] %s473_s19 }
  0x19   : > { %s505_s21 = sshll.u32 %s4105_s20, 4  ;;  %s4946_s28 = sld [smem:[#allocation21_spill]]  ;;  %s4258_s21 = int_to_ptr.vmem [resolvable:$true] %s505_s21 }
  0x1a   : > { %s4944_s30 = scalar_select %p4243_p3, 1, 0 }
  0x1b   : > { %p3610_p5 = pneg %p4243_p3 }
  0x1d   : > { %p4252_p6 = pnand %p3610_p5, %p4929_p1 }
  0x1f   : > { %s3825_s17 = scalar_lea.hbm %s4946_s28, 1024  ;;  %p4268_p8 = pneg %p4252_p6 }
  0x20   : > { %p3826_p7 = scmp.ne.s32.totalorder %s4946_s28, %s3825_s17  ;;  %p3832_p11 = scmp.lt.u32.totalorder %s3825_s17, %s4946_s28 }
  0x22   : > { %p3828_p9 = pnand %p4268_p8, %p3826_p7 }
  0x24   : > { %p3829_p10 = pneg %p3828_p9 }
  0x26   : > { %p3834_p12 = pnand %p3832_p11, %p3829_p10 }
  0x28   : > { %3837 = shalt.err (!%p3834_p12)
}
  0x29   : > { %s3838_s15 = scalar_lea.vmem %s4241_s29, 1024  ;;  %p3846_p5 = scmp.lt.s32.totalorder %s4241_s29, %s4241_s29 }
  0x2a   : > { %p3839_p13 = scmp.ne.s32.totalorder %s4241_s29, %s3838_s15  ;;  %p3847_p4 = scmp.lt.s32.totalorder %s3838_s15, %s3838_s15 }
  0x2c   : > { %p3841_p0 = pnand %p3839_p13, %p4268_p8  ;;  %p3848_p7 = por %p3847_p4, %p3846_p5 }
  0x2e   : > { %p3842_p2 = pneg %p3841_p0 }
  0x30   : > { %p3849_p9 = pnand %p3848_p7, %p3842_p2 }
  0x32   : > { %3852 = shalt.err (!%p3849_p9)
}
  0x33   : > { %s4924_s16 = smov 64   ;;  %s4926_s12 = smov 4  }
  0x34   : > { %3613 = dma.hbm_to_vmem [thread:$0]  (!%p4252_p6), %s4946_s28, 1024, %s4241_s29, [#allocation6], %s4924_s16, %s4924_s16, %s4926_s12  }
  0x35   : > { %s4948_s5 = sld [smem:[#allocation22_spill]] }
  0x3b   : > { %s3853_s15 = scalar_lea.hbm %s4948_s5, 1024 }
  0x3c   : > { %p3854_p4 = scmp.ne.s32.totalorder %s4948_s5, %s3853_s15  ;;  %p3860_p12 = scmp.lt.u32.totalorder %s3853_s15, %s4948_s5 }
  0x3e   : > { %p3856_p10 = pnand %p3854_p4, %p4268_p8 }
  0x40   : > { %p3857_p11 = pneg %p3856_p10 }
  0x42   : > { %p3862_p13 = pnand %p3860_p12, %p3857_p11 }
  0x44   : > { %3865 = shalt.err (!%p3862_p13)
}
  0x45   : > { %s3866_s29 = scalar_lea.vmem %s4256_s19, 1024  ;;  %p3874_p7 = scmp.lt.s32.totalorder %s4256_s19, %s4256_s19 }
  0x46   : > { %p3867_p0 = scmp.ne.s32.totalorder %s4256_s19, %s3866_s29  ;;  %p3875_p9 = scmp.lt.s32.totalorder %s3866_s29, %s3866_s29 }
  0x48   : > { %p3869_p2 = pnand %p3867_p0, %p4268_p8  ;;  %p3876_p4 = por %p3875_p9, %p3874_p7 }
  0x4a   : > { %p3870_p5 = pneg %p3869_p2 }
  0x4c   : > { %p3877_p10 = pnand %p3876_p4, %p3870_p5 }
  0x4e   : > { %3880 = shalt.err (!%p3877_p10)
}
  0x4f   : > { %3619 = dma.hbm_to_vmem [thread:$0]  (!%p4252_p6), %s4948_s5, 1024, %s4256_s19, [#allocation9], %s4924_s16, %s4924_s16, %s4926_s12  }
  0x50   : > { %s3881_s17 = scalar_lea.hbm %s4912_s9, 2048 }
  0x51   : > { %p3882_p11 = scmp.ne.s32.totalorder %s4912_s9, %s3881_s17  ;;  %p3888_p0 = scmp.lt.u32.totalorder %s3881_s17, %s4912_s9 }
  0x53   : > { %p3884_p12 = pnand %p3882_p11, %p4268_p8 }
  0x55   : > { %p3885_p13 = pneg %p3884_p12 }
  0x57   : > { %p3890_p2 = pnand %p3888_p0, %p3885_p13 }
  0x59   : > { %3893 = shalt.err (!%p3890_p2)
}
  0x5a   : > { %s3894_s19 = scalar_lea.vmem %s4258_s21, 2048  ;;  %p3902_p4 = scmp.lt.s32.totalorder %s4258_s21, %s4258_s21 }
  0x5b   : > { %p3895_p5 = scmp.ne.s32.totalorder %s4258_s21, %s3894_s19  ;;  %p3903_p10 = scmp.lt.s32.totalorder %s3894_s19, %s3894_s19 }
  0x5d   : > { %p3897_p7 = pnand %p3895_p5, %p4268_p8  ;;  %p3904_p11 = por %p3903_p10, %p3902_p4 }
  0x5f   : > { %p3898_p9 = pneg %p3897_p7 }
  0x61   : > { %p3905_p12 = pnand %p3904_p11, %p3898_p9 }
  0x63   : > { %3908 = shalt.err (!%p3905_p12)
}
  0x64   : > { %s4931_s29 = smov 128   ;;  %s4109_s8 = smov 8  }
  0x65   : > { %3625 = dma.hbm_to_vmem [thread:$0]  (!%p4252_p6), %s4912_s9, 2048, %s4258_s21, [#allocation12], %s4931_s29, %s4931_s29, %s4109_s8  }
  0x66   : > { %s4110_s14 = smov [#allocation7]   ;;  %s4111_s22 = smov [#allocation10]  }
  0x67   : > { %s457_s17 = sshll.u32 %s4110_s14, 4  ;;  %s489_s23 = sshll.u32 %s4111_s22, 4  ;;  %s458_s17 = int_to_ptr.vmem [resolvable:$true] %s457_s17  ;;  %s490_s23 = int_to_ptr.vmem [resolvable:$true] %s489_s23 }
  0x68   : > { %s3909_s19 = scalar_lea.hbm %s4906_s3, 1024 }
  0x69   : > { %p3910_p13 = scmp.ne.s32.totalorder %s4906_s3, %s3909_s19  ;;  %p3916_p5 = scmp.lt.u32.totalorder %s3909_s19, %s4906_s3 }
  0x6b   : > { %p3912_p0 = pnand %p3910_p13, %p4268_p8 }
  0x6d   : > { %p3913_p2 = pneg %p3912_p0 }
  0x6f   : > { %p3918_p7 = pnand %p3916_p5, %p3913_p2 }
  0x71   : > { %3921 = shalt.err (!%p3918_p7)
}
  0x72   : > { %s3922_s21 = scalar_lea.vmem %s458_s17, 1024  ;;  %p3930_p11 = scmp.lt.s32.totalorder %s458_s17, %s458_s17 }
  0x73   : > { %p3923_p9 = scmp.ne.s32.totalorder %s458_s17, %s3922_s21  ;;  %p3931_p12 = scmp.lt.s32.totalorder %s3922_s21, %s3922_s21 }
  0x75   : > { %p3925_p4 = pnand %p3923_p9, %p4268_p8  ;;  %p3932_p1 = por %p3931_p12, %p3930_p11 }
  0x77   : > { %p3926_p10 = pneg %p3925_p4 }
  0x79   : > { %p3933_p3 = pnand %p3932_p1, %p3926_p10 }
  0x7b   : > { %3936 = shalt.err (!%p3933_p3)
}
  0x7c   : > { %s4949_s16 = smov 4   ;;  %s4950_s12 = smov 64  }
  0x7d   : > { %3616 = dma.hbm_to_vmem [thread:$0]  (!%p4252_p6), %s4906_s3, 1024, %s458_s17, [#allocation6], %s4950_s12, %s4950_s12, %s4949_s16  }
  0x7e   : > { %s3937_s14 = scalar_lea.hbm %s4910_s7, 1024 }
  0x7f   : > { %p3938_p1 = scmp.ne.s32.totalorder %s4910_s7, %s3937_s14  ;;  %p3944_p0 = scmp.lt.u32.totalorder %s3937_s14, %s4910_s7 }
  0x81   : > { %p3940_p3 = pnand %p3938_p1, %p4268_p8 }
  0x83   : > { %p3941_p13 = pneg %p3940_p3 }
  0x85   : > { %p3946_p2 = pnand %p3944_p0, %p3941_p13 }
  0x87   : > { %3949 = shalt.err (!%p3946_p2)
}
  0x88   : > { %s3950_s21 = scalar_lea.vmem %s490_s23, 1024  ;;  %p3958_p4 = scmp.lt.s32.totalorder %s490_s23, %s490_s23 }
  0x89   : > { %p3951_p5 = scmp.ne.s32.totalorder %s490_s23, %s3950_s21  ;;  %p3959_p10 = scmp.lt.s32.totalorder %s3950_s21, %s3950_s21 }
  0x8b   : > { %p3953_p7 = pnand %p3951_p5, %p4268_p8  ;;  %p3960_p11 = por %p3959_p10, %p3958_p4 }
  0x8d   : > { %p3954_p9 = pneg %p3953_p7 }
  0x8f   : > { %p3961_p12 = pnand %p3960_p11, %p3954_p9 }
  0x91   : > { %3964 = shalt.err (!%p3961_p12)
}
  0x92   : > { %3622 = dma.hbm_to_vmem [thread:$0]  (!%p4252_p6), %s4910_s7, 1024, %s490_s23, [#allocation9], %s4950_s12, %s4950_s12, %s4949_s16  }
  0x93   : > { %s4112_s28 = smov [#allocation13]   ;;  %s3965_s22 = scalar_lea.hbm %s4914_s11, 2048 }
  0x94   : > { %s521_s10 = sshll.u32 %s4112_s28, 4  ;;  %p3966_p1 = scmp.ne.s32.totalorder %s4914_s11, %s3965_s22  ;;  %s522_s10 = int_to_ptr.vmem [resolvable:$true] %s521_s10 }
  0x95   : > { %p3972_p0 = scmp.lt.u32.totalorder %s3965_s22, %s4914_s11 }
  0x96   : > { %p3968_p3 = pnand %p3966_p1, %p4268_p8 }
  0x98   : > { %p3969_p13 = pneg %p3968_p3 }
  0x9a   : > { %p3974_p2 = pnand %p3972_p0, %p3969_p13 }
  0x9c   : > { %3977 = shalt.err (!%p3974_p2)
}
  0x9d   : > { %s3978_s23 = scalar_lea.vmem %s522_s10, 2048  ;;  %p3986_p4 = scmp.lt.s32.totalorder %s522_s10, %s522_s10 }
  0x9e   : > { %p3979_p5 = scmp.ne.s32.totalorder %s522_s10, %s3978_s23  ;;  %p3987_p10 = scmp.lt.s32.totalorder %s3978_s23, %s3978_s23 }
  0xa0   : > { %p3981_p7 = pnand %p3979_p5, %p4268_p8  ;;  %p3988_p11 = por %p3987_p10, %p3986_p4 }
  0xa2   : > { %p3982_p9 = pneg %p3981_p7 }
  0xa4   : > { %p3989_p12 = pnand %p3988_p11, %p3982_p9 }
  0xa6   : > { %3992 = shalt.err (!%p3989_p12)
}
  0xa7   : > { %3628 = dma.hbm_to_vmem [thread:$0]  (!%p4252_p6), %s4914_s11, 2048, %s522_s10, [#allocation12], %s4950_s12, %s4950_s12, %s4949_s16  }
  0xa8   : > { %s3255_s1 = sadd.s32 4294967294, %s4101_s27   ;;  %s4409_s18 = sadd.s32 1, %s4101_s27  }
  0xa9   : > { %s40_s28 = ssub.s32 %s4101_s27, %s4409_s18  ;;  %s43_s13 = sadd.s32 1, %s4097_s26 }
  0xaa   : > { %p41_p8 = scmp.eq.s32.totalorder %s40_s28, 0  ;;  %p50_p1 = scmp.ne.s32.totalorder %s4097_s26, %s4093_s25 }
  0xab   : > { %p51_p3 = scmp.eq.s32.totalorder %s4101_s27, 0  ;;  %p56_p13 = scmp.ne.s32.totalorder %s4093_s25, %s4089_s24 }
  0xac   : > { %s4420_s14 = scalar_select %p41_p8, %s4097_s26, %s43_s13  }
  0xad   : > { %p4422_p0 = por %p51_p3, %p50_p1  ;;  %p4952_p2 = scmp.eq.s32.totalorder %s4236_s0, 0 }
  0xae   : > { %p416_p5 = scmp.eq.s32.totalorder %s4236_s0, 1  ;;  %p422_p7 = scmp.eq.s32.totalorder %s3255_s1, 1 }
  0xaf   : > { %p4428_p6 = por %p4952_p2, %p56_p13  ;;  %p3643_p9 = scmp.lt.s32.totalorder %s4101_s27, 2 }
  0xb0   : > { %s550_s12 = sand.u32 1, %s4097_s26   ;;  %p4435_p4 = por %p416_p5, %p50_p1 }
  0xb1   : > { %p4439_p10 = por %p422_p7, %p56_p13  ;;  %s3264_s15 = sshll.u32 %s550_s12, 4 }
  0xb2   : > { %s4954_s10 = scalar_select %p4435_p4, 1, 0 }
  0xb3   : > { %s4955_s20 = scalar_select %p4439_p10, 1, 0 }
  0xb4   : > { %s3378_s19 = sshll.u32 %s4101_s27, 8  ;;  %s4956_s17 = sld [smem:[#allocation20_spill]] }
  0xb5   : > { %s554_s1 = scalar_lea.vmem [#allocation2], %s3264_s15  ;;  %p4453_p11 = pnand %p3643_p9, %p4422_p0 }
  0xb6   : > { %s561_s28 = sshll.u32 %s554_s1, 4  ;;  %s4457_s29 = scalar_lea.sflag [#allocation3], %s550_s12  ;;  %s4449_s28 = int_to_ptr.vmem [resolvable:$true] %s561_s28 }
  0xb7   : > { %p3995_p8 = pneg %p4453_p11 }
  0xba   : > { %s4447_s5 = scalar_lea.hbm %s4956_s17, %s3378_s19  ;;  %s3998_s22 = scalar_lea.hbm %s4956_s17, 512 }
  0xbb   : > { %s3993_s21 = scalar_lea.hbm %s4447_s5, 256  ;;  %p3999_p13 = scmp.lt.u32.totalorder %s4447_s5, %s4956_s17 }
  0xbc   : > { %p3994_p12 = scmp.ne.s32.totalorder %s4447_s5, %s3993_s21  ;;  %p4000_p0 = scmp.lt.u32.totalorder %s3998_s22, %s3993_s21 }
  0xbd   : > { %p4002_p5 = scmp.lt.u32.totalorder %s3993_s21, %s4447_s5 }
  0xbe   : > { %p3996_p1 = pnand %p3995_p8, %p3994_p12  ;;  %p4001_p2 = por %p4000_p0, %p3999_p13 }
  0xc0   : > { %p3997_p3 = pneg %p3996_p1  ;;  %p4003_p7 = por %p4002_p5, %p4001_p2 }
  0xc2   : > { %p4004_p9 = pnand %p4003_p7, %p3997_p3 }
  0xc4   : > { %4007 = shalt.err (!%p4004_p9)
}
  0xc5   : > { %s4008_s12 = scalar_lea.vmem %s4449_s28, 256  ;;  %s4113_s15 = smov [#allocation2]  }
  0xc6   : > { %p4009_p12 = scmp.ne.s32.totalorder %s4449_s28, %s4008_s12  ;;  %s4013_s19 = sshll.u32 %s4113_s15, 4  ;;  %s4014_s19 = int_to_ptr.vmem [resolvable:$false] %s4013_s19 }
  0xc7   : > { %s4015_s23 = scalar_lea.vmem %s4014_s19, 512  ;;  %p4016_p4 = scmp.lt.s32.totalorder %s4449_s28, %s4014_s19 }
  0xc8   : > { %p4011_p1 = pnand %p4009_p12, %p3995_p8  ;;  %p4017_p13 = scmp.lt.s32.totalorder %s4015_s23, %s4008_s12 }
  0xca   : > { %p4012_p10 = pneg %p4011_p1  ;;  %p4018_p0 = por %p4017_p13, %p4016_p4 }
  0xcc   : > { %p4019_p2 = pnand %p4018_p0, %p4012_p10 }
  0xce   : > { %4022 = shalt.err (!%p4019_p2)
}
  0xcf   : > { %s4958_s21 = smov 128   ;;  %p4959_p8 = scmp.ne.s32.totalorder %s4944_s30, 0 }
  0xd0   : > { %3632 = dma.hbm_to_vmem [thread:$0]  (!%p4453_p11), %s4447_s5, 256, %s4449_s28, %s4457_s29, %s4958_s21, %s4958_s21, %s4109_s8  }
  0xd1   : > { %573 = sbr.rel (%p4959_p8) target bundleno = 2925 (0xb6d), region = 88  ;;  %s4491_s22 = sand.u32 (!%p4959_p8), 1, %s4093_s25  }
  0xd2   : > { %s3268_s1 = sshll.u32 (!%p4959_p8), %s4491_s22, 4  ;;  %s576_s12 = scalar_lea.sflag (!%p4959_p8), [#allocation3], %s4491_s22 }
  0xd3   : > { %s4497_s13 = scalar_lea.vmem (!%p4959_p8), [#allocation2], %s3268_s1 }
  0xd8   : > { %4068 = dma.done.wait (%p4428_p6), %s576_s12, 256  }
  0xd9   : > { %4070 = vsyncadd (%p4428_p6), %s576_s12, 4294967040  ;;  %p4960_p4 = scmp.eq.s32.totalorder %s4236_s0, 0 }
  0xdb   : > { %4072 = dma.done.wait (%p4960_p4), [#allocation6], 2048   ;;  %p4961_p10 = pmov %p4960_p4 }
  0xdc   : > { %p4962_p11 = pmov %p4960_p4 }
  0xdd   : > { %4074 = vsyncadd (%p4961_p10), [#allocation6], 4294965248 }
  0xde   : > { %4076 = dma.done.wait (%p4962_p11), [#allocation9], 2048   ;;  %p4963_p3 = pmov %p4960_p4 }
  0xe0   : > { %4078 = vsyncadd (%p4963_p3), [#allocation9], 4294965248  ;;  %p4964_p5 = pmov %p4963_p3 }
  0xe1   : > { %p4965_p7 = pmov %p4963_p3 }
  0xe2   : > { %4080 = dma.done.wait (%p4964_p5), [#allocation12], 4096  }
  0xe3   : > { %4082 = vsyncadd (%p4965_p7), [#allocation12], 4294963200  ;;  %v4114_v0 = vmov 0.0   ;;  %vm4115_vm0 = vmmov 0   ;;  %v3703_v1 = vld [vmem:[#allocation7] sm:$0xff]   ;;  %v3705_v3 = vld [vmem:[#allocation7 + $0x8] sm:$0xff]   ;;  %v804_v46 = vlaneseq }
  0xe4   : > { %3474 = vmatprep.subr.bf16.mxu1 %v4114_v0  ;;  %3454 = vmatprep.subr.bf16.mxu0 %v4114_v0  ;;  %v3704_v2 = vld [vmem:[#allocation5] sm:$0xff]   ;;  %v3706_v4 = vld [vmem:[#allocation5 + $0x8] sm:$0xff]   ;;  %v3707_v5 = vld [vmem:[#allocation7 + $0x10] sm:$0xff]   ;;  %s4116_s5 = smov 32   ;;  %s4117_s28 = smov 96   ;;  %v4121_v52 = vmov 0  }
  0xe5   : > { %3490 = vmatprep.mubr.msk.bf16.mxu1 %vm4115_vm0, %v4114_v0  ;;  %3470 = vmatprep.mubr.msk.bf16.mxu0 %vm4115_vm0, %v4114_v0  ;;  %v3708_v6 = vld [vmem:[#allocation5 + $0x10] sm:$0xff]   ;;  %v3709_v7 = vld [vmem:[#allocation7 + $0x18] sm:$0xff]   ;;  %v3711_v9 = vld [vmem:[#allocation7 + $0x20] sm:$0xff]   ;;  %s4118_s15 = smov 64   ;;  %v4119_v44 = vmov 1983009808   ;;  %v4574_v53 = vpack.i.b16 %v4121_v52, %v4121_v52 }
  0xe6   : > { %3475 = vmatpush3.bf16.msra.mxu1 %v3703_v1  ;;  %3455 = vmatpush3.bf16.msra.mxu0 %v3704_v2  ;;  %v3710_v8 = vld [vmem:[#allocation5 + $0x18] sm:$0xff]   ;;  %v3712_v10 = vld [vmem:[#allocation5 + $0x20] sm:$0xff]   ;;  %v3713_v11 = vld [vmem:[#allocation7 + $0x28] sm:$0xff]   ;;  %v802_v45 = vunpack.c.l.s4 %v4119_v44  ;;  %v4570_v48 = vshrl.u32 %v804_v46, 7  ;;  %v4120_v49 = vmov 1934713408  }
  0xe7   : > { %3476 = vmatprep.subr.bf16.mxu1 %v4114_v0  ;;  %3456 = vmatprep.subr.bf16.mxu0 %v4114_v0  ;;  %v3714_v12 = vld [vmem:[#allocation5 + $0x28] sm:$0xff]   ;;  %v3715_v13 = vld [vmem:[#allocation7 + $0x30] sm:$0xff]   ;;  %v3717_v15 = vld [vmem:[#allocation7 + $0x38] sm:$0xff]   ;;  %v833_v50 = vunpack.c.l.s4 %v4120_v49  ;;  %vm1808_vm1 = vcmask 261120   ;;  %vm1997_vm2 = vcmask 130048   ;;  %vm2539_vm3 = vcmask 523264  }
  0xe8   : > { %v3716_v14 = vld [vmem:[#allocation5 + $0x30] sm:$0xff]   ;;  %v656_v17 = vld [vmem:[%s4497_s13 + $0x8] sm:$0xff]  ;;  %v3276_v20 = vld [vmem:[%s4905_s2] ss:$0 sm:$0xff]  ;;  %v803_v47 = vunpack.c.0.s8 %v802_v45  ;;  %vm2542_vm4 = vcmask 785408   ;;  %s4966_s30 = sld [smem:[#allocation23_spill]] }
  0xe9   : > { %v655_v16 = vld [vmem:[%s4497_s13] sm:$0xff]  ;;  %v3718_v18 = vld [vmem:[#allocation5 + $0x38] sm:$0xff]   ;;  %v3720_v37 = vld [vmem:[#allocation8 + $0x8] sm:$0xff]   ;;  %v834_v60 = vunpack.c.0.s8 %v833_v50  ;;  %s4967_s8 = sld [smem:[#allocation26_spill]]  ;;  %s4969_s23 = sld [smem:[#allocation24_spill]] }
  0xea   : > { %3477 = vmatpush3.bf16.msra.mxu1 %v3705_v3  ;;  %3457 = vmatpush3.bf16.msra.mxu0 %v3706_v4  ;;  %v657_v19 = vpack.c.bf16 %v656_v17, %v655_v16  ;;  %v3289_v21 = vld [vmem:[%s4907_s4] ss:$0 sm:$0xff]  ;;  %v3721_v38 = vld [vmem:[#allocation8 + $0x10] sm:$0xff]   ;;  %v3722_v39 = vld [vmem:[#allocation8 + $0x18] sm:$0xff]   ;;  %v4577_v58 = vsub.s32 %v803_v47, %v4570_v48  ;;  %s653_s19 = scalar_lea.vmem [#allocation14], %s3268_s1  ;;  %s3112_s29 = scalar_lea.sflag [#allocation4], %s4491_s22 }
  0xeb   : > { %3478 = vmatprep.subr.bf16.mxu1 %v4114_v0  ;;  %3458 = vmatprep.subr.bf16.mxu0 %v4114_v0  ;;  %v3719_v36 = vld [vmem:[#allocation8] sm:$0xff]   ;;  %v3724_v41 = vld [vmem:[#allocation8 + $0x28] sm:$0xff]   ;;  %v3725_v42 = vld [vmem:[#allocation8 + $0x30] sm:$0xff]   ;;  %p4974_p9 = scmp.ne.s32.totalorder %s4954_s10, 0  ;;  %s4122_s1 = smov [#allocation14]  }
  0xec   : > { %v3723_v40 = vld [vmem:[#allocation8 + $0x20] sm:$0xff]   ;;  %v3726_v43 = vld [vmem:[#allocation8 + $0x38] sm:$0xff]  }
  0xee   : > { %3479 = vmatpush3.bf16.msra.mxu1 %v3707_v5  ;;  %3459 = vmatpush3.bf16.msra.mxu0 %v3708_v6  ;;  %v4583_v6 = vsub.s32 %v834_v60, %v4570_v48 }
  0xef   : > { %3480 = vmatprep.subr.bf16.mxu1 %v4114_v0  ;;  %3460 = vmatprep.subr.bf16.mxu0 %v4114_v0 }
  0xf2   : > { %3481 = vmatpush3.bf16.msra.mxu1 %v3709_v7  ;;  %3461 = vmatpush3.bf16.msra.mxu0 %v3710_v8 }
  0xf3   : > { %3482 = vmatprep.subr.bf16.mxu1 %v4114_v0  ;;  %3462 = vmatprep.subr.bf16.mxu0 %v4114_v0 }
  0xf6   : > { %3483 = vmatpush3.bf16.msra.mxu1 %v3711_v9  ;;  %3463 = vmatpush3.bf16.msra.mxu0 %v3712_v10 }
  0xf7   : > { %3484 = vmatprep.subr.bf16.mxu1 %v4114_v0  ;;  %3464 = vmatprep.subr.bf16.mxu0 %v4114_v0 }
  0xfa   : > { %3485 = vmatpush3.bf16.msra.mxu1 %v3713_v11  ;;  %3465 = vmatpush3.bf16.msra.mxu0 %v3714_v12 }
  0xfb   : > { %3486 = vmatprep.subr.bf16.mxu1 %v4114_v0  ;;  %3466 = vmatprep.subr.bf16.mxu0 %v4114_v0 }
  0xfe   : > { %3487 = vmatpush3.bf16.msra.mxu1 %v3715_v13  ;;  %3467 = vmatpush3.bf16.msra.mxu0 %v3716_v14 }
  0xff   : > { %3488 = vmatprep.subr.bf16.mxu1 %v4114_v0  ;;  %3468 = vmatprep.subr.bf16.mxu0 %v4114_v0 }
 0x102   : > { %3489 = vmatpush3.bf16.msra.mxu1 %v3717_v15  ;;  %3469 = vmatpush3.bf16.msra.mxu0 %v3718_v18 }
 0x103   : > { %3514 = vmatprep.subr.bf16.mxu1 %v4114_v0  ;;  %3494 = vmatprep.subr.bf16.mxu0 %v4114_v0 }
 0x105   : > { %3491 = vmatmul.mubr.bf16.vlgmr.msra.gmra.mrb[0].mxu1 %v657_v19  ;;  %3471 = vmatmul.mubr.bf16.vlgmr.msra.gmra.mrb[0].mxu0 %v657_v19 }
 0x106   : > { %3516 = vmatprep.mubr.msk.bf16.mxu1 %vm4115_vm0, %v4114_v0  ;;  %3510 = vmatprep.mubr.msk.bf16.mxu0 %vm4115_vm0, %v4114_v0 }
 0x107   : > { %3495 = vmatpush3.bf16.msra.mxu0 %v3719_v36 }
 0x108   : > { %3496 = vmatprep.subr.bf16.mxu0 %v4114_v0 }
 0x10b   : > { %3497 = vmatpush3.bf16.msra.mxu0 %v3720_v37 }
 0x10c   : > { %3498 = vmatprep.subr.bf16.mxu0 %v4114_v0 }
 0x10f   : > { %3499 = vmatpush3.bf16.msra.mxu0 %v3721_v38 }
 0x110   : > { %3500 = vmatprep.subr.bf16.mxu0 %v4114_v0 }
 0x113   : > { %3501 = vmatpush3.bf16.msra.mxu0 %v3722_v39 }
 0x114   : > { %3502 = vmatprep.subr.bf16.mxu0 %v4114_v0 }
 0x117   : > { %3503 = vmatpush3.bf16.msra.mxu0 %v3723_v40 }
 0x118   : > { %3504 = vmatprep.subr.bf16.mxu0 %v4114_v0 }
 0x11b   : > { %3505 = vmatpush3.bf16.msra.mxu0 %v3724_v41 }
 0x11c   : > { %3506 = vmatprep.subr.bf16.mxu0 %v4114_v0 }
 0x11f   : > { %3507 = vmatpush3.bf16.msra.mxu0 %v3725_v42 }
 0x120   : > { %3508 = vmatprep.subr.bf16.mxu0 %v4114_v0 }
 0x123   : > { %3509 = vmatpush3.bf16.msra.mxu0 %v3726_v43 }
 0x124   : > { %3562 = vmatprep.subr.bf16.mxu0 %v4114_v0 }
 0x126   : > { %3511 = vmatmul.mubr.bf16.vlgmr.msra.gmra.mrb[4].mxu0 %v657_v19 }
 0x127   : > { %3578 = vmatprep.mubr.msk.bf16.mxu0 %vm4115_vm0, %v4114_v0 }
 0x1d8   : > { %v1149_v22 = vpop.f32.mrb[0].mxu1  ;;  %v763_v24 = vpop.f32.mrb[0].mxu0 }
 0x1d9   : > { %v3492_v23 = vpop.f32.mrb[1].mxu1  ;;  %v764_v26 = vadd.f32 %v3276_v20, %v763_v24  ;;  %v3472_v27 = vpop.f32.mrb[1].mxu0  ;;  %v1150_v28 = vadd.f32 %v3289_v21, %v1149_v22 }
 0x1da   : > { %v1152_v25 = vpop.f32.mrb[2].mxu1  ;;  %v766_v31 = vpop.f32.mrb[2].mxu0 }
 0x1db   : > { %v1153_v29 = vadd.f32 %v3289_v21, %v1152_v25  ;;  %v3493_v30 = vpop.f32.mrb[3].mxu1  ;;  %v767_v32 = vadd.f32 %v3276_v20, %v766_v31  ;;  %v3473_v33 = vpop.f32.mrb[3].mxu0 }
 0x1dd   : > { %v1156_v34 = vpack.c.bf16 %v1153_v29, %v1150_v28  ;;  %v4549_v35 = vpack.c.bf16 %v767_v32, %v764_v26 }
 0x1df   : > { %1162 = vrot.lane.b32.xlu1 %v1156_v34, %s4116_s5  ;;  %1158 = vrot.lane.b32.xlu0 %v1156_v34, %s4117_s28  ;;  %v1168_v56 = vshrl.u32 %v1156_v34, 16  ;;  %v782_v11 = vshrl.u32 %v4549_v35, 16 }
 0x1e3   : > { %1160 = vrot.lane.b32.xlu0 %v1156_v34, %s4118_s15  ;;  %772 = vrot.lane.b32.xlu1 %v4549_v35, %s4117_s28 }
 0x1e7   : > { %774 = vrot.lane.b32.xlu0 %v4549_v35, %s4118_s15  ;;  %776 = vrot.lane.b32.xlu1 %v4549_v35, %s4116_s5 }
 0x251   : > { %v1163_v51 = vpop.permute.xlu1 %1162  ;;  %v1159_v54 = vpop.permute.xlu0 %1158 }
 0x252   : > { %v1166_v55 = vpack.i.b16 %v1159_v54, %v1156_v34  ;;  %v1169_v57 = vshrl.u32 %v1159_v54, 16  ;;  %v1177_v2 = vshrl.u32 %v1163_v51, 16 }
 0x254   : > { %v1170_v59 = vpack.i.b16 %v1169_v57, %v1168_v56  ;;  %v1180_v61 = vcombine.high %v1166_v55, %v4574_v53  ;;  %v1187_v5 = vrot.slane %v1166_v55, %v4577_v58 }
 0x255   : > { %v1161_v62 = vpop.permute.xlu0 %1160  ;;  %v773_v1 = vpop.permute.xlu1 %772 }
 0x256   : > { %v1174_v63 = vpack.i.b16 %v1163_v51, %v1161_v62  ;;  %v1246_v3 = vcombine.high %v1170_v59, %v4574_v53  ;;  %v1176_v4 = vshrl.u32 %v1161_v62, 16  ;;  %v1194_v9 = vrot.slane %v1180_v61, %v4577_v58 }
 0x257   : > { %v783_v12 = vshrl.u32 %v773_v1, 16  ;;  %v1253_v13 = vrot.slane %v1170_v59, %v4577_v58  ;;  %v780_v20 = vpack.i.b16 %v773_v1, %v4549_v35 }
 0x258   : > { %v1195_v7 = vcombine.high %v1174_v63, %v4574_v53  ;;  %v1202_v8 = vrot.slane %v1174_v63, %v4577_v58  ;;  %v1178_v10 = vpack.i.b16 %v1177_v2, %v1176_v4  ;;  %v1260_v17 = vrot.slane %v1246_v3, %v4577_v58 }
 0x259   : > { %v784_v28 = vpack.i.b16 %v783_v12, %v782_v11  ;;  %v775_v29 = vpop.permute.xlu0 %774  ;;  %v777_v38 = vpop.permute.xlu1 %776  ;;  %v800_v42 = vcombine.high %v780_v20, %v4574_v53  ;;  %v807_v43 = vrot.slane %v780_v20, %v4577_v58 }
 0x25a   : > { %v1209_v14 = vrot.slane %v1195_v7, %v4577_v58  ;;  %v1210_v15 = vcombine.low %v1187_v5, %v1202_v8  ;;  %v1211_v16 = vcombine.high %v1187_v5, %v1202_v8  ;;  %v1261_v18 = vcombine.high %v1178_v10, %v4574_v53 }
 0x25b   : > { %v1268_v19 = vrot.slane %v1178_v10, %v4577_v58  ;;  %v790_v41 = vshrl.u32 %v775_v29, 16  ;;  %v866_v44 = vcombine.high %v784_v28, %v4574_v53  ;;  %v788_v47 = vpack.i.b16 %v777_v38, %v775_v29 }
 0x25c   : > { %v1218_v21 = vrot.slane %v1210_v15, %v4583_v6  ;;  %v1225_v22 = vrot.slane %v1211_v16, %v4583_v6  ;;  %v1226_v23 = vcombine.low %v1194_v9, %v1209_v14  ;;  %v1227_v24 = vcombine.high %v1194_v9, %v1209_v14 }
 0x25d   : > { %v1275_v25 = vrot.slane %v1261_v18, %v4577_v58  ;;  %v1276_v26 = vcombine.low %v1253_v13, %v1268_v19  ;;  %v1277_v27 = vcombine.high %v1253_v13, %v1268_v19  ;;  %v791_v49 = vshrl.u32 %v777_v38, 16 }
 0x25e   : > { %v1234_v30 = vrot.slane %v1226_v23, %v4583_v6  ;;  %v1241_v31 = vrot.slane %v1227_v24, %v4583_v6  ;;  %v1312_v32 = vcombine.low %v1218_v21, %v1225_v22  ;;  %v3298_v33 = vcombine.high %v1218_v21, %v1225_v22 }
 0x25f   : > { %v1284_v34 = vrot.slane %v1276_v26, %v4583_v6  ;;  %v1291_v35 = vrot.slane %v1277_v27, %v4583_v6  ;;  %v1292_v36 = vcombine.low %v1260_v17, %v1275_v25  ;;  %v1293_v37 = vcombine.high %v1260_v17, %v1275_v25 }
 0x260   : > { %v1328_v39 = vcombine.low %v1234_v30, %v1241_v31  ;;  %v3299_v40 = vcombine.high %v1234_v30, %v1241_v31  ;;  %v1319_v45 = vrot.slane %v1312_v32, %v4577_v58  ;;  %v1327_v46 = vrot.slane %v3298_v33, %v4577_v58 }
 0x261   : > { %v1300_v50 = vrot.slane %v1292_v36, %v4583_v6  ;;  %v1307_v51 = vrot.slane %v1293_v37, %v4583_v6  ;;  %v1362_v54 = vcombine.low %v1284_v34, %v1291_v35  ;;  %v792_v56 = vpack.i.b16 %v791_v49, %v790_v41 }
 0x262   : > { %v1335_v55 = vrot.slane %v1328_v39, %v4577_v58  ;;  %v815_v57 = vcombine.high %v788_v47, %v4574_v53  ;;  %v822_v59 = vrot.slane %v788_v47, %v4577_v58  ;;  %v1343_v60 = vrot.slane %v3299_v40, %v4577_v58 }
 0x263   : > { %v3300_v61 = vcombine.high %v1284_v34, %v1291_v35  ;;  %v814_v62 = vrot.slane %v800_v42, %v4577_v58  ;;  %v873_v63 = vrot.slane %v784_v28, %v4577_v58  ;;  %v880_v1 = vrot.slane %v866_v44, %v4577_v58 }
 0x264   : > { %v829_v2 = vrot.slane %v815_v57, %v4577_v58  ;;  %v830_v3 = vcombine.low %v807_v43, %v822_v59  ;;  %v831_v4 = vcombine.high %v807_v43, %v822_v59  ;;  %v881_v5 = vcombine.high %v792_v56, %v4574_v53 }
 0x265   : > { %v1378_v7 = vcombine.low %v1300_v50, %v1307_v51  ;;  %v3301_v8 = vcombine.high %v1300_v50, %v1307_v51  ;;  %v888_v9 = vrot.slane %v792_v56, %v4577_v58  ;;  %v1344_v10 = vcombine.low %v1319_v45, %v1327_v46 }
 0x266   : > { %v846_v11 = vcombine.low %v814_v62, %v829_v2  ;;  %v847_v12 = vcombine.high %v814_v62, %v829_v2  ;;  %v1352_v13 = vcombine.low %v1335_v55, %v1343_v60  ;;  %v1369_v14 = vrot.slane %v1362_v54, %v4577_v58 }
 0x267   : > { %v895_v15 = vrot.slane %v881_v5, %v4577_v58  ;;  %v896_v16 = vcombine.low %v873_v63, %v888_v9  ;;  %v897_v17 = vcombine.high %v873_v63, %v888_v9  ;;  %v1377_v18 = vrot.slane %v3300_v61, %v4577_v58 }
 0x268   : > { %v838_v19 = vrot.slane %v830_v3, %v4583_v6  ;;  %v845_v20 = vrot.slane %v831_v4, %v4583_v6  ;;  %v854_v21 = vrot.slane %v846_v11, %v4583_v6  ;;  %v861_v22 = vrot.slane %v847_v12, %v4583_v6 }
 0x269   : > { %v904_v23 = vrot.slane %v896_v16, %v4583_v6  ;;  %v911_v24 = vrot.slane %v897_v17, %v4583_v6  ;;  %v912_v25 = vcombine.low %v880_v1, %v895_v15  ;;  %v913_v26 = vcombine.high %v880_v1, %v895_v15 }
 0x26a   : > { %v948_v27 = vcombine.low %v854_v21, %v861_v22  ;;  %v3286_v28 = vcombine.high %v854_v21, %v861_v22  ;;  %v1385_v29 = vrot.slane %v1378_v7, %v4577_v58  ;;  %v1393_v30 = vrot.slane %v3301_v8, %v4577_v58 }
 0x26b   : > { %v920_v31 = vrot.slane %v912_v25, %v4583_v6  ;;  %v927_v32 = vrot.slane %v913_v26, %v4583_v6  ;;  %v982_v33 = vcombine.low %v904_v23, %v911_v24  ;;  %v3287_v34 = vcombine.high %v904_v23, %v911_v24 }
 0x26c   : > { %v932_v35 = vcombine.low %v838_v19, %v845_v20  ;;  %v3285_v36 = vcombine.high %v838_v19, %v845_v20  ;;  %v1394_v37 = vcombine.low %v1369_v14, %v1377_v18  ;;  %v955_v38 = vrot.slane %v948_v27, %v4577_v58 }
 0x26d   : > { %v998_v39 = vcombine.low %v920_v31, %v927_v32  ;;  %v3288_v40 = vcombine.high %v920_v31, %v927_v32  ;;  %v1359_v41 = vrot.slane %v1352_v13, %v4583_v6  ;;  %v963_v42 = vrot.slane %v3286_v28, %v4577_v58  ;;  %v3302_v31 = vld [vmem:[%s4909_s6] ss:$0 sm:$0xff]  ;;  %v1529_v32 = vpop.f32.mrb[4].mxu0 }
 0x26e   : > { %v989_v43 = vrot.slane %v982_v33, %v4577_v58  ;;  %v997_v44 = vrot.slane %v3287_v34, %v4577_v58  ;;  %v1402_v45 = vcombine.low %v1385_v29, %v1393_v30  ;;  %v1351_v49 = vrot.slane %v1344_v10, %v4583_v6  ;;  %v3512_v34 = vpop.f32.mrb[5].mxu0 }
 0x26f   : > { %v1005_v46 = vrot.slane %v998_v39, %v4577_v58  ;;  %v1013_v47 = vrot.slane %v3288_v40, %v4577_v58  ;;  %v939_v50 = vrot.slane %v932_v35, %v4577_v58  ;;  %v947_v51 = vrot.slane %v3285_v36, %v4577_v58  ;;  %v1532_v35 = vpop.f32.mrb[6].mxu0 }
 0x270   : > { %v1401_v54 = vrot.slane %v1394_v37, %v4583_v6  ;;  %v1409_v55 = vrot.slane %v1402_v45, %v4583_v6  ;;  %v972_v57 = vcombine.low %v955_v38, %v963_v42  ;;  %v1014_v59 = vcombine.low %v989_v43, %v997_v44  ;;  %v3513_v37 = vpop.f32.mrb[7].mxu0 }
 0x271   : > { %v1022_v56 = vcombine.low %v1005_v46, %v1013_v47  ;;  %v1360_v60 = vcombine.low %v1351_v49, %v1359_v41  ;;  %v964_v62 = vcombine.low %v939_v50, %v947_v51  ;;  %v1361_v16 = vcombine.high %v1351_v49, %v1359_v41 }
 0x272   : > { %v1410_v61 = vcombine.low %v1401_v54, %v1409_v55  ;;  %v979_v3 = vrot.slane %v972_v57, %v4583_v6  ;;  %v1021_v4 = vrot.slane %v1014_v59, %v4583_v6  ;;  %v1411_v14 = vcombine.high %v1401_v54, %v1409_v55 }
 0x273   : > { %v1029_v1 = vrot.slane %v1022_v56, %v4583_v6  ;;  %v971_v7 = vrot.slane %v964_v62, %v4583_v6  ;;  %v1415_v9 = vshrl.u32 %v1360_v60, 16  ;;  %v1421_v23 = vshrl.u32 %v1361_v16, 16 }
 0x274   : > { %v1414_v63 = vpack.i.b16 %v1410_v61, %v1360_v60  ;;  %v1416_v5 = vshrl.u32 %v1410_v61, 16  ;;  %v1420_v18 = vpack.i.b16 %v1411_v14, %v1361_v16  ;;  %v1422_v21 = vshrl.u32 %v1411_v14, 16 }
 0x275   : > { %v1030_v8 = vcombine.low %v1021_v4, %v1029_v1  ;;  %v980_v10 = vcombine.low %v971_v7, %v979_v3  ;;  %v1031_v22 = vcombine.high %v1021_v4, %v1029_v1  ;;  %v981_v24 = vcombine.high %v971_v7, %v979_v3 }
 0x276   : > { %v1813_v2 = vsel %vm1808_vm1, %v1414_v63, 0  ;;  %v1417_v11 = vpack.i.b16 %v1416_v5, %v1415_v9  ;;  %v1907_v20 = vsel %vm1808_vm1, %v1420_v18, 0  ;;  %v1423_v25 = vpack.i.b16 %v1422_v21, %v1421_v23 }
 0x277   : > { %3515 = vmatpush3.bf16.xpose.msra.mxu1 %v1813_v2  ;;  %v1034_v12 = vpack.i.b16 %v1030_v8, %v980_v10  ;;  %v1036_v15 = vshrl.u32 %v1030_v8, 16  ;;  %v1035_v17 = vshrl.u32 %v980_v10, 16  ;;  %v1040_v26 = vpack.i.b16 %v1031_v22, %v981_v24 }
 0x278   : > { %3520 = vmatprep.subr.bf16.mxu1 %v4114_v0  ;;  %v1860_v13 = vsel %vm1808_vm1, %v1417_v11, 0  ;;  %v1954_v27 = vsel %vm1808_vm1, %v1423_v25, 0  ;;  %v1042_v28 = vshrl.u32 %v1031_v22, 16  ;;  %v1041_v29 = vshrl.u32 %v981_v24, 16 }
 0x279   : > { %v1037_v19 = vpack.i.b16 %v1036_v15, %v1035_v17  ;;  %v1530_v33 = vadd.f32 %v3302_v31, %v1529_v32  ;;  %v1533_v36 = vadd.f32 %v3302_v31, %v1532_v35 }
 0x27a   : > { %v1043_v30 = vpack.i.b16 %v1042_v28, %v1041_v29 }
 0x27b   : > { %v4671_v38 = vpack.c.bf16 %v1533_v36, %v1530_v33 }
 0x27e   : > { %3517 = vmatmul.mubr.msk.bf16.vlgmr.msra.gmra.mrb[4].mxu1 %vm1808_vm1, %v1034_v12 }
 0x27f   : > { %3521 = vmatpush3.bf16.xpose.msra.mxu1 %v1860_v13  ;;  %3522 = vmatprep.mubr.msk.bf16.mxu1 %vm4115_vm0, %v4114_v0 }
 0x280   : > { %3526 = vmatprep.subr.bf16.mxu1 %v4114_v0 }
 0x286   : > { %3523 = vmatmul.mubr.msk.bf16.vlgmr.msra.gmra.mrb[8].mxu1 %vm1808_vm1, %v1037_v19 }
 0x287   : > { %3527 = vmatpush3.bf16.xpose.msra.mxu1 %v1907_v20  ;;  %3528 = vmatprep.mubr.msk.bf16.mxu1 %vm4115_vm0, %v4114_v0 }
 0x288   : > { %3532 = vmatprep.subr.bf16.mxu1 %v4114_v0 }
 0x28e   : > { %3529 = vmatmul.mubr.msk.bf16.vlgmr.msra.gmra.mrb[12].mxu1 %vm1808_vm1, %v1040_v26 }
 0x28f   : > { %3533 = vmatpush3.bf16.xpose.msra.mxu1 %v1954_v27  ;;  %3534 = vmatprep.mubr.msk.bf16.mxu1 %vm4115_vm0, %v4114_v0 }
 0x290   : > { %3538 = vmatprep.subr.bf16.mxu1 %v4114_v0 }
 0x296   : > { %3535 = vmatmul.mubr.msk.bf16.vlgmr.msra.gmra.mrb[16].mxu1 %vm1808_vm1, %v1043_v30 }
 0x297   : > { %3540 = vmatprep.mubr.msk.bf16.mxu1 %vm4115_vm0, %v4114_v0 }
 0x351   : > { %v1849_v39 = vpop.f32.mrb[4].mxu1 }
 0x352   : > { %v3518_v40 = vpop.f32.mrb[5].mxu1  ;;  %v1998_v41 = vsel %vm1997_vm2, %v1849_v39, -inf }
 0x353   : > { %1999 = vmax.xlane.f32.xlu0 %v1998_v41  ;;  %v1852_v42 = vpop.f32.mrb[6].mxu1 }
 0x354   : > { %v3519_v43 = vpop.f32.mrb[7].mxu1  ;;  %v2001_v44 = vsel %vm1997_vm2, %v1852_v42, -inf }
 0x355   : > { %2002 = vmax.xlane.f32.xlu1 %v2001_v44 }
 0x359   : > { %v1896_v45 = vpop.f32.mrb[8].mxu1 }
 0x35a   : > { %v3524_v46 = vpop.f32.mrb[9].mxu1  ;;  %v2004_v47 = vsel %vm1997_vm2, %v1896_v45, -inf }
 0x35b   : > { %2005 = vmax.xlane.f32.xlu0 %v2004_v47  ;;  %v1899_v49 = vpop.f32.mrb[10].mxu1 }
 0x35c   : > { %v3525_v50 = vpop.f32.mrb[11].mxu1  ;;  %v2007_v51 = vsel %vm1997_vm2, %v1899_v49, -inf }
 0x35f   : > { %2008 = vmax.xlane.f32.xlu0 %v2007_v51  ;;  %v1548_v51 = vshrl.u32 %v4671_v38, 16 }
 0x361   : > { %v1943_v54 = vpop.f32.mrb[12].mxu1 }
 0x362   : > { %v3530_v55 = vpop.f32.mrb[13].mxu1  ;;  %v2010_v56 = vsel %vm1997_vm2, %v1943_v54, -inf }
 0x363   : > { %2011 = vmax.xlane.f32.xlu1 %v2010_v56  ;;  %v1946_v57 = vpop.f32.mrb[14].mxu1 }
 0x364   : > { %v3531_v59 = vpop.f32.mrb[15].mxu1  ;;  %v2013_v60 = vsel %vm1997_vm2, %v1946_v57, -inf }
 0x365   : > { %2014 = vmax.xlane.f32.xlu0 %v2013_v60 }
 0x369   : > { %v1990_v61 = vpop.f32.mrb[16].mxu1 }
 0x36a   : > { %v3536_v62 = vpop.f32.mrb[17].mxu1  ;;  %v2016_v63 = vsel %vm1997_vm2, %v1990_v61, -inf }
 0x36b   : > { %2017 = vmax.xlane.f32.xlu1 %v2016_v63  ;;  %v1993_v1 = vpop.f32.mrb[18].mxu1 }
 0x36c   : > { %v3537_v2 = vpop.f32.mrb[19].mxu1  ;;  %v2019_v3 = vsel %vm1997_vm2, %v1993_v1, -inf }
 0x36d   : > { %2020 = vmax.xlane.f32.xlu0 %v2019_v3 }
 0x37c   : > { %1538 = vrot.lane.b32.xlu1 %v4671_v38, %s4117_s28 }
 0x3e0   : > { %v2000_v4 = vpop.xlane.xlu0 %1999 }
 0x3e1   : > { %v2022_v5 = vsub.f32 %v1849_v39, %v2000_v4 }
 0x3e2   : > { %v2003_v7 = vpop.xlane.xlu1 %2002 }
 0x3e3   : > { %v2030_v8 = vmul.f32 1.442695, %v2022_v5  ;;  %v2023_v9 = vsub.f32 %v1852_v42, %v2003_v7 }
 0x3e5   : > { %3775 = vpow2.f32 %v2030_v8  ;;  %v2032_v10 = vmul.f32 1.442695, %v2023_v9 }
 0x3e7   : > { %3777 = vpow2.f32 %v2032_v10 }
 0x3e8   : > { %v2006_v15 = vpop.xlane.xlu0 %2005 }
 0x3e9   : > { %v2024_v17 = vsub.f32 %v1896_v45, %v2006_v15 }
 0x3eb   : > { %v2034_v21 = vmul.f32 1.442695, %v2024_v17 }
 0x3ec   : > { %v2009_v16 = vpop.xlane.xlu0 %2008 }
 0x3ed   : > { %v2025_v19 = vsub.f32 %v1899_v49, %v2009_v16  ;;  %3779 = vpow2.f32 %v2034_v21 }
 0x3ef   : > { %v4683_v11 = vpop.eup %3775  ;;  %v2036_v24 = vmul.f32 1.442695, %v2025_v19 }
 0x3f0   : > { %v2046_v12 = vsel %vm1997_vm2, %v4683_v11, 0.0  ;;  %v2012_v20 = vpop.xlane.xlu1 %2011 }
 0x3f1   : > { %v4687_v13 = vpop.eup %3777  ;;  %2047 = vadd.xlane.f32.xlu1 %v2046_v12  ;;  %v2026_v25 = vsub.f32 %v1943_v54, %v2012_v20  ;;  %3781 = vpow2.f32 %v2036_v24 }
 0x3f2   : > { %v2049_v14 = vsel %vm1997_vm2, %v4687_v13, 0.0  ;;  %v2015_v18 = vpop.xlane.xlu0 %2014 }
 0x3f3   : > { %2050 = vadd.xlane.f32.xlu0 %v2049_v14  ;;  %v2027_v22 = vsub.f32 %v1946_v57, %v2015_v18  ;;  %v2038_v29 = vmul.f32 1.442695, %v2026_v25 }
 0x3f5   : > { %v2040_v27 = vmul.f32 1.442695, %v2027_v22 }
 0x3f7   : > { %3783 = vpow2.f32 %v2040_v27  ;;  %v4695_v33 = vpop.eup %3779 }
 0x3f8   : > { %v2018_v26 = vpop.xlane.xlu1 %2017  ;;  %3785 = vpow2.f32 %v2038_v29  ;;  %v2052_v35 = vsel %vm1997_vm2, %v4695_v33, 0.0 }
 0x3f9   : > { %v2028_v30 = vsub.f32 %v1990_v61, %v2018_v26 }
 0x3fa   : > { %v2021_v23 = vpop.xlane.xlu0 %2020 }
 0x3fb   : > { %v2029_v28 = vsub.f32 %v1993_v1, %v2021_v23  ;;  %v2042_v32 = vmul.f32 1.442695, %v2028_v30  ;;  %v4697_v34 = vpop.eup %3781 }
 0x3fc   : > { %v2055_v37 = vsel %vm1997_vm2, %v4697_v34, 0.0  ;;  %v1539_v46 = vpop.permute.xlu1 %1538 }
 0x3fd   : > { %v2044_v31 = vmul.f32 1.442695, %v2029_v28  ;;  %v1549_v47 = vshrl.u32 %v1539_v46, 16  ;;  %v1546_v50 = vpack.i.b16 %v1539_v46, %v4671_v38 }
 0x3ff   : > { %3787 = vpow2.f32 %v2044_v31  ;;  %v1550_v55 = vpack.i.b16 %v1549_v47, %v1548_v51  ;;  %v1560_v57 = vcombine.high %v1546_v50, %v4574_v53  ;;  %v1567_v1 = vrot.slane %v1546_v50, %v4577_v58 }
 0x400   : > { %3789 = vpow2.f32 %v2042_v32 }
 0x401   : > { %v4701_v36 = vpop.eup %3783  ;;  %v1626_v63 = vcombine.high %v1550_v55, %v4574_v53  ;;  %v1633_v10 = vrot.slane %v1550_v55, %v4577_v58 }
 0x402   : > { %1542 = vrot.lane.b32.xlu1 %v4671_v38, %s4116_s5  ;;  %v4705_v39 = vpop.eup %3785  ;;  %v2061_v40 = vsel %vm1997_vm2, %v4701_v36, 0.0 }
 0x403   : > { %v2058_v42 = vsel %vm1997_vm2, %v4705_v39, 0.0  ;;  %v1640_v12 = vrot.slane %v1626_v63, %v4577_v58 }
 0x409   : > { %1540 = vrot.lane.b32.xlu0 %v4671_v38, %s4118_s15  ;;  %v4709_v41 = vpop.eup %3787  ;;  %v1574_v38 = vrot.slane %v1560_v57, %v4577_v58 }
 0x40a   : > { %v4713_v43 = vpop.eup %3789  ;;  %v2067_v44 = vsel %vm1997_vm2, %v4709_v41, 0.0 }
 0x40b   : > { %v2064_v45 = vsel %vm1997_vm2, %v4713_v43, 0.0 }
 0x426   : > { %2053 = vadd.xlane.f32.xlu1 %v2052_v35 }
 0x428   : > { %2056 = vadd.xlane.f32.xlu0 %v2055_v37 }
 0x42a   : > { %2062 = vadd.xlane.f32.xlu1 %v2061_v40 }
 0x42c   : > { %2059 = vadd.xlane.f32.xlu0 %v2058_v42 }
 0x42e   : > { %2068 = vadd.xlane.f32.xlu1 %v2067_v44 }
 0x430   : > { %2065 = vadd.xlane.f32.xlu0 %v2064_v45 }
 0x47e   : > { %v2048_v49 = vpop.xlane.xlu1 %2047 }
 0x47f   : > { %3791 = vrcp.f32 %v2048_v49 }
 0x480   : > { %v2051_v54 = vpop.xlane.xlu0 %2050 }
 0x481   : > { %3793 = vrcp.f32 %v2051_v54 }
 0x482   : > { %v1543_v56 = vpop.permute.xlu1 %1542 }
 0x483   : > { %v1557_v60 = vshrl.u32 %v1543_v56, 16 }
 0x484   : > { %v1541_v59 = vpop.permute.xlu0 %1540 }
 0x485   : > { %v1554_v61 = vpack.i.b16 %v1543_v56, %v1541_v59  ;;  %v1556_v62 = vshrl.u32 %v1541_v59, 16 }
 0x487   : > { %v1558_v2 = vpack.i.b16 %v1557_v60, %v1556_v62  ;;  %v1575_v3 = vcombine.high %v1554_v61, %v4574_v53  ;;  %v1582_v4 = vrot.slane %v1554_v61, %v4577_v58 }
 0x489   : > { %v1589_v5 = vrot.slane %v1575_v3, %v4577_v58  ;;  %v1590_v7 = vcombine.low %v1567_v1, %v1582_v4  ;;  %v1591_v8 = vcombine.high %v1567_v1, %v1582_v4  ;;  %v1641_v9 = vcombine.high %v1558_v2, %v4574_v53  ;;  %v3792_v55 = vpop.eup %3791 }
 0x48a   : > { %v1648_v14 = vrot.slane %v1558_v2, %v4577_v58 }
 0x48b   : > { %v1598_v15 = vrot.slane %v1590_v7, %v4583_v6  ;;  %v1605_v16 = vrot.slane %v1591_v8, %v4583_v6  ;;  %v1606_v17 = vcombine.low %v1574_v38, %v1589_v5  ;;  %v1607_v18 = vcombine.high %v1574_v38, %v1589_v5  ;;  %v3794_v61 = vpop.eup %3793 }
 0x48c   : > { %v1655_v19 = vrot.slane %v1641_v9, %v4577_v58  ;;  %v1656_v20 = vcombine.low %v1633_v10, %v1648_v14  ;;  %v1657_v21 = vcombine.high %v1633_v10, %v1648_v14  ;;  %v2079_v5 = vmul.f32 %v3794_v61, %v4687_v13 }
 0x48d   : > { %v1614_v22 = vrot.slane %v1606_v17, %v4583_v6  ;;  %v1621_v23 = vrot.slane %v1607_v18, %v4583_v6  ;;  %v1692_v24 = vcombine.low %v1598_v15, %v1605_v16  ;;  %v3311_v25 = vcombine.high %v1598_v15, %v1605_v16 }
 0x48e   : > { %v1664_v26 = vrot.slane %v1656_v20, %v4583_v6  ;;  %v1671_v27 = vrot.slane %v1657_v21, %v4583_v6  ;;  %v1672_v28 = vcombine.low %v1640_v12, %v1655_v19  ;;  %v1673_v29 = vcombine.high %v1640_v12, %v1655_v19 }
 0x48f   : > { %v1699_v30 = vrot.slane %v1692_v24, %v4577_v58  ;;  %v1707_v31 = vrot.slane %v3311_v25, %v4577_v58  ;;  %v1708_v32 = vcombine.low %v1614_v22, %v1621_v23  ;;  %v3312_v35 = vcombine.high %v1614_v22, %v1621_v23 }
 0x490   : > { %v1680_v37 = vrot.slane %v1672_v28, %v4583_v6  ;;  %v1687_v40 = vrot.slane %v1673_v29, %v4583_v6  ;;  %v1742_v42 = vcombine.low %v1664_v26, %v1671_v27  ;;  %v3313_v44 = vcombine.high %v1664_v26, %v1671_v27 }
 0x491   : > { %v1715_v45 = vrot.slane %v1708_v32, %v4577_v58  ;;  %v1723_v46 = vrot.slane %v3312_v35, %v4577_v58  ;;  %v1724_v56 = vcombine.low %v1699_v30, %v1707_v31  ;;  %v2078_v9 = vmul.f32 %v3792_v55, %v4683_v11 }
 0x492   : > { %v1749_v47 = vrot.slane %v1742_v42, %v4577_v58  ;;  %v1757_v49 = vrot.slane %v3313_v44, %v4577_v58  ;;  %v1758_v50 = vcombine.low %v1680_v37, %v1687_v40  ;;  %v3314_v51 = vcombine.high %v1680_v37, %v1687_v40  ;;  %v3728_v44 = vld [vmem:[#allocation10 + $0x8] sm:$0xff]  }
 0x493   : > { %v1732_v54 = vcombine.low %v1715_v45, %v1723_v46  ;;  %v1731_v1 = vrot.slane %v1724_v56, %v4583_v6  ;;  %v2086_v12 = vpack.c.bf16 %v2079_v5, %v2078_v9  ;;  %v3729_v45 = vld [vmem:[#allocation10 + $0x10] sm:$0xff]   ;;  %v3730_v46 = vld [vmem:[#allocation10 + $0x18] sm:$0xff]  }
 0x494   : > { %v1765_v57 = vrot.slane %v1758_v50, %v4577_v58  ;;  %v1773_v59 = vrot.slane %v3314_v51, %v4577_v58  ;;  %v1774_v60 = vcombine.low %v1749_v47, %v1757_v49 }
 0x495   : > { %v1739_v62 = vrot.slane %v1732_v54, %v4583_v6 }
 0x496   : > { %v1782_v63 = vcombine.low %v1765_v57, %v1773_v59  ;;  %v1781_v2 = vrot.slane %v1774_v60, %v4583_v6 }
 0x497   : > { %v1740_v4 = vcombine.low %v1731_v1, %v1739_v62  ;;  %v1741_v24 = vcombine.high %v1731_v1, %v1739_v62 }
 0x498   : > { %v1789_v3 = vrot.slane %v1782_v63, %v4583_v6 }
 0x499   : > { %v1796_v10 = vshrl.u32 %v1740_v4, 16  ;;  %v1804_v30 = vshrl.u32 %v1741_v24, 16 }
 0x49a   : > { %v1790_v38 = vcombine.low %v1781_v2, %v1789_v3  ;;  %v1791_v20 = vcombine.high %v1781_v2, %v1789_v3 }
 0x49c   : > { %v1794_v7 = vpack.i.b16 %v1790_v38, %v1740_v4  ;;  %v1797_v8 = vshrl.u32 %v1790_v38, 16  ;;  %v1802_v27 = vpack.i.b16 %v1791_v20, %v1741_v24 }
 0x49e   : > { %3539 = vmatpush3.bf16.msra.mxu1 %v1794_v7  ;;  %v1798_v14 = vpack.i.b16 %v1797_v8, %v1796_v10 }
 0x49f   : > { %3544 = vmatprep.subr.bf16.mxu1 %v4114_v0 }
 0x4a1   : > { %3541 = vmatmul.mubr.msk.bf16.vlgmr.msra.gmra.mrb[20].mxu1 %vm1997_vm2, %v2086_v12 }
 0x4a2   : > { %3545 = vmatpush3.bf16.msra.mxu1 %v1798_v14  ;;  %3546 = vmatprep.mubr.msk.bf16.mxu1 %vm4115_vm0, %v4114_v0 }
 0x4a3   : > { %3550 = vmatprep.subr.bf16.mxu1 %v4114_v0 }
 0x4b3   : > { %v2054_v15 = vpop.xlane.xlu1 %2053 }
 0x4b4   : > { %3795 = vrcp.f32 %v2054_v15 }
 0x4b5   : > { %v2057_v13 = vpop.xlane.xlu0 %2056 }
 0x4b6   : > { %3797 = vrcp.f32 %v2057_v13 }
 0x4b7   : > { %v2063_v16 = vpop.xlane.xlu1 %2062 }
 0x4b9   : > { %v2060_v11 = vpop.xlane.xlu0 %2059 }
 0x4ba   : > { %3799 = vrcp.f32 %v2060_v11 }
 0x4bb   : > { %3801 = vrcp.f32 %v2063_v16  ;;  %v2069_v23 = vpop.xlane.xlu1 %2068 }
 0x4bd   : > { %v2066_v18 = vpop.xlane.xlu0 %2065 }
 0x4be   : > { %v3796_v17 = vpop.eup %3795  ;;  %3803 = vrcp.f32 %v2066_v18 }
 0x4bf   : > { %v2080_v21 = vmul.f32 %v3796_v17, %v4695_v33  ;;  %3805 = vrcp.f32 %v2069_v23  ;;  %v1805_v33 = vshrl.u32 %v1791_v20, 16 }
 0x4c0   : > { %v3798_v19 = vpop.eup %3797 }
 0x4c1   : > { %v2081_v22 = vmul.f32 %v3798_v19, %v4697_v34  ;;  %v1806_v35 = vpack.i.b16 %v1805_v33, %v1804_v30 }
 0x4c3   : > { %v2087_v25 = vpack.c.bf16 %v2081_v22, %v2080_v21 }
 0x4c4   : > { %v3800_v26 = vpop.eup %3799 }
 0x4c5   : > { %3547 = vmatmul.mubr.msk.bf16.vlgmr.msra.gmra.mrb[24].mxu1 %vm1997_vm2, %v2087_v25  ;;  %v3802_v28 = vpop.eup %3801  ;;  %v2082_v29 = vmul.f32 %v3800_v26, %v4705_v39 }
 0x4c6   : > { %3551 = vmatpush3.bf16.msra.mxu1 %v1802_v27  ;;  %3552 = vmatprep.mubr.msk.bf16.mxu1 %vm4115_vm0, %v4114_v0  ;;  %v2083_v34 = vmul.f32 %v3802_v28, %v4701_v36  ;;  %v3727_v36 = vld [vmem:[#allocation10] sm:$0xff]  }
 0x4c7   : > { %3556 = vmatprep.subr.bf16.mxu1 %v4114_v0  ;;  %3563 = vmatpush3.bf16.msra.mxu0 %v3727_v36 }
 0x4c8   : > { %v2088_v31 = vpack.c.bf16 %v2083_v34, %v2082_v29  ;;  %v3804_v32 = vpop.eup %3803  ;;  %3564 = vmatprep.subr.bf16.mxu0 %v4114_v0 }
 0x4c9   : > { %v3806_v37 = vpop.eup %3805  ;;  %v2084_v40 = vmul.f32 %v3804_v32, %v4713_v43  ;;  %v3732_v43 = vld [vmem:[#allocation10 + $0x28] sm:$0xff]  }
 0x4ca   : > { %v2085_v39 = vmul.f32 %v3806_v37, %v4709_v41  ;;  %v3731_v41 = vld [vmem:[#allocation10 + $0x20] sm:$0xff]  }
 0x4cb   : > { %3565 = vmatpush3.bf16.msra.mxu0 %v3728_v44 }
 0x4cc   : > { %v2089_v42 = vpack.c.bf16 %v2085_v39, %v2084_v40  ;;  %3566 = vmatprep.subr.bf16.mxu0 %v4114_v0 }
 0x4cd   : > { %3553 = vmatmul.mubr.msk.bf16.vlgmr.msra.gmra.mrb[28].mxu1 %vm1997_vm2, %v2088_v31 }
 0x4ce   : > { %3557 = vmatpush3.bf16.msra.mxu1 %v1806_v35  ;;  %3558 = vmatprep.mubr.msk.bf16.mxu1 %vm4115_vm0, %v4114_v0 }
 0x4cf   : > { %3567 = vmatpush3.bf16.msra.mxu0 %v3729_v45 }
 0x4d0   : > { %3568 = vmatprep.subr.bf16.mxu0 %v4114_v0 }
 0x4d3   : > { %3569 = vmatpush3.bf16.msra.mxu0 %v3730_v46 }
 0x4d4   : > { %3570 = vmatprep.subr.bf16.mxu0 %v4114_v0 }
 0x4d5   : > { %3559 = vmatmul.mubr.msk.bf16.vlgmr.msra.gmra.mrb[32].mxu1 %vm1997_vm2, %v2089_v42 }
 0x4d6   : > { %2842 = vmatprep.mubr.bf16.mxu1 %v4121_v52  ;;  %v3733_v52 = vld [vmem:[#allocation10 + $0x30] sm:$0xff]  }
 0x4d7   : > { %3571 = vmatpush3.bf16.msra.mxu0 %v3731_v41 }
 0x4d8   : > { %3572 = vmatprep.subr.bf16.mxu0 %v4114_v0 }
 0x4db   : > { %3573 = vmatpush3.bf16.msra.mxu0 %v3732_v43 }
 0x4dc   : > { %3574 = vmatprep.subr.bf16.mxu0 %v4114_v0 }
 0x4df   : > { %3575 = vmatpush3.bf16.msra.mxu0 %v3733_v52 }
 0x4e0   : > { %3576 = vmatprep.subr.bf16.mxu0 %v4114_v0 }
 0x574   : > { %v2127_v47 = vpop.f32.mrb[20].mxu1 }
 0x575   : > { %v3542_v49 = vpop.f32.mrb[21].mxu1 }
 0x576   : > { %v2130_v50 = vpop.f32.mrb[22].mxu1 }
 0x577   : > { %v2266_v51 = vpack.c.bf16 %v2130_v50, %v2127_v47  ;;  %v3543_v54 = vpop.f32.mrb[23].mxu1 }
 0x579   : > { %v2274_v61 = vshrl.u32 %v2266_v51, 16 }
 0x598   : > { %v2171_v55 = vpop.f32.mrb[24].mxu1 }
 0x599   : > { %v3548_v56 = vpop.f32.mrb[25].mxu1 }
 0x59a   : > { %v2174_v57 = vpop.f32.mrb[26].mxu1 }
 0x59b   : > { %v2267_v59 = vpack.c.bf16 %v2174_v57, %v2171_v55  ;;  %v3549_v60 = vpop.f32.mrb[27].mxu1 }
 0x59d   : > { %v2272_v62 = vpack.i.b16 %v2267_v59, %v2266_v51  ;;  %v2275_v63 = vshrl.u32 %v2267_v59, 16 }
 0x59f   : > { %v2276_v1 = vpack.i.b16 %v2275_v63, %v2274_v61  ;;  %v2286_v12 = vcombine.high %v2272_v62, %v4574_v53  ;;  %v2293_v16 = vrot.slane %v2272_v62, %v4577_v58  ;;  %v3734_v62 = vld [vmem:[#allocation10 + $0x38] sm:$0xff]  }
 0x5a0   : > { %v2215_v2 = vpop.f32.mrb[28].mxu1  ;;  %3577 = vmatpush3.bf16.msra.mxu0 %v3734_v62 }
 0x5a1   : > { %v3554_v3 = vpop.f32.mrb[29].mxu1  ;;  %v2300_v19 = vrot.slane %v2286_v12, %v4577_v58  ;;  %v2352_v20 = vcombine.high %v2276_v1, %v4574_v53  ;;  %v2359_v25 = vrot.slane %v2276_v1, %v4577_v58 }
 0x5a2   : > { %v2218_v4 = vpop.f32.mrb[30].mxu1 }
 0x5a3   : > { %v2268_v38 = vpack.c.bf16 %v2218_v4, %v2215_v2  ;;  %v3555_v5 = vpop.f32.mrb[31].mxu1  ;;  %v2366_v34 = vrot.slane %v2352_v20, %v4577_v58 }
 0x5a5   : > { %v2282_v14 = vshrl.u32 %v2268_v38, 16 }
 0x5a8   : > { %v2259_v0 = vpop.f32.mrb[32].mxu1 }
 0x5a9   : > { %v3560_v7 = vpop.f32.mrb[33].mxu1 }
 0x5aa   : > { %v2262_v8 = vpop.f32.mrb[34].mxu1 }
 0x5ab   : > { %v2269_v9 = vpack.c.bf16 %v2262_v8, %v2259_v0  ;;  %v3561_v10 = vpop.f32.mrb[35].mxu1 }
 0x5ad   : > { %v2280_v15 = vpack.i.b16 %v2269_v9, %v2268_v38  ;;  %v2283_v13 = vshrl.u32 %v2269_v9, 16 }
 0x5af   : > { %v2284_v11 = vpack.i.b16 %v2283_v13, %v2282_v14  ;;  %v2301_v17 = vcombine.high %v2280_v15, %v4574_v53  ;;  %v2308_v18 = vrot.slane %v2280_v15, %v4577_v58 }
 0x5b1   : > { %v2315_v21 = vrot.slane %v2301_v17, %v4577_v58  ;;  %v2316_v22 = vcombine.low %v2293_v16, %v2308_v18  ;;  %v2317_v23 = vcombine.high %v2293_v16, %v2308_v18  ;;  %v2367_v24 = vcombine.high %v2284_v11, %v4574_v53 }
 0x5b2   : > { %v2374_v26 = vrot.slane %v2284_v11, %v4577_v58 }
 0x5b3   : > { %v2324_v27 = vrot.slane %v2316_v22, %v4583_v6  ;;  %v2331_v28 = vrot.slane %v2317_v23, %v4583_v6  ;;  %v2332_v29 = vcombine.low %v2300_v19, %v2315_v21  ;;  %v2333_v33 = vcombine.high %v2300_v19, %v2315_v21  ;;  %v3327_v23 = vld [vmem:[%s4966_s30] ss:$0 sm:$0xff]  ;;  %s4970_s30 = sld [smem:[#allocation25_spill]] }
 0x5b4   : > { %v2381_v30 = vrot.slane %v2367_v24, %v4577_v58  ;;  %v2382_v31 = vcombine.low %v2359_v25, %v2374_v26  ;;  %v2383_v32 = vcombine.high %v2359_v25, %v2374_v26 }
 0x5b5   : > { %v2340_v35 = vrot.slane %v2332_v29, %v4583_v6  ;;  %v2347_v53 = vrot.slane %v2333_v33, %v4583_v6  ;;  %v2418_v37 = vcombine.low %v2324_v27, %v2331_v28  ;;  %v3323_v40 = vcombine.high %v2324_v27, %v2331_v28  ;;  %v3823_v33 = vld [vmem:[%s4497_s13] sm:$0xff] }
 0x5b6   : > { %v2390_v39 = vrot.slane %v2382_v31, %v4583_v6  ;;  %v2397_v42 = vrot.slane %v2383_v32, %v4583_v6  ;;  %v2398_v36 = vcombine.low %v2366_v34, %v2381_v30  ;;  %v2399_v44 = vcombine.high %v2366_v34, %v2381_v30  ;;  %v3824_v30 = vld [vmem:[%s4497_s13 + $0x8] sm:$0xff] }
 0x5b7   : > { %v2434_v45 = vcombine.low %v2340_v35, %v2347_v53  ;;  %v3324_v46 = vcombine.high %v2340_v35, %v2347_v53  ;;  %v2425_v41 = vrot.slane %v2418_v37, %v4577_v58  ;;  %v2433_v43 = vrot.slane %v3323_v40, %v4577_v58  ;;  %v3735_v32 = vld [vmem:[#allocation11] ss:$8 sps:$4 sm:$0xff]   ;;  %v3737_v35 = vld [vmem:[#allocation11 + $0x4] ss:$8 sps:$4 sm:$0xff]   ;;  %v3740_v53 = vld [vmem:[#allocation11 + $0x14] ss:$8 sps:$4 sm:$0xff]  }
 0x5b8   : > { %v2406_v52 = vrot.slane %v2398_v36, %v4583_v6  ;;  %v2413_v47 = vrot.slane %v2399_v44, %v4583_v6  ;;  %v2468_v49 = vcombine.low %v2390_v39, %v2397_v42  ;;  %v3325_v50 = vcombine.high %v2390_v39, %v2397_v42  ;;  %2810 = vmatprep.subr.bf16.mxu1 %v3737_v35  ;;  %v3738_v37 = vld [vmem:[#allocation11 + $0x10] ss:$8 sps:$4 sm:$0xff]  }
 0x5b9   : > { %v2441_v51 = vrot.slane %v2434_v45, %v4577_v58  ;;  %v2449_v54 = vrot.slane %v3324_v46, %v4577_v58  ;;  %v2450_v55 = vcombine.low %v2425_v41, %v2433_v43  ;;  %2811 = vmatpush1.bf16.msra.mxu1 %v3735_v32  ;;  %v3743_v43 = vld [vmem:[#allocation11 + $0x24] ss:$8 sps:$4 sm:$0xff]  }
 0x5ba   : > { %v2475_v56 = vrot.slane %v2468_v49, %v4577_v58  ;;  %v2483_v57 = vrot.slane %v3325_v50, %v4577_v58  ;;  %v2484_v59 = vcombine.low %v2406_v52, %v2413_v47  ;;  %v3326_v60 = vcombine.high %v2406_v52, %v2413_v47  ;;  %2812 = vmatprep.subr.bf16.mxu1 %v3740_v53  ;;  %v3741_v52 = vld [vmem:[#allocation11 + $0x20] ss:$8 sps:$4 sm:$0xff]   ;;  %v3746_v47 = vld [vmem:[#allocation11 + $0x34] ss:$8 sps:$4 sm:$0xff]   ;;  %v3744_v49 = vld [vmem:[#allocation11 + $0x30] ss:$8 sps:$4 sm:$0xff]  }
 0x5bb   : > { %v2458_v61 = vcombine.low %v2441_v51, %v2449_v54  ;;  %v2457_v3 = vrot.slane %v2450_v55, %v4583_v6  ;;  %v3749_v50 = vld [vmem:[#allocation11 + $0x44] ss:$8 sps:$4 sm:$0xff]   ;;  %v3747_v51 = vld [vmem:[#allocation11 + $0x40] ss:$8 sps:$4 sm:$0xff]   ;;  %v3752_v54 = vld [vmem:[#allocation11 + $0x54] ss:$8 sps:$4 sm:$0xff]  }
 0x5bc   : > { %v2491_v63 = vrot.slane %v2484_v59, %v4577_v58  ;;  %v2499_v1 = vrot.slane %v3326_v60, %v4577_v58  ;;  %v2500_v2 = vcombine.low %v2475_v56, %v2483_v57  ;;  %v3750_v55 = vld [vmem:[#allocation11 + $0x50] ss:$8 sps:$4 sm:$0xff]   ;;  %v3753_v56 = vld [vmem:[#allocation11 + $0x60] ss:$8 sps:$4 sm:$0xff]   ;;  %v3755_v57 = vld [vmem:[#allocation11 + $0x64] ss:$8 sps:$4 sm:$0xff]  }
 0x5bd   : > { %v2465_v4 = vrot.slane %v2458_v61, %v4583_v6  ;;  %2813 = vmatpush1.bf16.msra.mxu1 %v3738_v37  ;;  %v3758_v59 = vld [vmem:[#allocation11 + $0x74] ss:$8 sps:$4 sm:$0xff]   ;;  %v3756_v60 = vld [vmem:[#allocation11 + $0x70] ss:$8 sps:$4 sm:$0xff]  }
 0x5be   : > { %v2508_v38 = vcombine.low %v2491_v63, %v2499_v1  ;;  %v2507_v7 = vrot.slane %v2500_v2, %v4583_v6  ;;  %2814 = vmatprep.subr.bf16.mxu1 %v3743_v43 }
 0x5bf   : > { %v2467_v5 = vcombine.high %v2457_v3, %v2465_v4  ;;  %v2466_v0 = vcombine.low %v2457_v3, %v2465_v4 }
 0x5c0   : > { %v2515_v8 = vrot.slane %v2508_v38, %v4583_v6 }
 0x5c1   : > { %v2521_v12 = vshrl.u32 %v2466_v0, 16  ;;  %v2527_v14 = vshrl.u32 %v2467_v5, 16  ;;  %2815 = vmatpush1.bf16.msra.mxu1 %v3741_v52 }
 0x5c2   : > { %v2517_v9 = vcombine.high %v2507_v7, %v2515_v8  ;;  %v2516_v10 = vcombine.low %v2507_v7, %v2515_v8  ;;  %2816 = vmatprep.subr.bf16.mxu1 %v3746_v47 }
 0x5c4   : > { %v2526_v15 = vpack.i.b16 %v2517_v9, %v2467_v5  ;;  %v2522_v13 = vshrl.u32 %v2516_v10, 16  ;;  %v2528_v58 = vshrl.u32 %v2517_v9, 16  ;;  %v2520_v16 = vpack.i.b16 %v2516_v10, %v2466_v0  ;;  %v3336_v5 = vld [vmem:[%s4967_s8] ss:$0 sm:$0xff]  ;;  %s4971_s8 = sld [smem:[#allocation28_spill]] }
 0x5c5   : > { %2817 = vmatpush1.bf16.msra.mxu1 %v3744_v49 }
 0x5c6   : > { %2532 = vrot.lane.b32.xlu1 %v2526_v15, %s4118_s15  ;;  %v2523_v11 = vpack.i.b16 %v2522_v13, %v2521_v12  ;;  %v2529_v17 = vpack.i.b16 %v2528_v58, %v2527_v14  ;;  %2818 = vmatprep.subr.bf16.mxu1 %v3749_v50  ;;  %v3759_v13 = vld [vmem:[#allocation13 + $0x40] sm:$0xff]   ;;  %s3379_s15 = sshll.u32 %s4236_s0, 8 }
 0x5c7   : > { %v3760_v58 = vld [vmem:[#allocation13] sm:$0xff]   ;;  %3432 = vmatprep.subr.bf16.mxu0 %v3759_v13 }
 0x5c8   : > { %2530 = vrot.lane.b32.xlu0 %v2523_v11, %s4116_s5  ;;  %v3762_v11 = vld [vmem:[#allocation13 + $0x8] sm:$0xff]  }
 0x5c9   : > { %2819 = vmatpush1.bf16.msra.mxu1 %v3747_v51 }
 0x5ca   : > { %2534 = vrot.lane.b32.xlu1 %v2529_v17, %s4117_s28  ;;  %2820 = vmatprep.subr.bf16.mxu1 %v3752_v54  ;;  %s4968_s28 = sld [smem:[#allocation27_spill]]  ;;  %v3763_v17 = vld [vmem:[#allocation13 + $0x50] sm:$0xff]  }
 0x5cd   : > { %2821 = vmatpush1.bf16.msra.mxu1 %v3750_v55 }
 0x5ce   : > { %2822 = vmatprep.subr.bf16.mxu1 %v3755_v57 }
 0x5d0   : > { %v3337_v9 = vld [vmem:[%s4968_s28] ss:$0 sm:$0xff]  ;;  %s4972_s28 = sld [smem:[#allocation29_spill]] }
 0x5d1   : > { %2823 = vmatpush1.bf16.msra.mxu1 %v3753_v56 }
 0x5d2   : > { %2824 = vmatprep.subr.bf16.mxu1 %v3758_v59 }
 0x5d5   : > { %2825 = vmatpush1.bf16.msra.mxu1 %v3756_v60 }
 0x638   : > { %v2533_v18 = vpop.permute.xlu1 %2532 }
 0x63a   : > { %v2531_v6 = vpop.permute.xlu0 %2530 }
 0x63b   : > { %v2538_v19 = vsel %vm1808_vm1, %v2520_v16, %v2531_v6  ;;  %v3761_v16 = vld [vmem:[#allocation13 + $0x48] sm:$0xff]   ;;  %v3765_v6 = vld [vmem:[#allocation13 + $0x58] sm:$0xff]  }
 0x63c   : > { %v2535_v20 = vpop.permute.xlu1 %2534  ;;  %v2541_v21 = vsel %vm2539_vm3, %v2538_v19, %v2533_v18  ;;  %v3764_v18 = vld [vmem:[#allocation13 + $0x10] sm:$0xff]   ;;  %v3766_v19 = vld [vmem:[#allocation13 + $0x18] sm:$0xff]  }
 0x63d   : > { %v2544_v22 = vsel %vm2542_vm4, %v2541_v21, %v2535_v20  ;;  %v3767_v20 = vld [vmem:[#allocation13 + $0x60] sm:$0xff]  }
 0x63e   : > { %3579 = vmatmul.mubr.bf16.vlgmr.msra.gmra.mrb[8].mxu0 %v2544_v22  ;;  %v3768_v21 = vld [vmem:[#allocation13 + $0x20] sm:$0xff]   ;;  %v3769_v22 = vld [vmem:[#allocation13 + $0x68] sm:$0xff]  }
 0x63f   : > { %3433 = vmatpush3.bf16.msra.mxu0 %v3760_v58 }
 0x640   : > { %3434 = vmatprep.subr.bf16.mxu0 %v3761_v16 }
 0x643   : > { %3435 = vmatpush3.bf16.msra.mxu0 %v3762_v11 }
 0x644   : > { %3436 = vmatprep.subr.bf16.mxu0 %v3763_v17 }
 0x647   : > { %3437 = vmatpush3.bf16.msra.mxu0 %v3764_v18 }
 0x648   : > { %3438 = vmatprep.subr.bf16.mxu0 %v3765_v6  ;;  %v3354_v6 = vld [vmem:[%s4970_s30] ss:$0 sm:$0xff]  ;;  %s4973_s30 = sld [smem:[#allocation30_spill]] }
 0x64b   : > { %3439 = vmatpush3.bf16.msra.mxu0 %v3766_v19 }
 0x64c   : > { %3440 = vmatprep.subr.bf16.mxu0 %v3767_v20 }
 0x64e   : > { %s4857_s13 = scalar_lea.hbm %s4973_s30, %s3379_s15 }
 0x64f   : > { %3441 = vmatpush3.bf16.msra.mxu0 %v3768_v21 }
 0x650   : > { %3442 = vmatprep.subr.bf16.mxu0 %v3769_v22 }
 0x711   : > { %v2651_v24 = vpop.f32.mrb[8].mxu0 }
 0x712   : > { %v2652_v25 = vadd.f32 %v3327_v23, %v2651_v24  ;;  %v3580_v26 = vpop.f32.mrb[9].mxu0  ;;  %v3771_v24 = vld [vmem:[#allocation13 + $0x70] sm:$0xff]  }
 0x713   : > { %v2654_v27 = vpop.f32.mrb[10].mxu0  ;;  %v3773_v26 = vld [vmem:[#allocation13 + $0x78] sm:$0xff]  }
 0x714   : > { %v2655_v28 = vadd.f32 %v3327_v23, %v2654_v27  ;;  %v3581_v29 = vpop.f32.mrb[11].mxu0  ;;  %v2658_v34 = vadd.f32 %v3823_v33, %v2652_v25  ;;  %v3770_v23 = vld [vmem:[#allocation13 + $0x28] sm:$0xff]   ;;  %v3772_v25 = vld [vmem:[#allocation13 + $0x30] sm:$0xff]   ;;  %v3774_v27 = vld [vmem:[#allocation13 + $0x38] sm:$0xff]   ;;  %v2726_v33 = vsub.s32 1, %v4570_v48 }
 0x715   : > { %3443 = vmatpush3.bf16.msra.mxu0 %v3770_v23  ;;  %v2718_v29 = vld [vmem:[%s4969_s23] sm:$0x3]  ;;  %s3125_s23 = sshll.u32 %s653_s19, 4  ;;  %s4859_s23 = int_to_ptr.vmem [resolvable:$true] %s3125_s23 }
 0x716   : > { %2660 = vadd.xlane.f32.xlu0 %v2658_v34  ;;  %v2659_v31 = vadd.f32 %v3824_v30, %v2655_v28  ;;  %3444 = vmatprep.subr.bf16.mxu0 %v3771_v24  ;;  %v2722_v28 = vsub.s32 0, %v4570_v48  ;;  %v2727_v30 = vrot.slane %v2718_v29, %v2726_v33  ;;  %s4023_s0 = scalar_lea.vmem %s4859_s23, 256 }
 0x717   : > { %p4024_p6 = scmp.ne.s32.totalorder %s4859_s23, %s4023_s0 }
 0x718   : > { %2662 = vadd.xlane.f32.xlu1 %v2659_v31 }
 0x719   : > { %3445 = vmatpush3.bf16.msra.mxu0 %v3772_v25  ;;  %p4025_p12 = pnand %p4024_p6, %p4974_p9 }
 0x71a   : > { %3446 = vmatprep.subr.bf16.mxu0 %v3773_v26 }
 0x71b   : > { %p4026_p1 = pneg %p4025_p12 }
 0x71d   : > { %3447 = vmatpush3.bf16.msra.mxu0 %v3774_v27 }
 0x7a3   : > { %v2661_v40 = vpop.xlane.xlu0 %2660 }
 0x7a4   : > { %v2665_v39 = vmul.f32 0.0078125, %v2661_v40 }
 0x7a5   : > { %v2663_v42 = vpop.xlane.xlu1 %2662 }
 0x7a6   : > { %v2667_v36 = vsub.f32 %v2658_v34, %v2665_v39  ;;  %v2666_v44 = vmul.f32 0.0078125, %v2663_v42  ;;  %v2723_v34 = vrot.slane %v2718_v29, %v2722_v28 }
 0x7a8   : > { %v2668_v45 = vsub.f32 %v2659_v31, %v2666_v44  ;;  %v2669_v46 = vmul.f32 %v2667_v36, %v2667_v36 }
 0x7aa   : > { %2671 = vadd.xlane.f32.xlu0 %v2669_v46  ;;  %v2670_v41 = vmul.f32 %v2668_v45, %v2668_v45 }
 0x7ae   : > { %2673 = vadd.xlane.f32.xlu0 %v2670_v41 }
 0x837   : > { %v2672_v61 = vpop.xlane.xlu0 %2671 }
 0x838   : > { %v2675_v62 = vmul.f32 0.0078125, %v2672_v61 }
 0x83a   : > { %v2677_v63 = vadd.f32 1e-05, %v2675_v62 }
 0x83b   : > { %v2674_v1 = vpop.xlane.xlu0 %2673 }
 0x83c   : > { %3807 = vrsqrt.f32 %v2677_v63  ;;  %v2676_v2 = vmul.f32 0.0078125, %v2674_v1 }
 0x83e   : > { %v2678_v3 = vadd.f32 1e-05, %v2676_v2 }
 0x840   : > { %3809 = vrsqrt.f32 %v2678_v3 }
 0x846   : > { %v3808_v4 = vpop.eup %3807 }
 0x847   : > { %v2681_v38 = vmul.f32 %v3808_v4, %v2667_v36 }
 0x849   : > { %v2690_v8 = vmul.f32 %v3336_v5, %v2681_v38 }
 0x84a   : > { %v3810_v0 = vpop.eup %3809 }
 0x84b   : > { %v2682_v7 = vmul.f32 %v3810_v0, %v2668_v45  ;;  %v4829_v12 = vadd.f32 %v3337_v9, %v2690_v8 }
 0x84d   : > { %v2691_v10 = vmul.f32 %v3336_v5, %v2682_v7 }
 0x84f   : > { %v4831_v14 = vadd.f32 %v3337_v9, %v2691_v10 }
 0x851   : > { %v2701_v15 = vpack.c.bf16 %v4831_v14, %v4829_v12 }
 0x853   : > { %2843 = vmatmul.mubr.bf16.vlgmr.msra.gmra.mrb[36].mxu1 %v2701_v15 }
 0x926   : > { %v2844_v31 = vpop.f32.mrb[36].mxu1 }
 0x927   : > { %v2845_v32 = vadd.f32 %v2844_v31, %v2723_v34  ;;  %v2846_v35 = vpop.f32.mrb[37].mxu1 }
 0x928   : > { %v2847_v53 = vadd.f32 %v2846_v35, %v2727_v30  ;;  %v2848_v37 = vpop.f32.mrb[38].mxu1 }
 0x929   : > { %v2853_v40 = vmul.f32 %v2845_v32, %v2845_v32  ;;  %v2849_v39 = vadd.f32 %v2848_v37, %v2723_v34  ;;  %v2850_v42 = vpop.f32.mrb[39].mxu1 }
 0x92a   : > { %v2854_v36 = vmul.f32 %v2847_v53, %v2847_v53  ;;  %v2851_v44 = vadd.f32 %v2850_v42, %v2727_v30 }
 0x92b   : > { %v2857_v45 = vmul.f32 %v2853_v40, %v2845_v32  ;;  %v2855_v46 = vmul.f32 %v2849_v39, %v2849_v39 }
 0x92c   : > { %v2858_v41 = vmul.f32 %v2854_v36, %v2847_v53  ;;  %v2856_v43 = vmul.f32 %v2851_v44, %v2851_v44  ;;  %v3371_v36 = vld [vmem:[%s4971_s8] ss:$0 sm:$0xff]  ;;  %s4027_s8 = sshll.u32 %s4122_s1, 4  ;;  %s4028_s8 = int_to_ptr.vmem [resolvable:$false] %s4027_s8 }
 0x92d   : > { %v2861_v52 = vmul.f32 0.044715, %v2857_v45  ;;  %v2859_v47 = vmul.f32 %v2855_v46, %v2849_v39  ;;  %v3372_v46 = vld [vmem:[%s4972_s28] ss:$0 sm:$0xff]  ;;  %s4029_s16 = scalar_lea.vmem %s4028_s8, 512  ;;  %p4030_p13 = scmp.lt.s32.totalorder %s4859_s23, %s4028_s8 }
 0x92e   : > { %v2862_v49 = vmul.f32 0.044715, %v2858_v41  ;;  %v2860_v48 = vmul.f32 %v2856_v43, %v2851_v44  ;;  %p4031_p0 = scmp.lt.s32.totalorder %s4029_s16, %s4023_s0 }
 0x92f   : > { %v2865_v50 = vadd.f32 %v2861_v52, %v2845_v32  ;;  %v2863_v51 = vmul.f32 0.044715, %v2859_v47 }
 0x930   : > { %v2866_v54 = vadd.f32 %v2862_v49, %v2847_v53  ;;  %v2864_v55 = vmul.f32 0.044715, %v2860_v48  ;;  %p4032_p2 = por %p4031_p0, %p4030_p13 }
 0x931   : > { %v2869_v56 = vmul.f32 0.7978846, %v2865_v50  ;;  %v2867_v57 = vadd.f32 %v2863_v51, %v2849_v39 }
 0x932   : > { %v2870_v59 = vmul.f32 0.7978846, %v2866_v54  ;;  %v2868_v60 = vadd.f32 %v2864_v55, %v2851_v44  ;;  %p4033_p8 = pnand %p4032_p2, %p4026_p1 }
 0x933   : > { %3811 = vtanh.f32 %v2869_v56  ;;  %v2871_v61 = vmul.f32 0.7978846, %v2867_v57 }
 0x934   : > { %3813 = vtanh.f32 %v2870_v59  ;;  %v2872_v62 = vmul.f32 0.7978846, %v2868_v60 }
 0x935   : > { %3815 = vtanh.f32 %v2871_v61 }
 0x936   : > { %3817 = vtanh.f32 %v2872_v62 }
 0x93d   : > { %v3812_v63 = vpop.eup %3811 }
 0x93e   : > { %v3814_v1 = vpop.eup %3813  ;;  %v2877_v2 = vadd.f32 1.0, %v3812_v63 }
 0x93f   : > { %v3816_v3 = vpop.eup %3815  ;;  %v2878_v4 = vadd.f32 1.0, %v3814_v1 }
 0x940   : > { %v3818_v38 = vpop.eup %3817  ;;  %v2881_v5 = vmul.f32 0.5, %v2877_v2  ;;  %v2879_v0 = vadd.f32 1.0, %v3816_v3 }
 0x941   : > { %v2880_v7 = vadd.f32 1.0, %v3818_v38  ;;  %v2882_v8 = vmul.f32 0.5, %v2878_v4 }
 0x942   : > { %v2883_v9 = vmul.f32 0.5, %v2879_v0  ;;  %v2885_v15 = vmul.f32 %v2881_v5, %v2845_v32 }
 0x943   : > { %v2884_v10 = vmul.f32 0.5, %v2880_v7  ;;  %v2886_v58 = vmul.f32 %v2882_v8, %v2847_v53 }
 0x944   : > { %v2887_v13 = vmul.f32 %v2883_v9, %v2849_v39 }
 0x945   : > { %v2888_v16 = vmul.f32 %v2884_v10, %v2851_v44 }
 0x946   : > { %v2889_v11 = vpack.c.bf16 %v2887_v13, %v2885_v15 }
 0x947   : > { %v2890_v17 = vpack.c.bf16 %v2888_v16, %v2886_v58 }
 0x949   : > { %3058 = vmatprep.mubr.bf16.mxu0 %v2890_v17 }
 0x94a   : > { %3059 = vmatmul.mubr.bf16.vlgmr.msra.gmra.mrb[12].mxu0 %v2889_v11 }
 0xa1d   : > { %v3448_v18 = vpop.f32.mrb[12].mxu0 }
 0xa1e   : > { %v3449_v19 = vpop.f32.mrb[13].mxu0 }
 0xa1f   : > { %v3450_v20 = vadd.f32 %v3449_v19, %v3448_v18  ;;  %v3451_v21 = vpop.f32.mrb[14].mxu0 }
 0xa20   : > { %v3452_v22 = vpop.f32.mrb[15].mxu0 }
 0xa21   : > { %v3061_v23 = vadd.f32 %v3450_v20, %v3354_v6  ;;  %v3453_v24 = vadd.f32 %v3452_v22, %v3451_v21 }
 0xa23   : > { %v3064_v25 = vadd.f32 %v3453_v24, %v3354_v6  ;;  %v3067_v26 = vadd.f32 %v3061_v23, %v4829_v12 }
 0xa25   : > { %3069 = vadd.xlane.f32.xlu1 %v3067_v26  ;;  %v3068_v27 = vadd.f32 %v3064_v25, %v4831_v14 }
 0xa27   : > { %3071 = vadd.xlane.f32.xlu0 %v3068_v27 }
 0xab2   : > { %v3070_v28 = vpop.xlane.xlu1 %3069 }
 0xab3   : > { %v3073_v29 = vmul.f32 0.0078125, %v3070_v28 }
 0xab4   : > { %v3072_v33 = vpop.xlane.xlu0 %3071 }
 0xab5   : > { %v3075_v34 = vsub.f32 %v3067_v26, %v3073_v29  ;;  %v3074_v30 = vmul.f32 0.0078125, %v3072_v33 }
 0xab7   : > { %v3076_v31 = vsub.f32 %v3068_v27, %v3074_v30  ;;  %v3077_v32 = vmul.f32 %v3075_v34, %v3075_v34 }
 0xab9   : > { %3079 = vadd.xlane.f32.xlu1 %v3077_v32  ;;  %v3078_v35 = vmul.f32 %v3076_v31, %v3076_v31 }
 0xabb   : > { %3081 = vadd.xlane.f32.xlu0 %v3078_v35 }
 0xb46   : > { %v3080_v53 = vpop.xlane.xlu1 %3079 }
 0xb47   : > { %v3083_v37 = vmul.f32 0.0078125, %v3080_v53 }
 0xb48   : > { %v3082_v40 = vpop.xlane.xlu0 %3081 }
 0xb49   : > { %v3085_v12 = vadd.f32 1e-05, %v3083_v37  ;;  %v3084_v39 = vmul.f32 0.0078125, %v3082_v40 }
 0xb4b   : > { %3819 = vrsqrt.f32 %v3085_v12  ;;  %v3086_v14 = vadd.f32 1e-05, %v3084_v39 }
 0xb4d   : > { %3821 = vrsqrt.f32 %v3086_v14 }
 0xb55   : > { %v3820_v42 = vpop.eup %3819 }
 0xb56   : > { %v3089_v44 = vmul.f32 %v3820_v42, %v3075_v34 }
 0xb57   : > { %v3822_v45 = vpop.eup %3821 }
 0xb58   : > { %v3098_v41 = vmul.f32 %v3371_v36, %v3089_v44  ;;  %v3090_v43 = vmul.f32 %v3822_v45, %v3076_v31 }
 0xb5a   : > { %v3107_v52 = vadd.f32 %v3372_v46, %v3098_v41  ;;  %v3099_v47 = vmul.f32 %v3371_v36, %v3090_v43 }
 0xb5c   : > { %v3108_v49 = vadd.f32 %v3372_v46, %v3099_v47  ;;  %3109 = vst [vmem:[%s653_s19] sm:$0xff] %v3107_v52 }
 0xb5e   : > { %3110 = vst [vmem:[%s653_s19 + $0x8] sm:$0xff] %v3108_v49 }
 0xb5f   : > { %4036 = shalt.err (!%p4033_p8)
}
 0xb60   : > { %s4037_s5 = scalar_lea.hbm %s4857_s13, 256  ;;  %s4041_s19 = scalar_lea.hbm %s4973_s30, 512 }
 0xb61   : > { %p4038_p4 = scmp.ne.s32.totalorder %s4857_s13, %s4037_s5  ;;  %p4042_p3 = scmp.lt.u32.totalorder %s4857_s13, %s4973_s30 }
 0xb62   : > { %p4043_p5 = scmp.lt.u32.totalorder %s4041_s19, %s4037_s5  ;;  %p4045_p6 = scmp.lt.u32.totalorder %s4037_s5, %s4857_s13 }
 0xb63   : > { %p4039_p10 = pnand %p4038_p4, %p4974_p9 }
 0xb64   : > { %p4044_p7 = por %p4043_p5, %p4042_p3 }
 0xb65   : > { %p4040_p11 = pneg %p4039_p10 }
 0xb66   : > { %p4046_p12 = por %p4045_p6, %p4044_p7 }
 0xb68   : > { %p4047_p1 = pnand %p4046_p12, %p4040_p11 }
 0xb6a   : > { %4050 = shalt.err (!%p4047_p1)
}
 0xb6b   : > { %s4123_s0 = smov 128   ;;  %s4124_s1 = smov 8  }
 0xb6c   : > { %3608 = dma.vmem_to_hbm [thread:$0]  (%p4974_p9), %s4859_s23, 256, %s4857_s13, %s3112_s29, %s4123_s0, %s4123_s0, %s4124_s1  }
 0xb6d PF: > { %s3140_s8 = sand.u32 1, %s4089_s24   ;;  %p4975_p13 = scmp.ne.s32.totalorder %s4955_s20, 0 }
 0xb6e   : > { %p4976_p0 = scmp.ge.s32.totalorder %s4101_s27, 2  ;;  %s3141_s16 = scalar_lea.sflag [#allocation4], %s3140_s8 }
 0xb70   : > { %p3634_p2 = pnand %p4976_p0, %p4975_p13 }
 0xb72   : > { %4084 = dma.done.wait (!%p3634_p2), %s3141_s16, 256  }
 0xb73   : > { %4086 = vsyncadd (!%p3634_p2), %s3141_s16, 4294967040  ;;  %p33_p8 = scmp.ge.s32.totalorder %s4409_s18, 4   ;;  %s4977_s24 = smov %s4093_s25 }
 0xb74   : > { %s4978_s25 = smov %s4097_s26  ;;  %s4979_s26 = smov %s4420_s14 }
 0xb75   : > { %s4980_s27 = smov %s4409_s18  ;;  %35 = sbr.rel (!%p33_p8) target bundleno = 20 (0x14), region = 157 }
 0xb7c   :  { %3146 = vsyncpa [#allocation3], 1 }
 0xb7d   :  { %3148 = vsyncpa [#allocation3 + $0x1], 1 }
 0xb7e   :  { %3149 = vsyncpa [#allocation6], 1 }
 0xb7f   :  { %3150 = vsyncpa [#allocation9], 1 }
 0xb80   :  { %3151 = vsyncpa [#allocation12], 1 }
 0xb81   :  { %3152 = vsyncpa [#allocation4], 1 }
 0xb82   :  { %3154 = vsyncpa [#allocation4 + $0x1], 1 }

// kernel: tpu_custom_call.1
= control target key start
LH: loop header
LB: loop body
LE: loop exit
PB: predicated region body
PF: predicated region fallthrough
CT: control target
= control target key end

     0   :  { %s4903_s0 = inlined_call_operand.hbm [shape: f32[2,16,128], index: 0, kind: input, shape index: {}]   ;;  %s4904_s1 = inlined_call_operand.hbm [shape: bf16[128,128], index: 1, kind: input, shape index: {}]   ;;  %s4905_s2 = inlined_call_operand.vmem [shape: f32[1,128], index: 2, kind: input, shape index: {}]   ;;  %s4906_s3 = inlined_call_operand.hbm [shape: bf16[128,128], index: 3, kind: input, shape index: {}]   ;;  %s4907_s4 = inlined_call_operand.vmem [shape: f32[1,128], index: 4, kind: input, shape index: {}]   ;;  %s4908_s5 = inlined_call_operand.hbm [shape: bf16[128,128], index: 5, kind: input, shape index: {}]   ;;  %s4909_s6 = inlined_call_operand.vmem [shape: f32[1,128], index: 6, kind: input, shape index: {}]   ;;  %s4910_s7 = inlined_call_operand.hbm [shape: bf16[128,128], index: 7, kind: input, shape index: {}]   ;;  %s4911_s8 = inlined_call_operand.vmem [shape: f32[1,128], index: 8, kind: input, shape index: {}]   ;;  %s4912_s9 = inlined_call_operand.hbm [shape: bf16[128,256], index: 9, kind: input, shape index: {}]   ;;  %s4913_s10 = inlined_call_operand.vmem [shape: f32[1,256], index: 10, kind: input, shape index: {}]   ;;  %s4914_s11 = inlined_call_operand.hbm [shape: bf16[256,128], index: 11, kind: input, shape index: {}]   ;;  %s4915_s12 = inlined_call_operand.vmem [shape: f32[1,128], index: 12, kind: input, shape index: {}]   ;;  %s4916_s13 = inlined_call_operand.vmem [shape: f32[1,128], index: 13, kind: input, shape index: {}]   ;;  %s4917_s14 = inlined_call_operand.vmem [shape: f32[1,128], index: 14, kind: input, shape index: {}]   ;;  %s4918_s15 = inlined_call_operand.vmem [shape: f32[1,128], index: 15, kind: input, shape index: {}]   ;;  %s4919_s16 = inlined_call_operand.vmem [shape: f32[1,128], index: 16, kind: input, shape index: {}]   ;;  %s4920_s17 = inlined_call_operand.hbm [shape: f32[2,16,128], index: 17, kind: output, shape index: {}]  }
   0x1   :  { %4933 = sst [smem:[#allocation20_spill]] %s4903_s0 }
   0x2   :  { %4934 = sst [smem:[#allocation21_spill]] %s4904_s1 }
   0x3   :  { %4935 = sst [smem:[#allocation22_spill]] %s4908_s5 }
   0x4   :  { %4936 = sst [smem:[#allocation23_spill]] %s4911_s8 }
   0x5   :  { %4937 = sst [smem:[#allocation24_spill]] %s4913_s10 }
   0x6   :  { %4938 = sst [smem:[#allocation25_spill]] %s4915_s12 }
   0x7   :  { %4939 = sst [smem:[#allocation26_spill]] %s4916_s13 }
   0x8   :  { %4940 = sst [smem:[#allocation27_spill]] %s4917_s14 }
   0x9   :  { %4941 = sst [smem:[#allocation28_spill]] %s4918_s15 }
   0xa   :  { %4942 = sst [smem:[#allocation29_spill]] %s4919_s16 }
   0xb   :  { %4943 = sst [smem:[#allocation30_spill]] %s4920_s17 }
   0xc   :  { %22 = vsyncpa [#allocation3], 0 }
   0xd   :  { %24 = vsyncpa [#allocation3 + $0x1], 0 }
   0xe   :  { %25 = vsyncpa [#allocation6], 0 }
   0xf   :  { %26 = vsyncpa [#allocation9], 0 }
  0x10   :  { %27 = vsyncpa [#allocation12], 0 }
  0x11   :  { %28 = vsyncpa [#allocation4], 0 }
  0x12   :  { %30 = vsyncpa [#allocation4 + $0x1], 0  ;;  %s4215_s24 = smov 0   ;;  %s4217_s25 = smov 0  }
  0x13   :  { %s4219_s26 = smov 0   ;;  %s4221_s27 = smov 0  }
  0x14 LB: > { %s4103_s28 = smov [#allocation5]   ;;  %s4236_s0 = sadd.s32 4294967295, %s4101_s27   ;;  %s4101_s27 = sphi %s4221_s27, %s4980_s27   ;;  %s4097_s26 = sphi %s4219_s26, %s4979_s26   ;;  %s4093_s25 = sphi %s4217_s25, %s4978_s25   ;;  %s4089_s24 = sphi %s4215_s24, %s4977_s24  }
  0x15   : > { %s441_s29 = sshll.u32 %s4103_s28, 4  ;;  %p3256_p0 = scmp.ge.s32.totalorder %s4101_s27, 1  ;;  %s4241_s29 = int_to_ptr.vmem [resolvable:$true] %s441_s29 }
  0x16   : > { %p4929_p1 = scmp.eq.s32.totalorder %s4236_s0, 0  ;;  %p429_p2 = scmp.lt.s32.totalorder %s4101_s27, 3 }
  0x17   : > { %s4104_s18 = smov [#allocation8]   ;;  %s4105_s20 = smov [#allocation11]  }
  0x18   : > { %p4243_p3 = pnand %p3256_p0, %p429_p2  ;;  %s473_s19 = sshll.u32 %s4104_s18, 4  ;;  %s4256_s19 = int_to_ptr.vmem [resolvable:$true] %s473_s19 }
  0x19   : > { %s505_s21 = sshll.u32 %s4105_s20, 4  ;;  %s4946_s28 = sld [smem:[#allocation21_spill]]  ;;  %s4258_s21 = int_to_ptr.vmem [resolvable:$true] %s505_s21 }
  0x1a   : > { %s4944_s30 = scalar_select %p4243_p3, 1, 0 }
  0x1b   : > { %p3610_p5 = pneg %p4243_p3 }
  0x1d   : > { %p4252_p6 = pnand %p3610_p5, %p4929_p1 }
  0x1f   : > { %s3825_s17 = scalar_lea.hbm %s4946_s28, 1024  ;;  %p4268_p8 = pneg %p4252_p6 }
  0x20   : > { %p3826_p7 = scmp.ne.s32.totalorder %s4946_s28, %s3825_s17  ;;  %p3832_p11 = scmp.lt.u32.totalorder %s3825_s17, %s4946_s28 }
  0x22   : > { %p3828_p9 = pnand %p4268_p8, %p3826_p7 }
  0x24   : > { %p3829_p10 = pneg %p3828_p9 }
  0x26   : > { %p3834_p12 = pnand %p3832_p11, %p3829_p10 }
  0x28   : > { %3837 = shalt.err (!%p3834_p12)
}
  0x29   : > { %s3838_s15 = scalar_lea.vmem %s4241_s29, 1024  ;;  %p3846_p5 = scmp.lt.s32.totalorder %s4241_s29, %s4241_s29 }
  0x2a   : > { %p3839_p13 = scmp.ne.s32.totalorder %s4241_s29, %s3838_s15  ;;  %p3847_p4 = scmp.lt.s32.totalorder %s3838_s15, %s3838_s15 }
  0x2c   : > { %p3841_p0 = pnand %p3839_p13, %p4268_p8  ;;  %p3848_p7 = por %p3847_p4, %p3846_p5 }
  0x2e   : > { %p3842_p2 = pneg %p3841_p0 }
  0x30   : > { %p3849_p9 = pnand %p3848_p7, %p3842_p2 }
  0x32   : > { %3852 = shalt.err (!%p3849_p9)
}
  0x33   : > { %s4924_s16 = smov 64   ;;  %s4926_s12 = smov 4  }
  0x34   : > { %3613 = dma.hbm_to_vmem [thread:$0]  (!%p4252_p6), %s4946_s28, 1024, %s4241_s29, [#allocation6], %s4924_s16, %s4924_s16, %s4926_s12  }
  0x35   : > { %s4948_s5 = sld [smem:[#allocation22_spill]] }
  0x3b   : > { %s3853_s15 = scalar_lea.hbm %s4948_s5, 1024 }
  0x3c   : > { %p3854_p4 = scmp.ne.s32.totalorder %s4948_s5, %s3853_s15  ;;  %p3860_p12 = scmp.lt.u32.totalorder %s3853_s15, %s4948_s5 }
  0x3e   : > { %p3856_p10 = pnand %p3854_p4, %p4268_p8 }
  0x40   : > { %p3857_p11 = pneg %p3856_p10 }
  0x42   : > { %p3862_p13 = pnand %p3860_p12, %p3857_p11 }
  0x44   : > { %3865 = shalt.err (!%p3862_p13)
}
  0x45   : > { %s3866_s29 = scalar_lea.vmem %s4256_s19, 1024  ;;  %p3874_p7 = scmp.lt.s32.totalorder %s4256_s19, %s4256_s19 }
  0x46   : > { %p3867_p0 = scmp.ne.s32.totalorder %s4256_s19, %s3866_s29  ;;  %p3875_p9 = scmp.lt.s32.totalorder %s3866_s29, %s3866_s29 }
  0x48   : > { %p3869_p2 = pnand %p3867_p0, %p4268_p8  ;;  %p3876_p4 = por %p3875_p9, %p3874_p7 }
  0x4a   : > { %p3870_p5 = pneg %p3869_p2 }
  0x4c   : > { %p3877_p10 = pnand %p3876_p4, %p3870_p5 }
  0x4e   : > { %3880 = shalt.err (!%p3877_p10)
}
  0x4f   : > { %3619 = dma.hbm_to_vmem [thread:$0]  (!%p4252_p6), %s4948_s5, 1024, %s4256_s19, [#allocation9], %s4924_s16, %s4924_s16, %s4926_s12  }
  0x50   : > { %s3881_s17 = scalar_lea.hbm %s4912_s9, 2048 }
  0x51   : > { %p3882_p11 = scmp.ne.s32.totalorder %s4912_s9, %s3881_s17  ;;  %p3888_p0 = scmp.lt.u32.totalorder %s3881_s17, %s4912_s9 }
  0x53   : > { %p3884_p12 = pnand %p3882_p11, %p4268_p8 }
  0x55   : > { %p3885_p13 = pneg %p3884_p12 }
  0x57   : > { %p3890_p2 = pnand %p3888_p0, %p3885_p13 }
  0x59   : > { %3893 = shalt.err (!%p3890_p2)
}
  0x5a   : > { %s3894_s19 = scalar_lea.vmem %s4258_s21, 2048  ;;  %p3902_p4 = scmp.lt.s32.totalorder %s4258_s21, %s4258_s21 }
  0x5b   : > { %p3895_p5 = scmp.ne.s32.totalorder %s4258_s21, %s3894_s19  ;;  %p3903_p10 = scmp.lt.s32.totalorder %s3894_s19, %s3894_s19 }
  0x5d   : > { %p3897_p7 = pnand %p3895_p5, %p4268_p8  ;;  %p3904_p11 = por %p3903_p10, %p3902_p4 }
  0x5f   : > { %p3898_p9 = pneg %p3897_p7 }
  0x61   : > { %p3905_p12 = pnand %p3904_p11, %p3898_p9 }
  0x63   : > { %3908 = shalt.err (!%p3905_p12)
}
  0x64   : > { %s4931_s29 = smov 128   ;;  %s4109_s8 = smov 8  }
  0x65   : > { %3625 = dma.hbm_to_vmem [thread:$0]  (!%p4252_p6), %s4912_s9, 2048, %s4258_s21, [#allocation12], %s4931_s29, %s4931_s29, %s4109_s8  }
  0x66   : > { %s4110_s14 = smov [#allocation7]   ;;  %s4111_s22 = smov [#allocation10]  }
  0x67   : > { %s457_s17 = sshll.u32 %s4110_s14, 4  ;;  %s489_s23 = sshll.u32 %s4111_s22, 4  ;;  %s458_s17 = int_to_ptr.vmem [resolvable:$true] %s457_s17  ;;  %s490_s23 = int_to_ptr.vmem [resolvable:$true] %s489_s23 }
  0x68   : > { %s3909_s19 = scalar_lea.hbm %s4906_s3, 1024 }
  0x69   : > { %p3910_p13 = scmp.ne.s32.totalorder %s4906_s3, %s3909_s19  ;;  %p3916_p5 = scmp.lt.u32.totalorder %s3909_s19, %s4906_s3 }
  0x6b   : > { %p3912_p0 = pnand %p3910_p13, %p4268_p8 }
  0x6d   : > { %p3913_p2 = pneg %p3912_p0 }
  0x6f   : > { %p3918_p7 = pnand %p3916_p5, %p3913_p2 }
  0x71   : > { %3921 = shalt.err (!%p3918_p7)
}
  0x72   : > { %s3922_s21 = scalar_lea.vmem %s458_s17, 1024  ;;  %p3930_p11 = scmp.lt.s32.totalorder %s458_s17, %s458_s17 }
  0x73   : > { %p3923_p9 = scmp.ne.s32.totalorder %s458_s17, %s3922_s21  ;;  %p3931_p12 = scmp.lt.s32.totalorder %s3922_s21, %s3922_s21 }
  0x75   : > { %p3925_p4 = pnand %p3923_p9, %p4268_p8  ;;  %p3932_p1 = por %p3931_p12, %p3930_p11 }
  0x77   : > { %p3926_p10 = pneg %p3925_p4 }
  0x79   : > { %p3933_p3 = pnand %p3932_p1, %p3926_p10 }
  0x7b   : > { %3936 = shalt.err (!%p3933_p3)
}
  0x7c   : > { %s4949_s16 = smov 4   ;;  %s4950_s12 = smov 64  }
  0x7d   : > { %3616 = dma.hbm_to_vmem [thread:$0]  (!%p4252_p6), %s4906_s3, 1024, %s458_s17, [#allocation6], %s4950_s12, %s4950_s12, %s4949_s16  }
  0x7e   : > { %s3937_s14 = scalar_lea.hbm %s4910_s7, 1024 }
  0x7f   : > { %p3938_p1 = scmp.ne.s32.totalorder %s4910_s7, %s3937_s14  ;;  %p3944_p0 = scmp.lt.u32.totalorder %s3937_s14, %s4910_s7 }
  0x81   : > { %p3940_p3 = pnand %p3938_p1, %p4268_p8 }
  0x83   : > { %p3941_p13 = pneg %p3940_p3 }
  0x85   : > { %p3946_p2 = pnand %p3944_p0, %p3941_p13 }
  0x87   : > { %3949 = shalt.err (!%p3946_p2)
}
  0x88   : > { %s3950_s21 = scalar_lea.vmem %s490_s23, 1024  ;;  %p3958_p4 = scmp.lt.s32.totalorder %s490_s23, %s490_s23 }
  0x89   : > { %p3951_p5 = scmp.ne.s32.totalorder %s490_s23, %s3950_s21  ;;  %p3959_p10 = scmp.lt.s32.totalorder %s3950_s21, %s3950_s21 }
  0x8b   : > { %p3953_p7 = pnand %p3951_p5, %p4268_p8  ;;  %p3960_p11 = por %p3959_p10, %p3958_p4 }
  0x8d   : > { %p3954_p9 = pneg %p3953_p7 }
  0x8f   : > { %p3961_p12 = pnand %p3960_p11, %p3954_p9 }
  0x91   : > { %3964 = shalt.err (!%p3961_p12)
}
  0x92   : > { %3622 = dma.hbm_to_vmem [thread:$0]  (!%p4252_p6), %s4910_s7, 1024, %s490_s23, [#allocation9], %s4950_s12, %s4950_s12, %s4949_s16  }
  0x93   : > { %s4112_s28 = smov [#allocation13]   ;;  %s3965_s22 = scalar_lea.hbm %s4914_s11, 2048 }
  0x94   : > { %s521_s10 = sshll.u32 %s4112_s28, 4  ;;  %p3966_p1 = scmp.ne.s32.totalorder %s4914_s11, %s3965_s22  ;;  %s522_s10 = int_to_ptr.vmem [resolvable:$true] %s521_s10 }
  0x95   : > { %p3972_p0 = scmp.lt.u32.totalorder %s3965_s22, %s4914_s11 }
  0x96   : > { %p3968_p3 = pnand %p3966_p1, %p4268_p8 }
  0x98   : > { %p3969_p13 = pneg %p3968_p3 }
  0x9a   : > { %p3974_p2 = pnand %p3972_p0, %p3969_p13 }
  0x9c   : > { %3977 = shalt.err (!%p3974_p2)
}
  0x9d   : > { %s3978_s23 = scalar_lea.vmem %s522_s10, 2048  ;;  %p3986_p4 = scmp.lt.s32.totalorder %s522_s10, %s522_s10 }
  0x9e   : > { %p3979_p5 = scmp.ne.s32.totalorder %s522_s10, %s3978_s23  ;;  %p3987_p10 = scmp.lt.s32.totalorder %s3978_s23, %s3978_s23 }
  0xa0   : > { %p3981_p7 = pnand %p3979_p5, %p4268_p8  ;;  %p3988_p11 = por %p3987_p10, %p3986_p4 }
  0xa2   : > { %p3982_p9 = pneg %p3981_p7 }
  0xa4   : > { %p3989_p12 = pnand %p3988_p11, %p3982_p9 }
  0xa6   : > { %3992 = shalt.err (!%p3989_p12)
}
  0xa7   : > { %3628 = dma.hbm_to_vmem [thread:$0]  (!%p4252_p6), %s4914_s11, 2048, %s522_s10, [#allocation12], %s4950_s12, %s4950_s12, %s4949_s16  }
  0xa8   : > { %s3255_s1 = sadd.s32 4294967294, %s4101_s27   ;;  %s4409_s18 = sadd.s32 1, %s4101_s27  }
  0xa9   : > { %s40_s28 = ssub.s32 %s4101_s27, %s4409_s18  ;;  %s43_s13 = sadd.s32 1, %s4097_s26 }
  0xaa   : > { %p41_p8 = scmp.eq.s32.totalorder %s40_s28, 0  ;;  %p50_p1 = scmp.ne.s32.totalorder %s4097_s26, %s4093_s25 }
  0xab   : > { %p51_p3 = scmp.eq.s32.totalorder %s4101_s27, 0  ;;  %p56_p13 = scmp.ne.s32.totalorder %s4093_s25, %s4089_s24 }
  0xac   : > { %s4420_s14 = scalar_select %p41_p8, %s4097_s26, %s43_s13  }
  0xad   : > { %p4422_p0 = por %p51_p3, %p50_p1  ;;  %p4952_p2 = scmp.eq.s32.totalorder %s4236_s0, 0 }
  0xae   : > { %p416_p5 = scmp.eq.s32.totalorder %s4236_s0, 1  ;;  %p422_p7 = scmp.eq.s32.totalorder %s3255_s1, 1 }
  0xaf   : > { %p4428_p6 = por %p4952_p2, %p56_p13  ;;  %p3643_p9 = scmp.lt.s32.totalorder %s4101_s27, 2 }
  0xb0   : > { %s550_s12 = sand.u32 1, %s4097_s26   ;;  %p4435_p4 = por %p416_p5, %p50_p1 }
  0xb1   : > { %p4439_p10 = por %p422_p7, %p56_p13  ;;  %s3264_s15 = sshll.u32 %s550_s12, 4 }
  0xb2   : > { %s4954_s10 = scalar_select %p4435_p4, 1, 0 }
  0xb3   : > { %s4955_s20 = scalar_select %p4439_p10, 1, 0 }
  0xb4   : > { %s3378_s19 = sshll.u32 %s4101_s27, 8  ;;  %s4956_s17 = sld [smem:[#allocation20_spill]] }
  0xb5   : > { %s554_s1 = scalar_lea.vmem [#allocation2], %s3264_s15  ;;  %p4453_p11 = pnand %p3643_p9, %p4422_p0 }
  0xb6   : > { %s561_s28 = sshll.u32 %s554_s1, 4  ;;  %s4457_s29 = scalar_lea.sflag [#allocation3], %s550_s12  ;;  %s4449_s28 = int_to_ptr.vmem [resolvable:$true] %s561_s28 }
  0xb7   : > { %p3995_p8 = pneg %p4453_p11 }
  0xba   : > { %s4447_s5 = scalar_lea.hbm %s4956_s17, %s3378_s19  ;;  %s3998_s22 = scalar_lea.hbm %s4956_s17, 512 }
  0xbb   : > { %s3993_s21 = scalar_lea.hbm %s4447_s5, 256  ;;  %p3999_p13 = scmp.lt.u32.totalorder %s4447_s5, %s4956_s17 }
  0xbc   : > { %p3994_p12 = scmp.ne.s32.totalorder %s4447_s5, %s3993_s21  ;;  %p4000_p0 = scmp.lt.u32.totalorder %s3998_s22, %s3993_s21 }
  0xbd   : > { %p4002_p5 = scmp.lt.u32.totalorder %s3993_s21, %s4447_s5 }
  0xbe   : > { %p3996_p1 = pnand %p3995_p8, %p3994_p12  ;;  %p4001_p2 = por %p4000_p0, %p3999_p13 }
  0xc0   : > { %p3997_p3 = pneg %p3996_p1  ;;  %p4003_p7 = por %p4002_p5, %p4001_p2 }
  0xc2   : > { %p4004_p9 = pnand %p4003_p7, %p3997_p3 }
  0xc4   : > { %4007 = shalt.err (!%p4004_p9)
}
  0xc5   : > { %s4008_s12 = scalar_lea.vmem %s4449_s28, 256  ;;  %s4113_s15 = smov [#allocation2]  }
  0xc6   : > { %p4009_p12 = scmp.ne.s32.totalorder %s4449_s28, %s4008_s12  ;;  %s4013_s19 = sshll.u32 %s4113_s15, 4  ;;  %s4014_s19 = int_to_ptr.vmem [resolvable:$false] %s4013_s19 }
  0xc7   : > { %s4015_s23 = scalar_lea.vmem %s4014_s19, 512  ;;  %p4016_p4 = scmp.lt.s32.totalorder %s4449_s28, %s4014_s19 }
  0xc8   : > { %p4011_p1 = pnand %p4009_p12, %p3995_p8  ;;  %p4017_p13 = scmp.lt.s32.totalorder %s4015_s23, %s4008_s12 }
  0xca   : > { %p4012_p10 = pneg %p4011_p1  ;;  %p4018_p0 = por %p4017_p13, %p4016_p4 }
  0xcc   : > { %p4019_p2 = pnand %p4018_p0, %p4012_p10 }
  0xce   : > { %4022 = shalt.err (!%p4019_p2)
}
  0xcf   : > { %s4958_s21 = smov 128   ;;  %p4959_p8 = scmp.ne.s32.totalorder %s4944_s30, 0 }
  0xd0   : > { %3632 = dma.hbm_to_vmem [thread:$0]  (!%p4453_p11), %s4447_s5, 256, %s4449_s28, %s4457_s29, %s4958_s21, %s4958_s21, %s4109_s8  }
  0xd1   : > { %573 = sbr.rel (%p4959_p8) target bundleno = 2925 (0xb6d), region = 88  ;;  %s4491_s22 = sand.u32 (!%p4959_p8), 1, %s4093_s25  }
  0xd2   : > { %s3268_s1 = sshll.u32 (!%p4959_p8), %s4491_s22, 4  ;;  %s576_s12 = scalar_lea.sflag (!%p4959_p8), [#allocation3], %s4491_s22 }
  0xd3   : > { %s4497_s13 = scalar_lea.vmem (!%p4959_p8), [#allocation2], %s3268_s1 }
  0xd8   : > { %4068 = dma.done.wait (%p4428_p6), %s576_s12, 256  }
  0xd9   : > { %4070 = vsyncadd (%p4428_p6), %s576_s12, 4294967040  ;;  %p4960_p4 = scmp.eq.s32.totalorder %s4236_s0, 0 }
  0xdb   : > { %4072 = dma.done.wait (%p4960_p4), [#allocation6], 2048   ;;  %p4961_p10 = pmov %p4960_p4 }
  0xdc   : > { %p4962_p11 = pmov %p4960_p4 }
  0xdd   : > { %4074 = vsyncadd (%p4961_p10), [#allocation6], 4294965248 }
  0xde   : > { %4076 = dma.done.wait (%p4962_p11), [#allocation9], 2048   ;;  %p4963_p3 = pmov %p4960_p4 }
  0xe0   : > { %4078 = vsyncadd (%p4963_p3), [#allocation9], 4294965248  ;;  %p4964_p5 = pmov %p4963_p3 }
  0xe1   : > { %p4965_p7 = pmov %p4963_p3 }
  0xe2   : > { %4080 = dma.done.wait (%p4964_p5), [#allocation12], 4096  }
  0xe3   : > { %4082 = vsyncadd (%p4965_p7), [#allocation12], 4294963200  ;;  %v4114_v0 = vmov 0.0   ;;  %vm4115_vm0 = vmmov 0   ;;  %v3703_v1 = vld [vmem:[#allocation7] sm:$0xff]   ;;  %v3705_v3 = vld [vmem:[#allocation7 + $0x8] sm:$0xff]   ;;  %v804_v46 = vlaneseq }
  0xe4   : > { %3474 = vmatprep.subr.bf16.mxu1 %v4114_v0  ;;  %3454 = vmatprep.subr.bf16.mxu0 %v4114_v0  ;;  %v3704_v2 = vld [vmem:[#allocation5] sm:$0xff]   ;;  %v3706_v4 = vld [vmem:[#allocation5 + $0x8] sm:$0xff]   ;;  %v3707_v5 = vld [vmem:[#allocation7 + $0x10] sm:$0xff]   ;;  %s4116_s5 = smov 32   ;;  %s4117_s28 = smov 96   ;;  %v4121_v52 = vmov 0  }
  0xe5   : > { %3490 = vmatprep.mubr.msk.bf16.mxu1 %vm4115_vm0, %v4114_v0  ;;  %3470 = vmatprep.mubr.msk.bf16.mxu0 %vm4115_vm0, %v4114_v0  ;;  %v3708_v6 = vld [vmem:[#allocation5 + $0x10] sm:$0xff]   ;;  %v3709_v7 = vld [vmem:[#allocation7 + $0x18] sm:$0xff]   ;;  %v3711_v9 = vld [vmem:[#allocation7 + $0x20] sm:$0xff]   ;;  %s4118_s15 = smov 64   ;;  %v4119_v44 = vmov 1983009808   ;;  %v4574_v53 = vpack.i.b16 %v4121_v52, %v4121_v52 }
  0xe6   : > { %3475 = vmatpush3.bf16.msra.mxu1 %v3703_v1  ;;  %3455 = vmatpush3.bf16.msra.mxu0 %v3704_v2  ;;  %v3710_v8 = vld [vmem:[#allocation5 + $0x18] sm:$0xff]   ;;  %v3712_v10 = vld [vmem:[#allocation5 + $0x20] sm:$0xff]   ;;  %v3713_v11 = vld [vmem:[#allocation7 + $0x28] sm:$0xff]   ;;  %v802_v45 = vunpack.c.l.s4 %v4119_v44  ;;  %v4570_v48 = vshrl.u32 %v804_v46, 7  ;;  %v4120_v49 = vmov 1934713408  }
  0xe7   : > { %3476 = vmatprep.subr.bf16.mxu1 %v4114_v0  ;;  %3456 = vmatprep.subr.bf16.mxu0 %v4114_v0  ;;  %v3714_v12 = vld [vmem:[#allocation5 + $0x28] sm:$0xff]   ;;  %v3715_v13 = vld [vmem:[#allocation7 + $0x30] sm:$0xff]   ;;  %v3717_v15 = vld [vmem:[#allocation7 + $0x38] sm:$0xff]   ;;  %v833_v50 = vunpack.c.l.s4 %v4120_v49  ;;  %vm1808_vm1 = vcmask 261120   ;;  %vm1997_vm2 = vcmask 130048   ;;  %vm2539_vm3 = vcmask 523264  }
  0xe8   : > { %v3716_v14 = vld [vmem:[#allocation5 + $0x30] sm:$0xff]   ;;  %v656_v17 = vld [vmem:[%s4497_s13 + $0x8] sm:$0xff]  ;;  %v3276_v20 = vld [vmem:[%s4905_s2] ss:$0 sm:$0xff]  ;;  %v803_v47 = vunpack.c.0.s8 %v802_v45  ;;  %vm2542_vm4 = vcmask 785408   ;;  %s4966_s30 = sld [smem:[#allocation23_spill]] }
  0xe9   : > { %v655_v16 = vld [vmem:[%s4497_s13] sm:$0xff]  ;;  %v3718_v18 = vld [vmem:[#allocation5 + $0x38] sm:$0xff]   ;;  %v3720_v37 = vld [vmem:[#allocation8 + $0x8] sm:$0xff]   ;;  %v834_v60 = vunpack.c.0.s8 %v833_v50  ;;  %s4967_s8 = sld [smem:[#allocation26_spill]]  ;;  %s4969_s23 = sld [smem:[#allocation24_spill]] }
  0xea   : > { %3477 = vmatpush3.bf16.msra.mxu1 %v3705_v3  ;;  %3457 = vmatpush3.bf16.msra.mxu0 %v3706_v4  ;;  %v657_v19 = vpack.c.bf16 %v656_v17, %v655_v16  ;;  %v3289_v21 = vld [vmem:[%s4907_s4] ss:$0 sm:$0xff]  ;;  %v3721_v38 = vld [vmem:[#allocation8 + $0x10] sm:$0xff]   ;;  %v3722_v39 = vld [vmem:[#allocation8 + $0x18] sm:$0xff]   ;;  %v4577_v58 = vsub.s32 %v803_v47, %v4570_v48  ;;  %s653_s19 = scalar_lea.vmem [#allocation14], %s3268_s1  ;;  %s3112_s29 = scalar_lea.sflag [#allocation4], %s4491_s22 }
  0xeb   : > { %3478 = vmatprep.subr.bf16.mxu1 %v4114_v0  ;;  %3458 = vmatprep.subr.bf16.mxu0 %v4114_v0  ;;  %v3719_v36 = vld [vmem:[#allocation8] sm:$0xff]   ;;  %v3724_v41 = vld [vmem:[#allocation8 + $0x28] sm:$0xff]   ;;  %v3725_v42 = vld [vmem:[#allocation8 + $0x30] sm:$0xff]   ;;  %p4974_p9 = scmp.ne.s32.totalorder %s4954_s10, 0  ;;  %s4122_s1 = smov [#allocation14]  }
  0xec   : > { %v3723_v40 = vld [vmem:[#allocation8 + $0x20] sm:$0xff]   ;;  %v3726_v43 = vld [vmem:[#allocation8 + $0x38] sm:$0xff]  }
  0xee   : > { %3479 = vmatpush3.bf16.msra.mxu1 %v3707_v5  ;;  %3459 = vmatpush3.bf16.msra.mxu0 %v3708_v6  ;;  %v4583_v6 = vsub.s32 %v834_v60, %v4570_v48 }
  0xef   : > { %3480 = vmatprep.subr.bf16.mxu1 %v4114_v0  ;;  %3460 = vmatprep.subr.bf16.mxu0 %v4114_v0 }
  0xf2   : > { %3481 = vmatpush3.bf16.msra.mxu1 %v3709_v7  ;;  %3461 = vmatpush3.bf16.msra.mxu0 %v3710_v8 }
  0xf3   : > { %3482 = vmatprep.subr.bf16.mxu1 %v4114_v0  ;;  %3462 = vmatprep.subr.bf16.mxu0 %v4114_v0 }
  0xf6   : > { %3483 = vmatpush3.bf16.msra.mxu1 %v3711_v9  ;;  %3463 = vmatpush3.bf16.msra.mxu0 %v3712_v10 }
  0xf7   : > { %3484 = vmatprep.subr.bf16.mxu1 %v4114_v0  ;;  %3464 = vmatprep.subr.bf16.mxu0 %v4114_v0 }
  0xfa   : > { %3485 = vmatpush3.bf16.msra.mxu1 %v3713_v11  ;;  %3465 = vmatpush3.bf16.msra.mxu0 %v3714_v12 }
  0xfb   : > { %3486 = vmatprep.subr.bf16.mxu1 %v4114_v0  ;;  %3466 = vmatprep.subr.bf16.mxu0 %v4114_v0 }
  0xfe   : > { %3487 = vmatpush3.bf16.msra.mxu1 %v3715_v13  ;;  %3467 = vmatpush3.bf16.msra.mxu0 %v3716_v14 }
  0xff   : > { %3488 = vmatprep.subr.bf16.mxu1 %v4114_v0  ;;  %3468 = vmatprep.subr.bf16.mxu0 %v4114_v0 }
 0x102   : > { %3489 = vmatpush3.bf16.msra.mxu1 %v3717_v15  ;;  %3469 = vmatpush3.bf16.msra.mxu0 %v3718_v18 }
 0x103   : > { %3514 = vmatprep.subr.bf16.mxu1 %v4114_v0  ;;  %3494 = vmatprep.subr.bf16.mxu0 %v4114_v0 }
 0x105   : > { %3491 = vmatmul.mubr.bf16.vlgmr.msra.gmra.mrb[0].mxu1 %v657_v19  ;;  %3471 = vmatmul.mubr.bf16.vlgmr.msra.gmra.mrb[0].mxu0 %v657_v19 }
 0x106   : > { %3516 = vmatprep.mubr.msk.bf16.mxu1 %vm4115_vm0, %v4114_v0  ;;  %3510 = vmatprep.mubr.msk.bf16.mxu0 %vm4115_vm0, %v4114_v0 }
 0x107   : > { %3495 = vmatpush3.bf16.msra.mxu0 %v3719_v36 }
 0x108   : > { %3496 = vmatprep.subr.bf16.mxu0 %v4114_v0 }
 0x10b   : > { %3497 = vmatpush3.bf16.msra.mxu0 %v3720_v37 }
 0x10c   : > { %3498 = vmatprep.subr.bf16.mxu0 %v4114_v0 }
 0x10f   : > { %3499 = vmatpush3.bf16.msra.mxu0 %v3721_v38 }
 0x110   : > { %3500 = vmatprep.subr.bf16.mxu0 %v4114_v0 }
 0x113   : > { %3501 = vmatpush3.bf16.msra.mxu0 %v3722_v39 }
 0x114   : > { %3502 = vmatprep.subr.bf16.mxu0 %v4114_v0 }
 0x117   : > { %3503 = vmatpush3.bf16.msra.mxu0 %v3723_v40 }
 0x118   : > { %3504 = vmatprep.subr.bf16.mxu0 %v4114_v0 }
 0x11b   : > { %3505 = vmatpush3.bf16.msra.mxu0 %v3724_v41 }
 0x11c   : > { %3506 = vmatprep.subr.bf16.mxu0 %v4114_v0 }
 0x11f   : > { %3507 = vmatpush3.bf16.msra.mxu0 %v3725_v42 }
 0x120   : > { %3508 = vmatprep.subr.bf16.mxu0 %v4114_v0 }
 0x123   : > { %3509 = vmatpush3.bf16.msra.mxu0 %v3726_v43 }
 0x124   : > { %3562 = vmatprep.subr.bf16.mxu0 %v4114_v0 }
 0x126   : > { %3511 = vmatmul.mubr.bf16.vlgmr.msra.gmra.mrb[4].mxu0 %v657_v19 }
 0x127   : > { %3578 = vmatprep.mubr.msk.bf16.mxu0 %vm4115_vm0, %v4114_v0 }
 0x1d8   : > { %v1149_v22 = vpop.f32.mrb[0].mxu1  ;;  %v763_v24 = vpop.f32.mrb[0].mxu0 }
 0x1d9   : > { %v3492_v23 = vpop.f32.mrb[1].mxu1  ;;  %v764_v26 = vadd.f32 %v3276_v20, %v763_v24  ;;  %v3472_v27 = vpop.f32.mrb[1].mxu0  ;;  %v1150_v28 = vadd.f32 %v3289_v21, %v1149_v22 }
 0x1da   : > { %v1152_v25 = vpop.f32.mrb[2].mxu1  ;;  %v766_v31 = vpop.f32.mrb[2].mxu0 }
 0x1db   : > { %v1153_v29 = vadd.f32 %v3289_v21, %v1152_v25  ;;  %v3493_v30 = vpop.f32.mrb[3].mxu1  ;;  %v767_v32 = vadd.f32 %v3276_v20, %v766_v31  ;;  %v3473_v33 = vpop.f32.mrb[3].mxu0 }
 0x1dd   : > { %v1156_v34 = vpack.c.bf16 %v1153_v29, %v1150_v28  ;;  %v4549_v35 = vpack.c.bf16 %v767_v32, %v764_v26 }
 0x1df   : > { %1162 = vrot.lane.b32.xlu1 %v1156_v34, %s4116_s5  ;;  %1158 = vrot.lane.b32.xlu0 %v1156_v34, %s4117_s28  ;;  %v1168_v56 = vshrl.u32 %v1156_v34, 16  ;;  %v782_v11 = vshrl.u32 %v4549_v35, 16 }
 0x1e3   : > { %1160 = vrot.lane.b32.xlu0 %v1156_v34, %s4118_s15  ;;  %772 = vrot.lane.b32.xlu1 %v4549_v35, %s4117_s28 }
 0x1e7   : > { %774 = vrot.lane.b32.xlu0 %v4549_v35, %s4118_s15  ;;  %776 = vrot.lane.b32.xlu1 %v4549_v35, %s4116_s5 }
 0x251   : > { %v1163_v51 = vpop.permute.xlu1 %1162  ;;  %v1159_v54 = vpop.permute.xlu0 %1158 }
 0x252   : > { %v1166_v55 = vpack.i.b16 %v1159_v54, %v1156_v34  ;;  %v1169_v57 = vshrl.u32 %v1159_v54, 16  ;;  %v1177_v2 = vshrl.u32 %v1163_v51, 16 }
 0x254   : > { %v1170_v59 = vpack.i.b16 %v1169_v57, %v1168_v56  ;;  %v1180_v61 = vcombine.high %v1166_v55, %v4574_v53  ;;  %v1187_v5 = vrot.slane %v1166_v55, %v4577_v58 }
 0x255   : > { %v1161_v62 = vpop.permute.xlu0 %1160  ;;  %v773_v1 = vpop.permute.xlu1 %772 }
 0x256   : > { %v1174_v63 = vpack.i.b16 %v1163_v51, %v1161_v62  ;;  %v1246_v3 = vcombine.high %v1170_v59, %v4574_v53  ;;  %v1176_v4 = vshrl.u32 %v1161_v62, 16  ;;  %v1194_v9 = vrot.slane %v1180_v61, %v4577_v58 }
 0x257   : > { %v783_v12 = vshrl.u32 %v773_v1, 16  ;;  %v1253_v13 = vrot.slane %v1170_v59, %v4577_v58  ;;  %v780_v20 = vpack.i.b16 %v773_v1, %v4549_v35 }
 0x258   : > { %v1195_v7 = vcombine.high %v1174_v63, %v4574_v53  ;;  %v1202_v8 = vrot.slane %v1174_v63, %v4577_v58  ;;  %v1178_v10 = vpack.i.b16 %v1177_v2, %v1176_v4  ;;  %v1260_v17 = vrot.slane %v1246_v3, %v4577_v58 }
 0x259   : > { %v784_v28 = vpack.i.b16 %v783_v12, %v782_v11  ;;  %v775_v29 = vpop.permute.xlu0 %774  ;;  %v777_v38 = vpop.permute.xlu1 %776  ;;  %v800_v42 = vcombine.high %v780_v20, %v4574_v53  ;;  %v807_v43 = vrot.slane %v780_v20, %v4577_v58 }
 0x25a   : > { %v1209_v14 = vrot.slane %v1195_v7, %v4577_v58  ;;  %v1210_v15 = vcombine.low %v1187_v5, %v1202_v8  ;;  %v1211_v16 = vcombine.high %v1187_v5, %v1202_v8  ;;  %v1261_v18 = vcombine.high %v1178_v10, %v4574_v53 }
 0x25b   : > { %v1268_v19 = vrot.slane %v1178_v10, %v4577_v58  ;;  %v790_v41 = vshrl.u32 %v775_v29, 16  ;;  %v866_v44 = vcombine.high %v784_v28, %v4574_v53  ;;  %v788_v47 = vpack.i.b16 %v777_v38, %v775_v29 }
 0x25c   : > { %v1218_v21 = vrot.slane %v1210_v15, %v4583_v6  ;;  %v1225_v22 = vrot.slane %v1211_v16, %v4583_v6  ;;  %v1226_v23 = vcombine.low %v1194_v9, %v1209_v14  ;;  %v1227_v24 = vcombine.high %v1194_v9, %v1209_v14 }
 0x25d   : > { %v1275_v25 = vrot.slane %v1261_v18, %v4577_v58  ;;  %v1276_v26 = vcombine.low %v1253_v13, %v1268_v19  ;;  %v1277_v27 = vcombine.high %v1253_v13, %v1268_v19  ;;  %v791_v49 = vshrl.u32 %v777_v38, 16 }
 0x25e   : > { %v1234_v30 = vrot.slane %v1226_v23, %v4583_v6  ;;  %v1241_v31 = vrot.slane %v1227_v24, %v4583_v6  ;;  %v1312_v32 = vcombine.low %v1218_v21, %v1225_v22  ;;  %v3298_v33 = vcombine.high %v1218_v21, %v1225_v22 }
 0x25f   : > { %v1284_v34 = vrot.slane %v1276_v26, %v4583_v6  ;;  %v1291_v35 = vrot.slane %v1277_v27, %v4583_v6  ;;  %v1292_v36 = vcombine.low %v1260_v17, %v1275_v25  ;;  %v1293_v37 = vcombine.high %v1260_v17, %v1275_v25 }
 0x260   : > { %v1328_v39 = vcombine.low %v1234_v30, %v1241_v31  ;;  %v3299_v40 = vcombine.high %v1234_v30, %v1241_v31  ;;  %v1319_v45 = vrot.slane %v1312_v32, %v4577_v58  ;;  %v1327_v46 = vrot.slane %v3298_v33, %v4577_v58 }
 0x261   : > { %v1300_v50 = vrot.slane %v1292_v36, %v4583_v6  ;;  %v1307_v51 = vrot.slane %v1293_v37, %v4583_v6  ;;  %v1362_v54 = vcombine.low %v1284_v34, %v1291_v35  ;;  %v792_v56 = vpack.i.b16 %v791_v49, %v790_v41 }
 0x262   : > { %v1335_v55 = vrot.slane %v1328_v39, %v4577_v58  ;;  %v815_v57 = vcombine.high %v788_v47, %v4574_v53  ;;  %v822_v59 = vrot.slane %v788_v47, %v4577_v58  ;;  %v1343_v60 = vrot.slane %v3299_v40, %v4577_v58 }
 0x263   : > { %v3300_v61 = vcombine.high %v1284_v34, %v1291_v35  ;;  %v814_v62 = vrot.slane %v800_v42, %v4577_v58  ;;  %v873_v63 = vrot.slane %v784_v28, %v4577_v58  ;;  %v880_v1 = vrot.slane %v866_v44, %v4577_v58 }
 0x264   : > { %v829_v2 = vrot.slane %v815_v57, %v4577_v58  ;;  %v830_v3 = vcombine.low %v807_v43, %v822_v59  ;;  %v831_v4 = vcombine.high %v807_v43, %v822_v59  ;;  %v881_v5 = vcombine.high %v792_v56, %v4574_v53 }
 0x265   : > { %v1378_v7 = vcombine.low %v1300_v50, %v1307_v51  ;;  %v3301_v8 = vcombine.high %v1300_v50, %v1307_v51  ;;  %v888_v9 = vrot.slane %v792_v56, %v4577_v58  ;;  %v1344_v10 = vcombine.low %v1319_v45, %v1327_v46 }
 0x266   : > { %v846_v11 = vcombine.low %v814_v62, %v829_v2  ;;  %v847_v12 = vcombine.high %v814_v62, %v829_v2  ;;  %v1352_v13 = vcombine.low %v1335_v55, %v1343_v60  ;;  %v1369_v14 = vrot.slane %v1362_v54, %v4577_v58 }
 0x267   : > { %v895_v15 = vrot.slane %v881_v5, %v4577_v58  ;;  %v896_v16 = vcombine.low %v873_v63, %v888_v9  ;;  %v897_v17 = vcombine.high %v873_v63, %v888_v9  ;;  %v1377_v18 = vrot.slane %v3300_v61, %v4577_v58 }
 0x268   : > { %v838_v19 = vrot.slane %v830_v3, %v4583_v6  ;;  %v845_v20 = vrot.slane %v831_v4, %v4583_v6  ;;  %v854_v21 = vrot.slane %v846_v11, %v4583_v6  ;;  %v861_v22 = vrot.slane %v847_v12, %v4583_v6 }
 0x269   : > { %v904_v23 = vrot.slane %v896_v16, %v4583_v6  ;;  %v911_v24 = vrot.slane %v897_v17, %v4583_v6  ;;  %v912_v25 = vcombine.low %v880_v1, %v895_v15  ;;  %v913_v26 = vcombine.high %v880_v1, %v895_v15 }
 0x26a   : > { %v948_v27 = vcombine.low %v854_v21, %v861_v22  ;;  %v3286_v28 = vcombine.high %v854_v21, %v861_v22  ;;  %v1385_v29 = vrot.slane %v1378_v7, %v4577_v58  ;;  %v1393_v30 = vrot.slane %v3301_v8, %v4577_v58 }
 0x26b   : > { %v920_v31 = vrot.slane %v912_v25, %v4583_v6  ;;  %v927_v32 = vrot.slane %v913_v26, %v4583_v6  ;;  %v982_v33 = vcombine.low %v904_v23, %v911_v24  ;;  %v3287_v34 = vcombine.high %v904_v23, %v911_v24 }
 0x26c   : > { %v932_v35 = vcombine.low %v838_v19, %v845_v20  ;;  %v3285_v36 = vcombine.high %v838_v19, %v845_v20  ;;  %v1394_v37 = vcombine.low %v1369_v14, %v1377_v18  ;;  %v955_v38 = vrot.slane %v948_v27, %v4577_v58 }
 0x26d   : > { %v998_v39 = vcombine.low %v920_v31, %v927_v32  ;;  %v3288_v40 = vcombine.high %v920_v31, %v927_v32  ;;  %v1359_v41 = vrot.slane %v1352_v13, %v4583_v6  ;;  %v963_v42 = vrot.slane %v3286_v28, %v4577_v58  ;;  %v3302_v31 = vld [vmem:[%s4909_s6] ss:$0 sm:$0xff]  ;;  %v1529_v32 = vpop.f32.mrb[4].mxu0 }
 0x26e   : > { %v989_v43 = vrot.slane %v982_v33, %v4577_v58  ;;  %v997_v44 = vrot.slane %v3287_v34, %v4577_v58  ;;  %v1402_v45 = vcombine.low %v1385_v29, %v1393_v30  ;;  %v1351_v49 = vrot.slane %v1344_v10, %v4583_v6  ;;  %v3512_v34 = vpop.f32.mrb[5].mxu0 }
 0x26f   : > { %v1005_v46 = vrot.slane %v998_v39, %v4577_v58  ;;  %v1013_v47 = vrot.slane %v3288_v40, %v4577_v58  ;;  %v939_v50 = vrot.slane %v932_v35, %v4577_v58  ;;  %v947_v51 = vrot.slane %v3285_v36, %v4577_v58  ;;  %v1532_v35 = vpop.f32.mrb[6].mxu0 }
 0x270   : > { %v1401_v54 = vrot.slane %v1394_v37, %v4583_v6  ;;  %v1409_v55 = vrot.slane %v1402_v45, %v4583_v6  ;;  %v972_v57 = vcombine.low %v955_v38, %v963_v42  ;;  %v1014_v59 = vcombine.low %v989_v43, %v997_v44  ;;  %v3513_v37 = vpop.f32.mrb[7].mxu0 }
 0x271   : > { %v1022_v56 = vcombine.low %v1005_v46, %v1013_v47  ;;  %v1360_v60 = vcombine.low %v1351_v49, %v1359_v41  ;;  %v964_v62 = vcombine.low %v939_v50, %v947_v51  ;;  %v1361_v16 = vcombine.high %v1351_v49, %v1359_v41 }
 0x272   : > { %v1410_v61 = vcombine.low %v1401_v54, %v1409_v55  ;;  %v979_v3 = vrot.slane %v972_v57, %v4583_v6  ;;  %v1021_v4 = vrot.slane %v1014_v59, %v4583_v6  ;;  %v1411_v14 = vcombine.high %v1401_v54, %v1409_v55 }
 0x273   : > { %v1029_v1 = vrot.slane %v1022_v56, %v4583_v6  ;;  %v971_v7 = vrot.slane %v964_v62, %v4583_v6  ;;  %v1415_v9 = vshrl.u32 %v1360_v60, 16  ;;  %v1421_v23 = vshrl.u32 %v1361_v16, 16 }
 0x274   : > { %v1414_v63 = vpack.i.b16 %v1410_v61, %v1360_v60  ;;  %v1416_v5 = vshrl.u32 %v1410_v61, 16  ;;  %v1420_v18 = vpack.i.b16 %v1411_v14, %v1361_v16  ;;  %v1422_v21 = vshrl.u32 %v1411_v14, 16 }
 0x275   : > { %v1030_v8 = vcombine.low %v1021_v4, %v1029_v1  ;;  %v980_v10 = vcombine.low %v971_v7, %v979_v3  ;;  %v1031_v22 = vcombine.high %v1021_v4, %v1029_v1  ;;  %v981_v24 = vcombine.high %v971_v7, %v979_v3 }
 0x276   : > { %v1813_v2 = vsel %vm1808_vm1, %v1414_v63, 0  ;;  %v1417_v11 = vpack.i.b16 %v1416_v5, %v1415_v9  ;;  %v1907_v20 = vsel %vm1808_vm1, %v1420_v18, 0  ;;  %v1423_v25 = vpack.i.b16 %v1422_v21, %v1421_v23 }
 0x277   : > { %3515 = vmatpush3.bf16.xpose.msra.mxu1 %v1813_v2  ;;  %v1034_v12 = vpack.i.b16 %v1030_v8, %v980_v10  ;;  %v1036_v15 = vshrl.u32 %v1030_v8, 16  ;;  %v1035_v17 = vshrl.u32 %v980_v10, 16  ;;  %v1040_v26 = vpack.i.b16 %v1031_v22, %v981_v24 }
 0x278   : > { %3520 = vmatprep.subr.bf16.mxu1 %v4114_v0  ;;  %v1860_v13 = vsel %vm1808_vm1, %v1417_v11, 0  ;;  %v1954_v27 = vsel %vm1808_vm1, %v1423_v25, 0  ;;  %v1042_v28 = vshrl.u32 %v1031_v22, 16  ;;  %v1041_v29 = vshrl.u32 %v981_v24, 16 }
 0x279   : > { %v1037_v19 = vpack.i.b16 %v1036_v15, %v1035_v17  ;;  %v1530_v33 = vadd.f32 %v3302_v31, %v1529_v32  ;;  %v1533_v36 = vadd.f32 %v3302_v31, %v1532_v35 }
 0x27a   : > { %v1043_v30 = vpack.i.b16 %v1042_v28, %v1041_v29 }
 0x27b   : > { %v4671_v38 = vpack.c.bf16 %v1533_v36, %v1530_v33 }
 0x27e   : > { %3517 = vmatmul.mubr.msk.bf16.vlgmr.msra.gmra.mrb[4].mxu1 %vm1808_vm1, %v1034_v12 }
 0x27f   : > { %3521 = vmatpush3.bf16.xpose.msra.mxu1 %v1860_v13  ;;  %3522 = vmatprep.mubr.msk.bf16.mxu1 %vm4115_vm0, %v4114_v0 }
 0x280   : > { %3526 = vmatprep.subr.bf16.mxu1 %v4114_v0 }
 0x286   : > { %3523 = vmatmul.mubr.msk.bf16.vlgmr.msra.gmra.mrb[8].mxu1 %vm1808_vm1, %v1037_v19 }
 0x287   : > { %3527 = vmatpush3.bf16.xpose.msra.mxu1 %v1907_v20  ;;  %3528 = vmatprep.mubr.msk.bf16.mxu1 %vm4115_vm0, %v4114_v0 }
 0x288   : > { %3532 = vmatprep.subr.bf16.mxu1 %v4114_v0 }
 0x28e   : > { %3529 = vmatmul.mubr.msk.bf16.vlgmr.msra.gmra.mrb[12].mxu1 %vm1808_vm1, %v1040_v26 }
 0x28f   : > { %3533 = vmatpush3.bf16.xpose.msra.mxu1 %v1954_v27  ;;  %3534 = vmatprep.mubr.msk.bf16.mxu1 %vm4115_vm0, %v4114_v0 }
 0x290   : > { %3538 = vmatprep.subr.bf16.mxu1 %v4114_v0 }
 0x296   : > { %3535 = vmatmul.mubr.msk.bf16.vlgmr.msra.gmra.mrb[16].mxu1 %vm1808_vm1, %v1043_v30 }
 0x297   : > { %3540 = vmatprep.mubr.msk.bf16.mxu1 %vm4115_vm0, %v4114_v0 }
 0x351   : > { %v1849_v39 = vpop.f32.mrb[4].mxu1 }
 0x352   : > { %v3518_v40 = vpop.f32.mrb[5].mxu1  ;;  %v1998_v41 = vsel %vm1997_vm2, %v1849_v39, -inf }
 0x353   : > { %1999 = vmax.xlane.f32.xlu0 %v1998_v41  ;;  %v1852_v42 = vpop.f32.mrb[6].mxu1 }
 0x354   : > { %v3519_v43 = vpop.f32.mrb[7].mxu1  ;;  %v2001_v44 = vsel %vm1997_vm2, %v1852_v42, -inf }
 0x355   : > { %2002 = vmax.xlane.f32.xlu1 %v2001_v44 }
 0x359   : > { %v1896_v45 = vpop.f32.mrb[8].mxu1 }
 0x35a   : > { %v3524_v46 = vpop.f32.mrb[9].mxu1  ;;  %v2004_v47 = vsel %vm1997_vm2, %v1896_v45, -inf }
 0x35b   : > { %2005 = vmax.xlane.f32.xlu0 %v2004_v47  ;;  %v1899_v49 = vpop.f32.mrb[10].mxu1 }
 0x35c   : > { %v3525_v50 = vpop.f32.mrb[11].mxu1  ;;  %v2007_v51 = vsel %vm1997_vm2, %v1899_v49, -inf }
 0x35f   : > { %2008 = vmax.xlane.f32.xlu0 %v2007_v51  ;;  %v1548_v51 = vshrl.u32 %v4671_v38, 16 }
 0x361   : > { %v1943_v54 = vpop.f32.mrb[12].mxu1 }
 0x362   : > { %v3530_v55 = vpop.f32.mrb[13].mxu1  ;;  %v2010_v56 = vsel %vm1997_vm2, %v1943_v54, -inf }
 0x363   : > { %2011 = vmax.xlane.f32.xlu1 %v2010_v56  ;;  %v1946_v57 = vpop.f32.mrb[14].mxu1 }
 0x364   : > { %v3531_v59 = vpop.f32.mrb[15].mxu1  ;;  %v2013_v60 = vsel %vm1997_vm2, %v1946_v57, -inf }
 0x365   : > { %2014 = vmax.xlane.f32.xlu0 %v2013_v60 }
 0x369   : > { %v1990_v61 = vpop.f32.mrb[16].mxu1 }
 0x36a   : > { %v3536_v62 = vpop.f32.mrb[17].mxu1  ;;  %v2016_v63 = vsel %vm1997_vm2, %v1990_v61, -inf }
 0x36b   : > { %2017 = vmax.xlane.f32.xlu1 %v2016_v63  ;;  %v1993_v1 = vpop.f32.mrb[18].mxu1 }
 0x36c   : > { %v3537_v2 = vpop.f32.mrb[19].mxu1  ;;  %v2019_v3 = vsel %vm1997_vm2, %v1993_v1, -inf }
 0x36d   : > { %2020 = vmax.xlane.f32.xlu0 %v2019_v3 }
 0x37c   : > { %1538 = vrot.lane.b32.xlu1 %v4671_v38, %s4117_s28 }
 0x3e0   : > { %v2000_v4 = vpop.xlane.xlu0 %1999 }
 0x3e1   : > { %v2022_v5 = vsub.f32 %v1849_v39, %v2000_v4 }
 0x3e2   : > { %v2003_v7 = vpop.xlane.xlu1 %2002 }
 0x3e3   : > { %v2030_v8 = vmul.f32 1.442695, %v2022_v5  ;;  %v2023_v9 = vsub.f32 %v1852_v42, %v2003_v7 }
 0x3e5   : > { %3775 = vpow2.f32 %v2030_v8  ;;  %v2032_v10 = vmul.f32 1.442695, %v2023_v9 }
 0x3e7   : > { %3777 = vpow2.f32 %v2032_v10 }
 0x3e8   : > { %v2006_v15 = vpop.xlane.xlu0 %2005 }
 0x3e9   : > { %v2024_v17 = vsub.f32 %v1896_v45, %v2006_v15 }
 0x3eb   : > { %v2034_v21 = vmul.f32 1.442695, %v2024_v17 }
 0x3ec   : > { %v2009_v16 = vpop.xlane.xlu0 %2008 }
 0x3ed   : > { %v2025_v19 = vsub.f32 %v1899_v49, %v2009_v16  ;;  %3779 = vpow2.f32 %v2034_v21 }
 0x3ef   : > { %v4683_v11 = vpop.eup %3775  ;;  %v2036_v24 = vmul.f32 1.442695, %v2025_v19 }
 0x3f0   : > { %v2046_v12 = vsel %vm1997_vm2, %v4683_v11, 0.0  ;;  %v2012_v20 = vpop.xlane.xlu1 %2011 }
 0x3f1   : > { %v4687_v13 = vpop.eup %3777  ;;  %2047 = vadd.xlane.f32.xlu1 %v2046_v12  ;;  %v2026_v25 = vsub.f32 %v1943_v54, %v2012_v20  ;;  %3781 = vpow2.f32 %v2036_v24 }
 0x3f2   : > { %v2049_v14 = vsel %vm1997_vm2, %v4687_v13, 0.0  ;;  %v2015_v18 = vpop.xlane.xlu0 %2014 }
 0x3f3   : > { %2050 = vadd.xlane.f32.xlu0 %v2049_v14  ;;  %v2027_v22 = vsub.f32 %v1946_v57, %v2015_v18  ;;  %v2038_v29 = vmul.f32 1.442695, %v2026_v25 }
 0x3f5   : > { %v2040_v27 = vmul.f32 1.442695, %v2027_v22 }
 0x3f7   : > { %3783 = vpow2.f32 %v2040_v27  ;;  %v4695_v33 = vpop.eup %3779 }
 0x3f8   : > { %v2018_v26 = vpop.xlane.xlu1 %2017  ;;  %3785 = vpow2.f32 %v2038_v29  ;;  %v2052_v35 = vsel %vm1997_vm2, %v4695_v33, 0.0 }
 0x3f9   : > { %v2028_v30 = vsub.f32 %v1990_v61, %v2018_v26 }
 0x3fa   : > { %v2021_v23 = vpop.xlane.xlu0 %2020 }
 0x3fb   : > { %v2029_v28 = vsub.f32 %v1993_v1, %v2021_v23  ;;  %v2042_v32 = vmul.f32 1.442695, %v2028_v30  ;;  %v4697_v34 = vpop.eup %3781 }
 0x3fc   : > { %v2055_v37 = vsel %vm1997_vm2, %v4697_v34, 0.0  ;;  %v1539_v46 = vpop.permute.xlu1 %1538 }
 0x3fd   : > { %v2044_v31 = vmul.f32 1.442695, %v2029_v28  ;;  %v1549_v47 = vshrl.u32 %v1539_v46, 16  ;;  %v1546_v50 = vpack.i.b16 %v1539_v46, %v4671_v38 }
 0x3ff   : > { %3787 = vpow2.f32 %v2044_v31  ;;  %v1550_v55 = vpack.i.b16 %v1549_v47, %v1548_v51  ;;  %v1560_v57 = vcombine.high %v1546_v50, %v4574_v53  ;;  %v1567_v1 = vrot.slane %v1546_v50, %v4577_v58 }
 0x400   : > { %3789 = vpow2.f32 %v2042_v32 }
 0x401   : > { %v4701_v36 = vpop.eup %3783  ;;  %v1626_v63 = vcombine.high %v1550_v55, %v4574_v53  ;;  %v1633_v10 = vrot.slane %v1550_v55, %v4577_v58 }
 0x402   : > { %1542 = vrot.lane.b32.xlu1 %v4671_v38, %s4116_s5  ;;  %v4705_v39 = vpop.eup %3785  ;;  %v2061_v40 = vsel %vm1997_vm2, %v4701_v36, 0.0 }
 0x403   : > { %v2058_v42 = vsel %vm1997_vm2, %v4705_v39, 0.0  ;;  %v1640_v12 = vrot.slane %v1626_v63, %v4577_v58 }
 0x409   : > { %1540 = vrot.lane.b32.xlu0 %v4671_v38, %s4118_s15  ;;  %v4709_v41 = vpop.eup %3787  ;;  %v1574_v38 = vrot.slane %v1560_v57, %v4577_v58 }
 0x40a   : > { %v4713_v43 = vpop.eup %3789  ;;  %v2067_v44 = vsel %vm1997_vm2, %v4709_v41, 0.0 }
 0x40b   : > { %v2064_v45 = vsel %vm1997_vm2, %v4713_v43, 0.0 }
 0x426   : > { %2053 = vadd.xlane.f32.xlu1 %v2052_v35 }
 0x428   : > { %2056 = vadd.xlane.f32.xlu0 %v2055_v37 }
 0x42a   : > { %2062 = vadd.xlane.f32.xlu1 %v2061_v40 }
 0x42c   : > { %2059 = vadd.xlane.f32.xlu0 %v2058_v42 }
 0x42e   : > { %2068 = vadd.xlane.f32.xlu1 %v2067_v44 }
 0x430   : > { %2065 = vadd.xlane.f32.xlu0 %v2064_v45 }
 0x47e   : > { %v2048_v49 = vpop.xlane.xlu1 %2047 }
 0x47f   : > { %3791 = vrcp.f32 %v2048_v49 }
 0x480   : > { %v2051_v54 = vpop.xlane.xlu0 %2050 }
 0x481   : > { %3793 = vrcp.f32 %v2051_v54 }
 0x482   : > { %v1543_v56 = vpop.permute.xlu1 %1542 }
 0x483   : > { %v1557_v60 = vshrl.u32 %v1543_v56, 16 }
 0x484   : > { %v1541_v59 = vpop.permute.xlu0 %1540 }
 0x485   : > { %v1554_v61 = vpack.i.b16 %v1543_v56, %v1541_v59  ;;  %v1556_v62 = vshrl.u32 %v1541_v59, 16 }
 0x487   : > { %v1558_v2 = vpack.i.b16 %v1557_v60, %v1556_v62  ;;  %v1575_v3 = vcombine.high %v1554_v61, %v4574_v53  ;;  %v1582_v4 = vrot.slane %v1554_v61, %v4577_v58 }
 0x489   : > { %v1589_v5 = vrot.slane %v1575_v3, %v4577_v58  ;;  %v1590_v7 = vcombine.low %v1567_v1, %v1582_v4  ;;  %v1591_v8 = vcombine.high %v1567_v1, %v1582_v4  ;;  %v1641_v9 = vcombine.high %v1558_v2, %v4574_v53  ;;  %v3792_v55 = vpop.eup %3791 }
 0x48a   : > { %v1648_v14 = vrot.slane %v1558_v2, %v4577_v58 }
 0x48b   : > { %v1598_v15 = vrot.slane %v1590_v7, %v4583_v6  ;;  %v1605_v16 = vrot.slane %v1591_v8, %v4583_v6  ;;  %v1606_v17 = vcombine.low %v1574_v38, %v1589_v5  ;;  %v1607_v18 = vcombine.high %v1574_v38, %v1589_v5  ;;  %v3794_v61 = vpop.eup %3793 }
 0x48c   : > { %v1655_v19 = vrot.slane %v1641_v9, %v4577_v58  ;;  %v1656_v20 = vcombine.low %v1633_v10, %v1648_v14  ;;  %v1657_v21 = vcombine.high %v1633_v10, %v1648_v14  ;;  %v2079_v5 = vmul.f32 %v3794_v61, %v4687_v13 }
 0x48d   : > { %v1614_v22 = vrot.slane %v1606_v17, %v4583_v6  ;;  %v1621_v23 = vrot.slane %v1607_v18, %v4583_v6  ;;  %v1692_v24 = vcombine.low %v1598_v15, %v1605_v16  ;;  %v3311_v25 = vcombine.high %v1598_v15, %v1605_v16 }
 0x48e   : > { %v1664_v26 = vrot.slane %v1656_v20, %v4583_v6  ;;  %v1671_v27 = vrot.slane %v1657_v21, %v4583_v6  ;;  %v1672_v28 = vcombine.low %v1640_v12, %v1655_v19  ;;  %v1673_v29 = vcombine.high %v1640_v12, %v1655_v19 }
 0x48f   : > { %v1699_v30 = vrot.slane %v1692_v24, %v4577_v58  ;;  %v1707_v31 = vrot.slane %v3311_v25, %v4577_v58  ;;  %v1708_v32 = vcombine.low %v1614_v22, %v1621_v23  ;;  %v3312_v35 = vcombine.high %v1614_v22, %v1621_v23 }
 0x490   : > { %v1680_v37 = vrot.slane %v1672_v28, %v4583_v6  ;;  %v1687_v40 = vrot.slane %v1673_v29, %v4583_v6  ;;  %v1742_v42 = vcombine.low %v1664_v26, %v1671_v27  ;;  %v3313_v44 = vcombine.high %v1664_v26, %v1671_v27 }
 0x491   : > { %v1715_v45 = vrot.slane %v1708_v32, %v4577_v58  ;;  %v1723_v46 = vrot.slane %v3312_v35, %v4577_v58  ;;  %v1724_v56 = vcombine.low %v1699_v30, %v1707_v31  ;;  %v2078_v9 = vmul.f32 %v3792_v55, %v4683_v11 }
 0x492   : > { %v1749_v47 = vrot.slane %v1742_v42, %v4577_v58  ;;  %v1757_v49 = vrot.slane %v3313_v44, %v4577_v58  ;;  %v1758_v50 = vcombine.low %v1680_v37, %v1687_v40  ;;  %v3314_v51 = vcombine.high %v1680_v37, %v1687_v40  ;;  %v3728_v44 = vld [vmem:[#allocation10 + $0x8] sm:$0xff]  }
 0x493   : > { %v1732_v54 = vcombine.low %v1715_v45, %v1723_v46  ;;  %v1731_v1 = vrot.slane %v1724_v56, %v4583_v6  ;;  %v2086_v12 = vpack.c.bf16 %v2079_v5, %v2078_v9  ;;  %v3729_v45 = vld [vmem:[#allocation10 + $0x10] sm:$0xff]   ;;  %v3730_v46 = vld [vmem:[#allocation10 + $0x18] sm:$0xff]  }
 0x494   : > { %v1765_v57 = vrot.slane %v1758_v50, %v4577_v58  ;;  %v1773_v59 = vrot.slane %v3314_v51, %v4577_v58  ;;  %v1774_v60 = vcombine.low %v1749_v47, %v1757_v49 }
 0x495   : > { %v1739_v62 = vrot.slane %v1732_v54, %v4583_v6 }
 0x496   : > { %v1782_v63 = vcombine.low %v1765_v57, %v1773_v59  ;;  %v1781_v2 = vrot.slane %v1774_v60, %v4583_v6 }
 0x497   : > { %v1740_v4 = vcombine.low %v1731_v1, %v1739_v62  ;;  %v1741_v24 = vcombine.high %v1731_v1, %v1739_v62 }
 0x498   : > { %v1789_v3 = vrot.slane %v1782_v63, %v4583_v6 }
 0x499   : > { %v1796_v10 = vshrl.u32 %v1740_v4, 16  ;;  %v1804_v30 = vshrl.u32 %v1741_v24, 16 }
 0x49a   : > { %v1790_v38 = vcombine.low %v1781_v2, %v1789_v3  ;;  %v1791_v20 = vcombine.high %v1781_v2, %v1789_v3 }
 0x49c   : > { %v1794_v7 = vpack.i.b16 %v1790_v38, %v1740_v4  ;;  %v1797_v8 = vshrl.u32 %v1790_v38, 16  ;;  %v1802_v27 = vpack.i.b16 %v1791_v20, %v1741_v24 }
 0x49e   : > { %3539 = vmatpush3.bf16.msra.mxu1 %v1794_v7  ;;  %v1798_v14 = vpack.i.b16 %v1797_v8, %v1796_v10 }
 0x49f   : > { %3544 = vmatprep.subr.bf16.mxu1 %v4114_v0 }
 0x4a1   : > { %3541 = vmatmul.mubr.msk.bf16.vlgmr.msra.gmra.mrb[20].mxu1 %vm1997_vm2, %v2086_v12 }
 0x4a2   : > { %3545 = vmatpush3.bf16.msra.mxu1 %v1798_v14  ;;  %3546 = vmatprep.mubr.msk.bf16.mxu1 %vm4115_vm0, %v4114_v0 }
 0x4a3   : > { %3550 = vmatprep.subr.bf16.mxu1 %v4114_v0 }
 0x4b3   : > { %v2054_v15 = vpop.xlane.xlu1 %2053 }
 0x4b4   : > { %3795 = vrcp.f32 %v2054_v15 }
 0x4b5   : > { %v2057_v13 = vpop.xlane.xlu0 %2056 }
 0x4b6   : > { %3797 = vrcp.f32 %v2057_v13 }
 0x4b7   : > { %v2063_v16 = vpop.xlane.xlu1 %2062 }
 0x4b9   : > { %v2060_v11 = vpop.xlane.xlu0 %2059 }
 0x4ba   : > { %3799 = vrcp.f32 %v2060_v11 }
 0x4bb   : > { %3801 = vrcp.f32 %v2063_v16  ;;  %v2069_v23 = vpop.xlane.xlu1 %2068 }
 0x4bd   : > { %v2066_v18 = vpop.xlane.xlu0 %2065 }
 0x4be   : > { %v3796_v17 = vpop.eup %3795  ;;  %3803 = vrcp.f32 %v2066_v18 }
 0x4bf   : > { %v2080_v21 = vmul.f32 %v3796_v17, %v4695_v33  ;;  %3805 = vrcp.f32 %v2069_v23  ;;  %v1805_v33 = vshrl.u32 %v1791_v20, 16 }
 0x4c0   : > { %v3798_v19 = vpop.eup %3797 }
 0x4c1   : > { %v2081_v22 = vmul.f32 %v3798_v19, %v4697_v34  ;;  %v1806_v35 = vpack.i.b16 %v1805_v33, %v1804_v30 }
 0x4c3   : > { %v2087_v25 = vpack.c.bf16 %v2081_v22, %v2080_v21 }
 0x4c4   : > { %v3800_v26 = vpop.eup %3799 }
 0x4c5   : > { %3547 = vmatmul.mubr.msk.bf16.vlgmr.msra.gmra.mrb[24].mxu1 %vm1997_vm2, %v2087_v25  ;;  %v3802_v28 = vpop.eup %3801  ;;  %v2082_v29 = vmul.f32 %v3800_v26, %v4705_v39 }
 0x4c6   : > { %3551 = vmatpush3.bf16.msra.mxu1 %v1802_v27  ;;  %3552 = vmatprep.mubr.msk.bf16.mxu1 %vm4115_vm0, %v4114_v0  ;;  %v2083_v34 = vmul.f32 %v3802_v28, %v4701_v36  ;;  %v3727_v36 = vld [vmem:[#allocation10] sm:$0xff]  }
 0x4c7   : > { %3556 = vmatprep.subr.bf16.mxu1 %v4114_v0  ;;  %3563 = vmatpush3.bf16.msra.mxu0 %v3727_v36 }
 0x4c8   : > { %v2088_v31 = vpack.c.bf16 %v2083_v34, %v2082_v29  ;;  %v3804_v32 = vpop.eup %3803  ;;  %3564 = vmatprep.subr.bf16.mxu0 %v4114_v0 }
 0x4c9   : > { %v3806_v37 = vpop.eup %3805  ;;  %v2084_v40 = vmul.f32 %v3804_v32, %v4713_v43  ;;  %v3732_v43 = vld [vmem:[#allocation10 + $0x28] sm:$0xff]  }
 0x4ca   : > { %v2085_v39 = vmul.f32 %v3806_v37, %v4709_v41  ;;  %v3731_v41 = vld [vmem:[#allocation10 + $0x20] sm:$0xff]  }
 0x4cb   : > { %3565 = vmatpush3.bf16.msra.mxu0 %v3728_v44 }
 0x4cc   : > { %v2089_v42 = vpack.c.bf16 %v2085_v39, %v2084_v40  ;;  %3566 = vmatprep.subr.bf16.mxu0 %v4114_v0 }
 0x4cd   : > { %3553 = vmatmul.mubr.msk.bf16.vlgmr.msra.gmra.mrb[28].mxu1 %vm1997_vm2, %v2088_v31 }
 0x4ce   : > { %3557 = vmatpush3.bf16.msra.mxu1 %v1806_v35  ;;  %3558 = vmatprep.mubr.msk.bf16.mxu1 %vm4115_vm0, %v4114_v0 }
 0x4cf   : > { %3567 = vmatpush3.bf16.msra.mxu0 %v3729_v45 }
 0x4d0   : > { %3568 = vmatprep.subr.bf16.mxu0 %v4114_v0 }
 0x4d3   : > { %3569 = vmatpush3.bf16.msra.mxu0 %v3730_v46 }
 0x4d4   : > { %3570 = vmatprep.subr.bf16.mxu0 %v4114_v0 }
 0x4d5   : > { %3559 = vmatmul.mubr.msk.bf16.vlgmr.msra.gmra.mrb[32].mxu1 %vm1997_vm2, %v2089_v42 }
 0x4d6   : > { %2842 = vmatprep.mubr.bf16.mxu1 %v4121_v52  ;;  %v3733_v52 = vld [vmem:[#allocation10 + $0x30] sm:$0xff]  }
 0x4d7   : > { %3571 = vmatpush3.bf16.msra.mxu0 %v3731_v41 }
 0x4d8   : > { %3572 = vmatprep.subr.bf16.mxu0 %v4114_v0 }
 0x4db   : > { %3573 = vmatpush3.bf16.msra.mxu0 %v3732_v43 }
 0x4dc   : > { %3574 = vmatprep.subr.bf16.mxu0 %v4114_v0 }
 0x4df   : > { %3575 = vmatpush3.bf16.msra.mxu0 %v3733_v52 }
 0x4e0   : > { %3576 = vmatprep.subr.bf16.mxu0 %v4114_v0 }
 0x574   : > { %v2127_v47 = vpop.f32.mrb[20].mxu1 }
 0x575   : > { %v3542_v49 = vpop.f32.mrb[21].mxu1 }
 0x576   : > { %v2130_v50 = vpop.f32.mrb[22].mxu1 }
 0x577   : > { %v2266_v51 = vpack.c.bf16 %v2130_v50, %v2127_v47  ;;  %v3543_v54 = vpop.f32.mrb[23].mxu1 }
 0x579   : > { %v2274_v61 = vshrl.u32 %v2266_v51, 16 }
 0x598   : > { %v2171_v55 = vpop.f32.mrb[24].mxu1 }
 0x599   : > { %v3548_v56 = vpop.f32.mrb[25].mxu1 }
 0x59a   : > { %v2174_v57 = vpop.f32.mrb[26].mxu1 }
 0x59b   : > { %v2267_v59 = vpack.c.bf16 %v2174_v57, %v2171_v55  ;;  %v3549_v60 = vpop.f32.mrb[27].mxu1 }
 0x59d   : > { %v2272_v62 = vpack.i.b16 %v2267_v59, %v2266_v51  ;;  %v2275_v63 = vshrl.u32 %v2267_v59, 16 }
 0x59f   : > { %v2276_v1 = vpack.i.b16 %v2275_v63, %v2274_v61  ;;  %v2286_v12 = vcombine.high %v2272_v62, %v4574_v53  ;;  %v2293_v16 = vrot.slane %v2272_v62, %v4577_v58  ;;  %v3734_v62 = vld [vmem:[#allocation10 + $0x38] sm:$0xff]  }
 0x5a0   : > { %v2215_v2 = vpop.f32.mrb[28].mxu1  ;;  %3577 = vmatpush3.bf16.msra.mxu0 %v3734_v62 }
 0x5a1   : > { %v3554_v3 = vpop.f32.mrb[29].mxu1  ;;  %v2300_v19 = vrot.slane %v2286_v12, %v4577_v58  ;;  %v2352_v20 = vcombine.high %v2276_v1, %v4574_v53  ;;  %v2359_v25 = vrot.slane %v2276_v1, %v4577_v58 }
 0x5a2   : > { %v2218_v4 = vpop.f32.mrb[30].mxu1 }
 0x5a3   : > { %v2268_v38 = vpack.c.bf16 %v2218_v4, %v2215_v2  ;;  %v3555_v5 = vpop.f32.mrb[31].mxu1  ;;  %v2366_v34 = vrot.slane %v2352_v20, %v4577_v58 }
 0x5a5   : > { %v2282_v14 = vshrl.u32 %v2268_v38, 16 }
 0x5a8   : > { %v2259_v0 = vpop.f32.mrb[32].mxu1 }
 0x5a9   : > { %v3560_v7 = vpop.f32.mrb[33].mxu1 }
 0x5aa   : > { %v2262_v8 = vpop.f32.mrb[34].mxu1 }
 0x5ab   : > { %v2269_v9 = vpack.c.bf16 %v2262_v8, %v2259_v0  ;;  %v3561_v10 = vpop.f32.mrb[35].mxu1 }
 0x5ad   : > { %v2280_v15 = vpack.i.b16 %v2269_v9, %v2268_v38  ;;  %v2283_v13 = vshrl.u32 %v2269_v9, 16 }
 0x5af   : > { %v2284_v11 = vpack.i.b16 %v2283_v13, %v2282_v14  ;;  %v2301_v17 = vcombine.high %v2280_v15, %v4574_v53  ;;  %v2308_v18 = vrot.slane %v2280_v15, %v4577_v58 }
 0x5b1   : > { %v2315_v21 = vrot.slane %v2301_v17, %v4577_v58  ;;  %v2316_v22 = vcombine.low %v2293_v16, %v2308_v18  ;;  %v2317_v23 = vcombine.high %v2293_v16, %v2308_v18  ;;  %v2367_v24 = vcombine.high %v2284_v11, %v4574_v53 }
 0x5b2   : > { %v2374_v26 = vrot.slane %v2284_v11, %v4577_v58 }
 0x5b3   : > { %v2324_v27 = vrot.slane %v2316_v22, %v4583_v6  ;;  %v2331_v28 = vrot.slane %v2317_v23, %v4583_v6  ;;  %v2332_v29 = vcombine.low %v2300_v19, %v2315_v21  ;;  %v2333_v33 = vcombine.high %v2300_v19, %v2315_v21  ;;  %v3327_v23 = vld [vmem:[%s4966_s30] ss:$0 sm:$0xff]  ;;  %s4970_s30 = sld [smem:[#allocation25_spill]] }
 0x5b4   : > { %v2381_v30 = vrot.slane %v2367_v24, %v4577_v58  ;;  %v2382_v31 = vcombine.low %v2359_v25, %v2374_v26  ;;  %v2383_v32 = vcombine.high %v2359_v25, %v2374_v26 }
 0x5b5   : > { %v2340_v35 = vrot.slane %v2332_v29, %v4583_v6  ;;  %v2347_v53 = vrot.slane %v2333_v33, %v4583_v6  ;;  %v2418_v37 = vcombine.low %v2324_v27, %v2331_v28  ;;  %v3323_v40 = vcombine.high %v2324_v27, %v2331_v28  ;;  %v3823_v33 = vld [vmem:[%s4497_s13] sm:$0xff] }
 0x5b6   : > { %v2390_v39 = vrot.slane %v2382_v31, %v4583_v6  ;;  %v2397_v42 = vrot.slane %v2383_v32, %v4583_v6  ;;  %v2398_v36 = vcombine.low %v2366_v34, %v2381_v30  ;;  %v2399_v44 = vcombine.high %v2366_v34, %v2381_v30  ;;  %v3824_v30 = vld [vmem:[%s4497_s13 + $0x8] sm:$0xff] }
 0x5b7   : > { %v2434_v45 = vcombine.low %v2340_v35, %v2347_v53  ;;  %v3324_v46 = vcombine.high %v2340_v35, %v2347_v53  ;;  %v2425_v41 = vrot.slane %v2418_v37, %v4577_v58  ;;  %v2433_v43 = vrot.slane %v3323_v40, %v4577_v58  ;;  %v3735_v32 = vld [vmem:[#allocation11] ss:$8 sps:$4 sm:$0xff]   ;;  %v3737_v35 = vld [vmem:[#allocation11 + $0x4] ss:$8 sps:$4 sm:$0xff]   ;;  %v3740_v53 = vld [vmem:[#allocation11 + $0x14] ss:$8 sps:$4 sm:$0xff]  }
 0x5b8   : > { %v2406_v52 = vrot.slane %v2398_v36, %v4583_v6  ;;  %v2413_v47 = vrot.slane %v2399_v44, %v4583_v6  ;;  %v2468_v49 = vcombine.low %v2390_v39, %v2397_v42  ;;  %v3325_v50 = vcombine.high %v2390_v39, %v2397_v42  ;;  %2810 = vmatprep.subr.bf16.mxu1 %v3737_v35  ;;  %v3738_v37 = vld [vmem:[#allocation11 + $0x10] ss:$8 sps:$4 sm:$0xff]  }
 0x5b9   : > { %v2441_v51 = vrot.slane %v2434_v45, %v4577_v58  ;;  %v2449_v54 = vrot.slane %v3324_v46, %v4577_v58  ;;  %v2450_v55 = vcombine.low %v2425_v41, %v2433_v43  ;;  %2811 = vmatpush1.bf16.msra.mxu1 %v3735_v32  ;;  %v3743_v43 = vld [vmem:[#allocation11 + $0x24] ss:$8 sps:$4 sm:$0xff]  }
 0x5ba   : > { %v2475_v56 = vrot.slane %v2468_v49, %v4577_v58  ;;  %v2483_v57 = vrot.slane %v3325_v50, %v4577_v58  ;;  %v2484_v59 = vcombine.low %v2406_v52, %v2413_v47  ;;  %v3326_v60 = vcombine.high %v2406_v52, %v2413_v47  ;;  %2812 = vmatprep.subr.bf16.mxu1 %v3740_v53  ;;  %v3741_v52 = vld [vmem:[#allocation11 + $0x20] ss:$8 sps:$4 sm:$0xff]   ;;  %v3746_v47 = vld [vmem:[#allocation11 + $0x34] ss:$8 sps:$4 sm:$0xff]   ;;  %v3744_v49 = vld [vmem:[#allocation11 + $0x30] ss:$8 sps:$4 sm:$0xff]  }
 0x5bb   : > { %v2458_v61 = vcombine.low %v2441_v51, %v2449_v54  ;;  %v2457_v3 = vrot.slane %v2450_v55, %v4583_v6  ;;  %v3749_v50 = vld [vmem:[#allocation11 + $0x44] ss:$8 sps:$4 sm:$0xff]   ;;  %v3747_v51 = vld [vmem:[#allocation11 + $0x40] ss:$8 sps:$4 sm:$0xff]   ;;  %v3752_v54 = vld [vmem:[#allocation11 + $0x54] ss:$8 sps:$4 sm:$0xff]  }
 0x5bc   : > { %v2491_v63 = vrot.slane %v2484_v59, %v4577_v58  ;;  %v2499_v1 = vrot.slane %v3326_v60, %v4577_v58  ;;  %v2500_v2 = vcombine.low %v2475_v56, %v2483_v57  ;;  %v3750_v55 = vld [vmem:[#allocation11 + $0x50] ss:$8 sps:$4 sm:$0xff]   ;;  %v3753_v56 = vld [vmem:[#allocation11 + $0x60] ss:$8 sps:$4 sm:$0xff]   ;;  %v3755_v57 = vld [vmem:[#allocation11 + $0x64] ss:$8 sps:$4 sm:$0xff]  }
 0x5bd   : > { %v2465_v4 = vrot.slane %v2458_v61, %v4583_v6  ;;  %2813 = vmatpush1.bf16.msra.mxu1 %v3738_v37  ;;  %v3758_v59 = vld [vmem:[#allocation11 + $0x74] ss:$8 sps:$4 sm:$0xff]   ;;  %v3756_v60 = vld [vmem:[#allocation11 + $0x70] ss:$8 sps:$4 sm:$0xff]  }
 0x5be   : > { %v2508_v38 = vcombine.low %v2491_v63, %v2499_v1  ;;  %v2507_v7 = vrot.slane %v2500_v2, %v4583_v6  ;;  %2814 = vmatprep.subr.bf16.mxu1 %v3743_v43 }
 0x5bf   : > { %v2467_v5 = vcombine.high %v2457_v3, %v2465_v4  ;;  %v2466_v0 = vcombine.low %v2457_v3, %v2465_v4 }
 0x5c0   : > { %v2515_v8 = vrot.slane %v2508_v38, %v4583_v6 }
 0x5c1   : > { %v2521_v12 = vshrl.u32 %v2466_v0, 16  ;;  %v2527_v14 = vshrl.u32 %v2467_v5, 16  ;;  %2815 = vmatpush1.bf16.msra.mxu1 %v3741_v52 }
 0x5c2   : > { %v2517_v9 = vcombine.high %v2507_v7, %v2515_v8  ;;  %v2516_v10 = vcombine.low %v2507_v7, %v2515_v8  ;;  %2816 = vmatprep.subr.bf16.mxu1 %v3746_v47 }
 0x5c4   : > { %v2526_v15 = vpack.i.b16 %v2517_v9, %v2467_v5  ;;  %v2522_v13 = vshrl.u32 %v2516_v10, 16  ;;  %v2528_v58 = vshrl.u32 %v2517_v9, 16  ;;  %v2520_v16 = vpack.i.b16 %v2516_v10, %v2466_v0  ;;  %v3336_v5 = vld [vmem:[%s4967_s8] ss:$0 sm:$0xff]  ;;  %s4971_s8 = sld [smem:[#allocation28_spill]] }
 0x5c5   : > { %2817 = vmatpush1.bf16.msra.mxu1 %v3744_v49 }
 0x5c6   : > { %2532 = vrot.lane.b32.xlu1 %v2526_v15, %s4118_s15  ;;  %v2523_v11 = vpack.i.b16 %v2522_v13, %v2521_v12  ;;  %v2529_v17 = vpack.i.b16 %v2528_v58, %v2527_v14  ;;  %2818 = vmatprep.subr.bf16.mxu1 %v3749_v50  ;;  %v3759_v13 = vld [vmem:[#allocation13 + $0x40] sm:$0xff]   ;;  %s3379_s15 = sshll.u32 %s4236_s0, 8 }
 0x5c7   : > { %v3760_v58 = vld [vmem:[#allocation13] sm:$0xff]   ;;  %3432 = vmatprep.subr.bf16.mxu0 %v3759_v13 }
 0x5c8   : > { %2530 = vrot.lane.b32.xlu0 %v2523_v11, %s4116_s5  ;;  %v3762_v11 = vld [vmem:[#allocation13 + $0x8] sm:$0xff]  }
 0x5c9   : > { %2819 = vmatpush1.bf16.msra.mxu1 %v3747_v51 }
 0x5ca   : > { %2534 = vrot.lane.b32.xlu1 %v2529_v17, %s4117_s28  ;;  %2820 = vmatprep.subr.bf16.mxu1 %v3752_v54  ;;  %s4968_s28 = sld [smem:[#allocation27_spill]]  ;;  %v3763_v17 = vld [vmem:[#allocation13 + $0x50] sm:$0xff]  }
 0x5cd   : > { %2821 = vmatpush1.bf16.msra.mxu1 %v3750_v55 }
 0x5ce   : > { %2822 = vmatprep.subr.bf16.mxu1 %v3755_v57 }
 0x5d0   : > { %v3337_v9 = vld [vmem:[%s4968_s28] ss:$0 sm:$0xff]  ;;  %s4972_s28 = sld [smem:[#allocation29_spill]] }
 0x5d1   : > { %2823 = vmatpush1.bf16.msra.mxu1 %v3753_v56 }
 0x5d2   : > { %2824 = vmatprep.subr.bf16.mxu1 %v3758_v59 }
 0x5d5   : > { %2825 = vmatpush1.bf16.msra.mxu1 %v3756_v60 }
 0x638   : > { %v2533_v18 = vpop.permute.xlu1 %2532 }
 0x63a   : > { %v2531_v6 = vpop.permute.xlu0 %2530 }
 0x63b   : > { %v2538_v19 = vsel %vm1808_vm1, %v2520_v16, %v2531_v6  ;;  %v3761_v16 = vld [vmem:[#allocation13 + $0x48] sm:$0xff]   ;;  %v3765_v6 = vld [vmem:[#allocation13 + $0x58] sm:$0xff]  }
 0x63c   : > { %v2535_v20 = vpop.permute.xlu1 %2534  ;;  %v2541_v21 = vsel %vm2539_vm3, %v2538_v19, %v2533_v18  ;;  %v3764_v18 = vld [vmem:[#allocation13 + $0x10] sm:$0xff]   ;;  %v3766_v19 = vld [vmem:[#allocation13 + $0x18] sm:$0xff]  }
 0x63d   : > { %v2544_v22 = vsel %vm2542_vm4, %v2541_v21, %v2535_v20  ;;  %v3767_v20 = vld [vmem:[#allocation13 + $0x60] sm:$0xff]  }
 0x63e   : > { %3579 = vmatmul.mubr.bf16.vlgmr.msra.gmra.mrb[8].mxu0 %v2544_v22  ;;  %v3768_v21 = vld [vmem:[#allocation13 + $0x20] sm:$0xff]   ;;  %v3769_v22 = vld [vmem:[#allocation13 + $0x68] sm:$0xff]  }
 0x63f   : > { %3433 = vmatpush3.bf16.msra.mxu0 %v3760_v58 }
 0x640   : > { %3434 = vmatprep.subr.bf16.mxu0 %v3761_v16 }
 0x643   : > { %3435 = vmatpush3.bf16.msra.mxu0 %v3762_v11 }
 0x644   : > { %3436 = vmatprep.subr.bf16.mxu0 %v3763_v17 }
 0x647   : > { %3437 = vmatpush3.bf16.msra.mxu0 %v3764_v18 }
 0x648   : > { %3438 = vmatprep.subr.bf16.mxu0 %v3765_v6  ;;  %v3354_v6 = vld [vmem:[%s4970_s30] ss:$0 sm:$0xff]  ;;  %s4973_s30 = sld [smem:[#allocation30_spill]] }
 0x64b   : > { %3439 = vmatpush3.bf16.msra.mxu0 %v3766_v19 }
 0x64c   : > { %3440 = vmatprep.subr.bf16.mxu0 %v3767_v20 }
 0x64e   : > { %s4857_s13 = scalar_lea.hbm %s4973_s30, %s3379_s15 }
 0x64f   : > { %3441 = vmatpush3.bf16.msra.mxu0 %v3768_v21 }
 0x650   : > { %3442 = vmatprep.subr.bf16.mxu0 %v3769_v22 }
 0x711   : > { %v2651_v24 = vpop.f32.mrb[8].mxu0 }
 0x712   : > { %v2652_v25 = vadd.f32 %v3327_v23, %v2651_v24  ;;  %v3580_v26 = vpop.f32.mrb[9].mxu0  ;;  %v3771_v24 = vld [vmem:[#allocation13 + $0x70] sm:$0xff]  }
 0x713   : > { %v2654_v27 = vpop.f32.mrb[10].mxu0  ;;  %v3773_v26 = vld [vmem:[#allocation13 + $0x78] sm:$0xff]  }
 0x714   : > { %v2655_v28 = vadd.f32 %v3327_v23, %v2654_v27  ;;  %v3581_v29 = vpop.f32.mrb[11].mxu0  ;;  %v2658_v34 = vadd.f32 %v3823_v33, %v2652_v25  ;;  %v3770_v23 = vld [vmem:[#allocation13 + $0x28] sm:$0xff]   ;;  %v3772_v25 = vld [vmem:[#allocation13 + $0x30] sm:$0xff]   ;;  %v3774_v27 = vld [vmem:[#allocation13 + $0x38] sm:$0xff]   ;;  %v2726_v33 = vsub.s32 1, %v4570_v48 }
 0x715   : > { %3443 = vmatpush3.bf16.msra.mxu0 %v3770_v23  ;;  %v2718_v29 = vld [vmem:[%s4969_s23] sm:$0x3]  ;;  %s3125_s23 = sshll.u32 %s653_s19, 4  ;;  %s4859_s23 = int_to_ptr.vmem [resolvable:$true] %s3125_s23 }
 0x716   : > { %2660 = vadd.xlane.f32.xlu0 %v2658_v34  ;;  %v2659_v31 = vadd.f32 %v3824_v30, %v2655_v28  ;;  %3444 = vmatprep.subr.bf16.mxu0 %v3771_v24  ;;  %v2722_v28 = vsub.s32 0, %v4570_v48  ;;  %v2727_v30 = vrot.slane %v2718_v29, %v2726_v33  ;;  %s4023_s0 = scalar_lea.vmem %s4859_s23, 256 }
 0x717   : > { %p4024_p6 = scmp.ne.s32.totalorder %s4859_s23, %s4023_s0 }
 0x718   : > { %2662 = vadd.xlane.f32.xlu1 %v2659_v31 }
 0x719   : > { %3445 = vmatpush3.bf16.msra.mxu0 %v3772_v25  ;;  %p4025_p12 = pnand %p4024_p6, %p4974_p9 }
 0x71a   : > { %3446 = vmatprep.subr.bf16.mxu0 %v3773_v26 }
 0x71b   : > { %p4026_p1 = pneg %p4025_p12 }
 0x71d   : > { %3447 = vmatpush3.bf16.msra.mxu0 %v3774_v27 }
 0x7a3   : > { %v2661_v40 = vpop.xlane.xlu0 %2660 }
 0x7a4   : > { %v2665_v39 = vmul.f32 0.0078125, %v2661_v40 }
 0x7a5   : > { %v2663_v42 = vpop.xlane.xlu1 %2662 }
 0x7a6   : > { %v2667_v36 = vsub.f32 %v2658_v34, %v2665_v39  ;;  %v2666_v44 = vmul.f32 0.0078125, %v2663_v42  ;;  %v2723_v34 = vrot.slane %v2718_v29, %v2722_v28 }
 0x7a8   : > { %v2668_v45 = vsub.f32 %v2659_v31, %v2666_v44  ;;  %v2669_v46 = vmul.f32 %v2667_v36, %v2667_v36 }
 0x7aa   : > { %2671 = vadd.xlane.f32.xlu0 %v2669_v46  ;;  %v2670_v41 = vmul.f32 %v2668_v45, %v2668_v45 }
 0x7ae   : > { %2673 = vadd.xlane.f32.xlu0 %v2670_v41 }
 0x837   : > { %v2672_v61 = vpop.xlane.xlu0 %2671 }
 0x838   : > { %v2675_v62 = vmul.f32 0.0078125, %v2672_v61 }
 0x83a   : > { %v2677_v63 = vadd.f32 1e-05, %v2675_v62 }
 0x83b   : > { %v2674_v1 = vpop.xlane.xlu0 %2673 }
 0x83c   : > { %3807 = vrsqrt.f32 %v2677_v63  ;;  %v2676_v2 = vmul.f32 0.0078125, %v2674_v1 }
 0x83e   : > { %v2678_v3 = vadd.f32 1e-05, %v2676_v2 }
 0x840   : > { %3809 = vrsqrt.f32 %v2678_v3 }
 0x846   : > { %v3808_v4 = vpop.eup %3807 }
 0x847   : > { %v2681_v38 = vmul.f32 %v3808_v4, %v2667_v36 }
 0x849   : > { %v2690_v8 = vmul.f32 %v3336_v5, %v2681_v38 }
 0x84a   : > { %v3810_v0 = vpop.eup %3809 }
 0x84b   : > { %v2682_v7 = vmul.f32 %v3810_v0, %v2668_v45  ;;  %v4829_v12 = vadd.f32 %v3337_v9, %v2690_v8 }
 0x84d   : > { %v2691_v10 = vmul.f32 %v3336_v5, %v2682_v7 }
 0x84f   : > { %v4831_v14 = vadd.f32 %v3337_v9, %v2691_v10 }
 0x851   : > { %v2701_v15 = vpack.c.bf16 %v4831_v14, %v4829_v12 }
 0x853   : > { %2843 = vmatmul.mubr.bf16.vlgmr.msra.gmra.mrb[36].mxu1 %v2701_v15 }
 0x926   : > { %v2844_v31 = vpop.f32.mrb[36].mxu1 }
 0x927   : > { %v2845_v32 = vadd.f32 %v2844_v31, %v2723_v34  ;;  %v2846_v35 = vpop.f32.mrb[37].mxu1 }
 0x928   : > { %v2847_v53 = vadd.f32 %v2846_v35, %v2727_v30  ;;  %v2848_v37 = vpop.f32.mrb[38].mxu1 }
 0x929   : > { %v2853_v40 = vmul.f32 %v2845_v32, %v2845_v32  ;;  %v2849_v39 = vadd.f32 %v2848_v37, %v2723_v34  ;;  %v2850_v42 = vpop.f32.mrb[39].mxu1 }
 0x92a   : > { %v2854_v36 = vmul.f32 %v2847_v53, %v2847_v53  ;;  %v2851_v44 = vadd.f32 %v2850_v42, %v2727_v30 }
 0x92b   : > { %v2857_v45 = vmul.f32 %v2853_v40, %v2845_v32  ;;  %v2855_v46 = vmul.f32 %v2849_v39, %v2849_v39 }
 0x92c   : > { %v2858_v41 = vmul.f32 %v2854_v36, %v2847_v53  ;;  %v2856_v43 = vmul.f32 %v2851_v44, %v2851_v44  ;;  %v3371_v36 = vld [vmem:[%s4971_s8] ss:$0 sm:$0xff]  ;;  %s4027_s8 = sshll.u32 %s4122_s1, 4  ;;  %s4028_s8 = int_to_ptr.vmem [resolvable:$false] %s4027_s8 }
 0x92d   : > { %v2861_v52 = vmul.f32 0.044715, %v2857_v45  ;;  %v2859_v47 = vmul.f32 %v2855_v46, %v2849_v39  ;;  %v3372_v46 = vld [vmem:[%s4972_s28] ss:$0 sm:$0xff]  ;;  %s4029_s16 = scalar_lea.vmem %s4028_s8, 512  ;;  %p4030_p13 = scmp.lt.s32.totalorder %s4859_s23, %s4028_s8 }
 0x92e   : > { %v2862_v49 = vmul.f32 0.044715, %v2858_v41  ;;  %v2860_v48 = vmul.f32 %v2856_v43, %v2851_v44  ;;  %p4031_p0 = scmp.lt.s32.totalorder %s4029_s16, %s4023_s0 }
 0x92f   : > { %v2865_v50 = vadd.f32 %v2861_v52, %v2845_v32  ;;  %v2863_v51 = vmul.f32 0.044715, %v2859_v47 }
 0x930   : > { %v2866_v54 = vadd.f32 %v2862_v49, %v2847_v53  ;;  %v2864_v55 = vmul.f32 0.044715, %v2860_v48  ;;  %p4032_p2 = por %p4031_p0, %p4030_p13 }
 0x931   : > { %v2869_v56 = vmul.f32 0.7978846, %v2865_v50  ;;  %v2867_v57 = vadd.f32 %v2863_v51, %v2849_v39 }
 0x932   : > { %v2870_v59 = vmul.f32 0.7978846, %v2866_v54  ;;  %v2868_v60 = vadd.f32 %v2864_v55, %v2851_v44  ;;  %p4033_p8 = pnand %p4032_p2, %p4026_p1 }
 0x933   : > { %3811 = vtanh.f32 %v2869_v56  ;;  %v2871_v61 = vmul.f32 0.7978846, %v2867_v57 }
 0x934   : > { %3813 = vtanh.f32 %v2870_v59  ;;  %v2872_v62 = vmul.f32 0.7978846, %v2868_v60 }
 0x935   : > { %3815 = vtanh.f32 %v2871_v61 }
 0x936   : > { %3817 = vtanh.f32 %v2872_v62 }
 0x93d   : > { %v3812_v63 = vpop.eup %3811 }
 0x93e   : > { %v3814_v1 = vpop.eup %3813  ;;  %v2877_v2 = vadd.f32 1.0, %v3812_v63 }
 0x93f   : > { %v3816_v3 = vpop.eup %3815  ;;  %v2878_v4 = vadd.f32 1.0, %v3814_v1 }
 0x940   : > { %v3818_v38 = vpop.eup %3817  ;;  %v2881_v5 = vmul.f32 0.5, %v2877_v2  ;;  %v2879_v0 = vadd.f32 1.0, %v3816_v3 }
 0x941   : > { %v2880_v7 = vadd.f32 1.0, %v3818_v38  ;;  %v2882_v8 = vmul.f32 0.5, %v2878_v4 }
 0x942   : > { %v2883_v9 = vmul.f32 0.5, %v2879_v0  ;;  %v2885_v15 = vmul.f32 %v2881_v5, %v2845_v32 }
 0x943   : > { %v2884_v10 = vmul.f32 0.5, %v2880_v7  ;;  %v2886_v58 = vmul.f32 %v2882_v8, %v2847_v53 }
 0x944   : > { %v2887_v13 = vmul.f32 %v2883_v9, %v2849_v39 }
 0x945   : > { %v2888_v16 = vmul.f32 %v2884_v10, %v2851_v44 }
 0x946   : > { %v2889_v11 = vpack.c.bf16 %v2887_v13, %v2885_v15 }
 0x947   : > { %v2890_v17 = vpack.c.bf16 %v2888_v16, %v2886_v58 }
 0x949   : > { %3058 = vmatprep.mubr.bf16.mxu0 %v2890_v17 }
 0x94a   : > { %3059 = vmatmul.mubr.bf16.vlgmr.msra.gmra.mrb[12].mxu0 %v2889_v11 }
 0xa1d   : > { %v3448_v18 = vpop.f32.mrb[12].mxu0 }
 0xa1e   : > { %v3449_v19 = vpop.f32.mrb[13].mxu0 }
 0xa1f   : > { %v3450_v20 = vadd.f32 %v3449_v19, %v3448_v18  ;;  %v3451_v21 = vpop.f32.mrb[14].mxu0 }
 0xa20   : > { %v3452_v22 = vpop.f32.mrb[15].mxu0 }
 0xa21   : > { %v3061_v23 = vadd.f32 %v3450_v20, %v3354_v6  ;;  %v3453_v24 = vadd.f32 %v3452_v22, %v3451_v21 }
 0xa23   : > { %v3064_v25 = vadd.f32 %v3453_v24, %v3354_v6  ;;  %v3067_v26 = vadd.f32 %v3061_v23, %v4829_v12 }
 0xa25   : > { %3069 = vadd.xlane.f32.xlu1 %v3067_v26  ;;  %v3068_v27 = vadd.f32 %v3064_v25, %v4831_v14 }
 0xa27   : > { %3071 = vadd.xlane.f32.xlu0 %v3068_v27 }
 0xab2   : > { %v3070_v28 = vpop.xlane.xlu1 %3069 }
 0xab3   : > { %v3073_v29 = vmul.f32 0.0078125, %v3070_v28 }
 0xab4   : > { %v3072_v33 = vpop.xlane.xlu0 %3071 }
 0xab5   : > { %v3075_v34 = vsub.f32 %v3067_v26, %v3073_v29  ;;  %v3074_v30 = vmul.f32 0.0078125, %v3072_v33 }
 0xab7   : > { %v3076_v31 = vsub.f32 %v3068_v27, %v3074_v30  ;;  %v3077_v32 = vmul.f32 %v3075_v34, %v3075_v34 }
 0xab9   : > { %3079 = vadd.xlane.f32.xlu1 %v3077_v32  ;;  %v3078_v35 = vmul.f32 %v3076_v31, %v3076_v31 }
 0xabb   : > { %3081 = vadd.xlane.f32.xlu0 %v3078_v35 }
 0xb46   : > { %v3080_v53 = vpop.xlane.xlu1 %3079 }
 0xb47   : > { %v3083_v37 = vmul.f32 0.0078125, %v3080_v53 }
 0xb48   : > { %v3082_v40 = vpop.xlane.xlu0 %3081 }
 0xb49   : > { %v3085_v12 = vadd.f32 1e-05, %v3083_v37  ;;  %v3084_v39 = vmul.f32 0.0078125, %v3082_v40 }
 0xb4b   : > { %3819 = vrsqrt.f32 %v3085_v12  ;;  %v3086_v14 = vadd.f32 1e-05, %v3084_v39 }
 0xb4d   : > { %3821 = vrsqrt.f32 %v3086_v14 }
 0xb55   : > { %v3820_v42 = vpop.eup %3819 }
 0xb56   : > { %v3089_v44 = vmul.f32 %v3820_v42, %v3075_v34 }
 0xb57   : > { %v3822_v45 = vpop.eup %3821 }
 0xb58   : > { %v3098_v41 = vmul.f32 %v3371_v36, %v3089_v44  ;;  %v3090_v43 = vmul.f32 %v3822_v45, %v3076_v31 }
 0xb5a   : > { %v3107_v52 = vadd.f32 %v3372_v46, %v3098_v41  ;;  %v3099_v47 = vmul.f32 %v3371_v36, %v3090_v43 }
 0xb5c   : > { %v3108_v49 = vadd.f32 %v3372_v46, %v3099_v47  ;;  %3109 = vst [vmem:[%s653_s19] sm:$0xff] %v3107_v52 }
 0xb5e   : > { %3110 = vst [vmem:[%s653_s19 + $0x8] sm:$0xff] %v3108_v49 }
 0xb5f   : > { %4036 = shalt.err (!%p4033_p8)
}
 0xb60   : > { %s4037_s5 = scalar_lea.hbm %s4857_s13, 256  ;;  %s4041_s19 = scalar_lea.hbm %s4973_s30, 512 }
 0xb61   : > { %p4038_p4 = scmp.ne.s32.totalorder %s4857_s13, %s4037_s5  ;;  %p4042_p3 = scmp.lt.u32.totalorder %s4857_s13, %s4973_s30 }
 0xb62   : > { %p4043_p5 = scmp.lt.u32.totalorder %s4041_s19, %s4037_s5  ;;  %p4045_p6 = scmp.lt.u32.totalorder %s4037_s5, %s4857_s13 }
 0xb63   : > { %p4039_p10 = pnand %p4038_p4, %p4974_p9 }
 0xb64   : > { %p4044_p7 = por %p4043_p5, %p4042_p3 }
 0xb65   : > { %p4040_p11 = pneg %p4039_p10 }
 0xb66   : > { %p4046_p12 = por %p4045_p6, %p4044_p7 }
 0xb68   : > { %p4047_p1 = pnand %p4046_p12, %p4040_p11 }
 0xb6a   : > { %4050 = shalt.err (!%p4047_p1)
}
 0xb6b   : > { %s4123_s0 = smov 128   ;;  %s4124_s1 = smov 8  }
 0xb6c   : > { %3608 = dma.vmem_to_hbm [thread:$0]  (%p4974_p9), %s4859_s23, 256, %s4857_s13, %s3112_s29, %s4123_s0, %s4123_s0, %s4124_s1  }
 0xb6d PF: > { %s3140_s8 = sand.u32 1, %s4089_s24   ;;  %p4975_p13 = scmp.ne.s32.totalorder %s4955_s20, 0 }
 0xb6e   : > { %p4976_p0 = scmp.ge.s32.totalorder %s4101_s27, 2  ;;  %s3141_s16 = scalar_lea.sflag [#allocation4], %s3140_s8 }
 0xb70   : > { %p3634_p2 = pnand %p4976_p0, %p4975_p13 }
 0xb72   : > { %4084 = dma.done.wait (!%p3634_p2), %s3141_s16, 256  }
 0xb73   : > { %4086 = vsyncadd (!%p3634_p2), %s3141_s16, 4294967040  ;;  %p33_p8 = scmp.ge.s32.totalorder %s4409_s18, 4   ;;  %s4977_s24 = smov %s4093_s25 }
 0xb74   : > { %s4978_s25 = smov %s4097_s26  ;;  %s4979_s26 = smov %s4420_s14 }
 0xb75   : > { %s4980_s27 = smov %s4409_s18  ;;  %35 = sbr.rel (!%p33_p8) target bundleno = 20 (0x14), region = 157 }
 0xb7c   :  { %3146 = vsyncpa [#allocation3], 1 }
 0xb7d   :  { %3148 = vsyncpa [#allocation3 + $0x1], 1 }
 0xb7e   :  { %3149 = vsyncpa [#allocation6], 1 }
 0xb7f   :  { %3150 = vsyncpa [#allocation9], 1 }
 0xb80   :  { %3151 = vsyncpa [#allocation12], 1 }
 0xb81   :  { %3152 = vsyncpa [#allocation4], 1 }
 0xb82   :  { %3154 = vsyncpa [#allocation4 + $0x1], 1 }

</bundles_post_ra>
